<compile_context>
chip_gen: v7x
topology: tpu7x:2x2x1
jax: 0.10.0
libtpu: 0.0.40
codegen_flags: <defaults>
</compile_context>

<pallas_src>
import functools

import jax
import jax.numpy as jnp
from jax import lax
from jax.experimental import pallas as pl
from jax.experimental.pallas import tpu as pltpu


def _round_up(x, m):
    return ((x + m - 1) // m) * m


def _fused_channel_context_kernel(x_ref, w1_ref, b1_ref, w2_ref, b2_ref,
                                  w3_ref, b3_ref, mask_ref, o_ref,
                                  aext_ref, slab_ref, *, H, W):
    """One image: three fused 5x5 'same' convs, activations resident in VMEM.

    aext_ref : (Cp, L + 2*M0) padded activation with M0 = 2*Wp+2 zero-margin lanes on
               each side so every tap shift is a static, in-bounds lane slice.
    slab_ref : (25*Cp, L) im2col slab -- the 25 taps folded into the contraction axis.
    """
    Hp, Wp = H + 4, W + 4
    L = Hp * Wp
    M0 = 2 * Wp + 2                       # largest |flat shift| over the 25 taps

    mask = mask_ref[...]                  # (1, L): 1 inside valid HxW window, 0 in halo

    # Zero the extended buffer once (margins must not hold stale garbage/NaNs).
    aext_ref[...] = jnp.zeros(aext_ref.shape, jnp.float32)
    # Layer-1 input (channel-padded to Cp and spatially padded in the wrapper).
    aext_ref[:, M0:M0 + L] = x_ref[0]

    def conv5x5(w_ref, b_ref, relu):
        cin = aext_ref.shape[0]           # Cp
        # Build the im2col slab: 25 shifted copies, taps folded onto the sublane axis.
        for t in range(25):
            dy, dx = t // 5, t % 5
            s = (dy - 2) * Wp + (dx - 2)
            slab_ref[t * cin:(t + 1) * cin, :] = aext_ref[:, M0 + s:M0 + s + L]
        # Single fat MXU matmul: (Cout, 25*Cp) x (25*Cp, L) -> (Cout, L), f32 accumulate.
        acc = jnp.dot(w_ref[...], slab_ref[...],
                      preferred_element_type=jnp.float32)
        acc = acc + b_ref[...]            # (Cout, 1) broadcasts over lanes
        if relu:
            acc = jnp.maximum(acc, 0.0)
        return acc                        # (Cout, L)

    # Layer 1 (+ReLU); mask re-zeroes the halo so it acts as padding for layer 2.
    h = conv5x5(w1_ref, b1_ref, relu=True) * mask
    # Rows h.shape[0]..Cp of aext may keep old data; harmless because the padded
    # weight columns for those channels are zero.
    aext_ref[0:h.shape[0], M0:M0 + L] = h

    # Layer 2 (+ReLU).
    h = conv5x5(w2_ref, b2_ref, relu=True) * mask
    aext_ref[0:h.shape[0], M0:M0 + L] = h

    # Layer 3 (no ReLU).  Halo positions are sliced away in the wrapper.
    out = conv5x5(w3_ref, b3_ref, relu=False)
    o_ref[0] = out.astype(o_ref.dtype)


def _prep_weight(w_oihw, Cp):
    """OIHW (Cout, Cin, 5, 5) -> (Cout, 25*Cp), tap-major / channel-minor, Cin zero-padded."""
    Cout, Cin, _, _ = w_oihw.shape
    w = jnp.pad(w_oihw, ((0, 0), (0, Cp - Cin), (0, 0), (0, 0)))
    return jnp.transpose(w, (0, 2, 3, 1)).reshape(Cout, 25 * Cp)


@jax.jit
def channel_context_forward(x_nchw, params):
    """Equivalent of ChannelContext.forward: NCHW in -> NCHW out."""
    N, Cin, H, W = x_nchw.shape
    Mk = params["w1"].shape[0]
    Cout3 = params["w3"].shape[0]         # 2*Mk
    Hp, Wp = H + 4, W + 4
    L = Hp * Wp
    Cp = _round_up(max(Cin, Mk), 8)       # uniform padded Cin for all three layers
    M0 = 2 * Wp + 2
    Lext = L + 2 * M0

    # Input: pad channels to Cp, spatial by the 2-pixel halo, flatten spatial (once).
    xp = jnp.pad(x_nchw, ((0, 0), (0, Cp - Cin), (2, 2), (2, 2)))
    x_flat = xp.reshape(N, Cp, L)

    # Weights in lane-friendly (Cout, 25*Cp) layout, biases as (Cout, 1).
    w1 = _prep_weight(params["w1"], Cp); b1 = params["b1"].reshape(-1, 1)
    w2 = _prep_weight(params["w2"], Cp); b2 = params["b2"].reshape(-1, 1)
    w3 = _prep_weight(params["w3"], Cp); b3 = params["b3"].reshape(-1, 1)

    # 0/1 mask of the valid HxW window inside the padded (Hp, Wp) frame.
    mask = jnp.zeros((Hp, Wp), jnp.float32).at[2:2 + H, 2:2 + W].set(1.0).reshape(1, L)

    kernel = functools.partial(_fused_channel_context_kernel, H=H, W=W)
    out_flat = pl.pallas_call(
        kernel,
        out_shape=jax.ShapeDtypeStruct((N, Cout3, L), jnp.float32),
        grid=(N,),
        in_specs=[
            pl.BlockSpec((1, Cp, L), lambda n: (n, 0, 0)),
            pl.BlockSpec((Mk, 25 * Cp), lambda n: (0, 0)),
            pl.BlockSpec((Mk, 1), lambda n: (0, 0)),
            pl.BlockSpec((Mk, 25 * Cp), lambda n: (0, 0)),
            pl.BlockSpec((Mk, 1), lambda n: (0, 0)),
            pl.BlockSpec((Cout3, 25 * Cp), lambda n: (0, 0)),
            pl.BlockSpec((Cout3, 1), lambda n: (0, 0)),
            pl.BlockSpec((1, L), lambda n: (0, 0)),
        ],
        out_specs=pl.BlockSpec((1, Cout3, L), lambda n: (n, 0, 0)),
        scratch_shapes=[
            pltpu.VMEM((Cp, Lext), jnp.float32),      # padded activation + shift margins
            pltpu.VMEM((25 * Cp, L), jnp.float32),    # im2col slab (taps folded into K)
        ],
        compiler_params=pltpu.CompilerParams(
            dimension_semantics=("parallel",)),       # batch axis -> both TCs on v7x
    )(x_flat, w1, b1, w2, b2, w3, b3, mask)

    # Drop the halo: (N, 2*Mk, Hp, Wp) -> (N, 2*Mk, H, W).  Already NCHW.
    return out_flat.reshape(N, Cout3, Hp, Wp)[:, :, 2:2 + H, 2:2 + W]


def init_channel_context_params(key, Mk, y_hat_channels):
    """Deterministic synthetic parameters in PyTorch OIHW layout."""
    ks = jax.random.split(key, 6)
    s = 0.1
    return dict(
        w1=s * jax.random.normal(ks[0], (Mk, y_hat_channels, 5, 5), jnp.float32),
        b1=s * jax.random.normal(ks[1], (Mk,), jnp.float32),
        w2=s * jax.random.normal(ks[2], (Mk, Mk, 5, 5), jnp.float32),
        b2=s * jax.random.normal(ks[3], (Mk,), jnp.float32),
        w3=s * jax.random.normal(ks[4], (2 * Mk, Mk, 5, 5), jnp.float32),
        b3=s * jax.random.normal(ks[5], (2 * Mk,), jnp.float32),
    )


def _reference_forward(x_nchw, params):
    """Pure-JAX (XLA conv) reference for correctness checking."""
    def conv(x, w_oihw, b, relu):
        y = lax.conv_general_dilated(
            x, w_oihw, window_strides=(1, 1), padding=((2, 2), (2, 2)),
            dimension_numbers=("NCHW", "OIHW", "NCHW"),
            precision=lax.Precision.HIGHEST)
        y = y + b.reshape(1, -1, 1, 1)
        return jnp.maximum(y, 0.0) if relu else y

    h = conv(x_nchw, params["w1"], params["b1"], True)
    h = conv(h, params["w2"], params["b2"], True)
    return conv(h, params["w3"], params["b3"], False)


if __name__ == "__main__":
    Mk = 8
    y_hat_channels = 4
    N, H, W = 2, 16, 16

    key = jax.random.PRNGKey(0)
    k_x, k_p = jax.random.split(key)
    x = jax.random.normal(k_x, (N, y_hat_channels, H, W), jnp.float32)
    params = init_channel_context_params(k_p, Mk, y_hat_channels)

    out = jax.block_until_ready(channel_context_forward(x, params))
    assert out.shape == (N, 2 * Mk, H, W), out.shape

    ref = jax.block_until_ready(_reference_forward(x, params))
    err = float(jnp.max(jnp.abs(out - ref)))
    assert err < 1e-3, err

    print("KERNEL_OK")
</pallas_src>

<mosaic_0001>
module attributes {stable_mosaic.version = 11 : i64} {
  func.func @_fused_channel_context_kernel(%arg0: i32, %arg1: memref<1x8x400xf32, #tpu.memory_space<vmem>>, %arg2: memref<8x200xf32, #tpu.memory_space<vmem>>, %arg3: memref<8x1xf32, #tpu.memory_space<vmem>>, %arg4: memref<8x200xf32, #tpu.memory_space<vmem>>, %arg5: memref<8x1xf32, #tpu.memory_space<vmem>>, %arg6: memref<16x200xf32, #tpu.memory_space<vmem>>, %arg7: memref<16x1xf32, #tpu.memory_space<vmem>>, %arg8: memref<1x400xf32, #tpu.memory_space<vmem>>, %arg9: memref<1x16x400xf32, #tpu.memory_space<vmem>>, %arg10: memref<8x484xf32, #tpu.memory_space<vmem>>, %arg11: memref<200x400xf32, #tpu.memory_space<vmem>>) attributes {dimension_semantics = [#tpu.dimension_semantics<parallel>], iteration_bounds = array<i64: 2>, scalar_prefetch = 0 : i64, scratch_operands = 2 : i64, tpu.core_type = #tpu.core_type<tc>, window_params = [{transform_indices = @transform_0, window_bounds = array<i64: 1, 8, 400>}, {pipeline_mode = #tpu.pipeline_mode<synchronous>, transform_indices = @transform_1, window_bounds = array<i64: 8, 200>}, {pipeline_mode = #tpu.pipeline_mode<synchronous>, transform_indices = @transform_2, window_bounds = array<i64: 8, 1>}, {pipeline_mode = #tpu.pipeline_mode<synchronous>, transform_indices = @transform_3, window_bounds = array<i64: 8, 200>}, {pipeline_mode = #tpu.pipeline_mode<synchronous>, transform_indices = @transform_4, window_bounds = array<i64: 8, 1>}, {pipeline_mode = #tpu.pipeline_mode<synchronous>, transform_indices = @transform_5, window_bounds = array<i64: 16, 200>}, {pipeline_mode = #tpu.pipeline_mode<synchronous>, transform_indices = @transform_6, window_bounds = array<i64: 16, 1>}, {pipeline_mode = #tpu.pipeline_mode<synchronous>, transform_indices = @transform_7, window_bounds = array<i64: 1, 400>}, {transform_indices = @transform_8, window_bounds = array<i64: 1, 16, 400>}]} {
    %c0 = arith.constant 0 : index
    %c0_0 = arith.constant 0 : index
    %0 = vector.load %arg8[%c0, %c0_0] : memref<1x400xf32, #tpu.memory_space<vmem>>, vector<1x400xf32>
    %cst = arith.constant 0.000000e+00 : f32
    %1 = vector.broadcast %cst : f32 to vector<8x484xf32>
    %c0_1 = arith.constant 0 : index
    %c0_2 = arith.constant 0 : index
    %2 = vector.load %arg10[%c0_1, %c0_2] : memref<8x484xf32, #tpu.memory_space<vmem>>, vector<8x484xf32>
    tpu.vector_store %arg10[%c0_1, %c0_2], %1 {strides = array<i32>} : memref<8x484xf32, #tpu.memory_space<vmem>>, vector<8x484xf32>,
    %c0_3 = arith.constant 0 : index
    %c0_4 = arith.constant 0 : index
    %c0_5 = arith.constant 0 : index
    %3 = vector.load %arg1[%c0_3, %c0_4, %c0_5] : memref<1x8x400xf32, #tpu.memory_space<vmem>>, vector<1x8x400xf32>
    %4 = vector.shape_cast %3 : vector<1x8x400xf32> to vector<8x400xf32>
    %c0_6 = arith.constant 0 : index
    %c42 = arith.constant 42 : index
    %5 = vector.load %arg10[%c0_6, %c42] : memref<8x484xf32, #tpu.memory_space<vmem>>, vector<8x400xf32>
    tpu.vector_store %arg10[%c0_6, %c42], %4 {strides = array<i32>} : memref<8x484xf32, #tpu.memory_space<vmem>>, vector<8x400xf32>,
    %c0_7 = arith.constant 0 : index
    %c0_8 = arith.constant 0 : index
    %6 = vector.load %arg10[%c0_7, %c0_8] : memref<8x484xf32, #tpu.memory_space<vmem>>, vector<8x400xf32>
    %c0_9 = arith.constant 0 : index
    %c0_10 = arith.constant 0 : index
    %7 = vector.load %arg11[%c0_9, %c0_10] : memref<200x400xf32, #tpu.memory_space<vmem>>, vector<8x400xf32>
    tpu.vector_store %arg11[%c0_9, %c0_10], %6 {strides = array<i32>} : memref<200x400xf32, #tpu.memory_space<vmem>>, vector<8x400xf32>,
    %c0_11 = arith.constant 0 : index
    %c1 = arith.constant 1 : index
    %8 = vector.load %arg10[%c0_11, %c1] : memref<8x484xf32, #tpu.memory_space<vmem>>, vector<8x400xf32>
    %c8 = arith.constant 8 : index
    %c0_12 = arith.constant 0 : index
    %9 = vector.load %arg11[%c8, %c0_12] : memref<200x400xf32, #tpu.memory_space<vmem>>, vector<8x400xf32>
    tpu.vector_store %arg11[%c8, %c0_12], %8 {strides = array<i32>} : memref<200x400xf32, #tpu.memory_space<vmem>>, vector<8x400xf32>,
    %c0_13 = arith.constant 0 : index
    %c2 = arith.constant 2 : index
    %10 = vector.load %arg10[%c0_13, %c2] : memref<8x484xf32, #tpu.memory_space<vmem>>, vector<8x400xf32>
    %c16 = arith.constant 16 : index
    %c0_14 = arith.constant 0 : index
    %11 = vector.load %arg11[%c16, %c0_14] : memref<200x400xf32, #tpu.memory_space<vmem>>, vector<8x400xf32>
    tpu.vector_store %arg11[%c16, %c0_14], %10 {strides = array<i32>} : memref<200x400xf32, #tpu.memory_space<vmem>>, vector<8x400xf32>,
    %c0_15 = arith.constant 0 : index
    %c3 = arith.constant 3 : index
    %12 = vector.load %arg10[%c0_15, %c3] : memref<8x484xf32, #tpu.memory_space<vmem>>, vector<8x400xf32>
    %c24 = arith.constant 24 : index
    %c0_16 = arith.constant 0 : index
    %13 = vector.load %arg11[%c24, %c0_16] : memref<200x400xf32, #tpu.memory_space<vmem>>, vector<8x400xf32>
    tpu.vector_store %arg11[%c24, %c0_16], %12 {strides = array<i32>} : memref<200x400xf32, #tpu.memory_space<vmem>>, vector<8x400xf32>,
    %c0_17 = arith.constant 0 : index
    %c4 = arith.constant 4 : index
    %14 = vector.load %arg10[%c0_17, %c4] : memref<8x484xf32, #tpu.memory_space<vmem>>, vector<8x400xf32>
    %c32 = arith.constant 32 : index
    %c0_18 = arith.constant 0 : index
    %15 = vector.load %arg11[%c32, %c0_18] : memref<200x400xf32, #tpu.memory_space<vmem>>, vector<8x400xf32>
    tpu.vector_store %arg11[%c32, %c0_18], %14 {strides = array<i32>} : memref<200x400xf32, #tpu.memory_space<vmem>>, vector<8x400xf32>,
    %c0_19 = arith.constant 0 : index
    %c20 = arith.constant 20 : index
    %16 = vector.load %arg10[%c0_19, %c20] : memref<8x484xf32, #tpu.memory_space<vmem>>, vector<8x400xf32>
    %c40 = arith.constant 40 : index
    %c0_20 = arith.constant 0 : index
    %17 = vector.load %arg11[%c40, %c0_20] : memref<200x400xf32, #tpu.memory_space<vmem>>, vector<8x400xf32>
    tpu.vector_store %arg11[%c40, %c0_20], %16 {strides = array<i32>} : memref<200x400xf32, #tpu.memory_space<vmem>>, vector<8x400xf32>,
    %c0_21 = arith.constant 0 : index
    %c21 = arith.constant 21 : index
    %18 = vector.load %arg10[%c0_21, %c21] : memref<8x484xf32, #tpu.memory_space<vmem>>, vector<8x400xf32>
    %c48 = arith.constant 48 : index
    %c0_22 = arith.constant 0 : index
    %19 = vector.load %arg11[%c48, %c0_22] : memref<200x400xf32, #tpu.memory_space<vmem>>, vector<8x400xf32>
    tpu.vector_store %arg11[%c48, %c0_22], %18 {strides = array<i32>} : memref<200x400xf32, #tpu.memory_space<vmem>>, vector<8x400xf32>,
    %c0_23 = arith.constant 0 : index
    %c22 = arith.constant 22 : index
    %20 = vector.load %arg10[%c0_23, %c22] : memref<8x484xf32, #tpu.memory_space<vmem>>, vector<8x400xf32>
    %c56 = arith.constant 56 : index
    %c0_24 = arith.constant 0 : index
    %21 = vector.load %arg11[%c56, %c0_24] : memref<200x400xf32, #tpu.memory_space<vmem>>, vector<8x400xf32>
    tpu.vector_store %arg11[%c56, %c0_24], %20 {strides = array<i32>} : memref<200x400xf32, #tpu.memory_space<vmem>>, vector<8x400xf32>,
    %c0_25 = arith.constant 0 : index
    %c23 = arith.constant 23 : index
    %22 = vector.load %arg10[%c0_25, %c23] : memref<8x484xf32, #tpu.memory_space<vmem>>, vector<8x400xf32>
    %c64 = arith.constant 64 : index
    %c0_26 = arith.constant 0 : index
    %23 = vector.load %arg11[%c64, %c0_26] : memref<200x400xf32, #tpu.memory_space<vmem>>, vector<8x400xf32>
    tpu.vector_store %arg11[%c64, %c0_26], %22 {strides = array<i32>} : memref<200x400xf32, #tpu.memory_space<vmem>>, vector<8x400xf32>,
    %c0_27 = arith.constant 0 : index
    %c24_28 = arith.constant 24 : index
    %24 = vector.load %arg10[%c0_27, %c24_28] : memref<8x484xf32, #tpu.memory_space<vmem>>, vector<8x400xf32>
    %c72 = arith.constant 72 : index
    %c0_29 = arith.constant 0 : index
    %25 = vector.load %arg11[%c72, %c0_29] : memref<200x400xf32, #tpu.memory_space<vmem>>, vector<8x400xf32>
    tpu.vector_store %arg11[%c72, %c0_29], %24 {strides = array<i32>} : memref<200x400xf32, #tpu.memory_space<vmem>>, vector<8x400xf32>,
    %c0_30 = arith.constant 0 : index
    %c40_31 = arith.constant 40 : index
    %26 = vector.load %arg10[%c0_30, %c40_31] : memref<8x484xf32, #tpu.memory_space<vmem>>, vector<8x400xf32>
    %c80 = arith.constant 80 : index
    %c0_32 = arith.constant 0 : index
    %27 = vector.load %arg11[%c80, %c0_32] : memref<200x400xf32, #tpu.memory_space<vmem>>, vector<8x400xf32>
    tpu.vector_store %arg11[%c80, %c0_32], %26 {strides = array<i32>} : memref<200x400xf32, #tpu.memory_space<vmem>>, vector<8x400xf32>,
    %c0_33 = arith.constant 0 : index
    %c41 = arith.constant 41 : index
    %28 = vector.load %arg10[%c0_33, %c41] : memref<8x484xf32, #tpu.memory_space<vmem>>, vector<8x400xf32>
    %c88 = arith.constant 88 : index
    %c0_34 = arith.constant 0 : index
    %29 = vector.load %arg11[%c88, %c0_34] : memref<200x400xf32, #tpu.memory_space<vmem>>, vector<8x400xf32>
    tpu.vector_store %arg11[%c88, %c0_34], %28 {strides = array<i32>} : memref<200x400xf32, #tpu.memory_space<vmem>>, vector<8x400xf32>,
    %c0_35 = arith.constant 0 : index
    %c42_36 = arith.constant 42 : index
    %30 = vector.load %arg10[%c0_35, %c42_36] : memref<8x484xf32, #tpu.memory_space<vmem>>, vector<8x400xf32>
    %c96 = arith.constant 96 : index
    %c0_37 = arith.constant 0 : index
    %31 = vector.load %arg11[%c96, %c0_37] : memref<200x400xf32, #tpu.memory_space<vmem>>, vector<8x400xf32>
    tpu.vector_store %arg11[%c96, %c0_37], %30 {strides = array<i32>} : memref<200x400xf32, #tpu.memory_space<vmem>>, vector<8x400xf32>,
    %c0_38 = arith.constant 0 : index
    %c43 = arith.constant 43 : index
    %32 = vector.load %arg10[%c0_38, %c43] : memref<8x484xf32, #tpu.memory_space<vmem>>, vector<8x400xf32>
    %c104 = arith.constant 104 : index
    %c0_39 = arith.constant 0 : index
    %33 = vector.load %arg11[%c104, %c0_39] : memref<200x400xf32, #tpu.memory_space<vmem>>, vector<8x400xf32>
    tpu.vector_store %arg11[%c104, %c0_39], %32 {strides = array<i32>} : memref<200x400xf32, #tpu.memory_space<vmem>>, vector<8x400xf32>,
    %c0_40 = arith.constant 0 : index
    %c44 = arith.constant 44 : index
    %34 = vector.load %arg10[%c0_40, %c44] : memref<8x484xf32, #tpu.memory_space<vmem>>, vector<8x400xf32>
    %c112 = arith.constant 112 : index
    %c0_41 = arith.constant 0 : index
    %35 = vector.load %arg11[%c112, %c0_41] : memref<200x400xf32, #tpu.memory_space<vmem>>, vector<8x400xf32>
    tpu.vector_store %arg11[%c112, %c0_41], %34 {strides = array<i32>} : memref<200x400xf32, #tpu.memory_space<vmem>>, vector<8x400xf32>,
    %c0_42 = arith.constant 0 : index
    %c60 = arith.constant 60 : index
    %36 = vector.load %arg10[%c0_42, %c60] : memref<8x484xf32, #tpu.memory_space<vmem>>, vector<8x400xf32>
    %c120 = arith.constant 120 : index
    %c0_43 = arith.constant 0 : index
    %37 = vector.load %arg11[%c120, %c0_43] : memref<200x400xf32, #tpu.memory_space<vmem>>, vector<8x400xf32>
    tpu.vector_store %arg11[%c120, %c0_43], %36 {strides = array<i32>} : memref<200x400xf32, #tpu.memory_space<vmem>>, vector<8x400xf32>,
    %c0_44 = arith.constant 0 : index
    %c61 = arith.constant 61 : index
    %38 = vector.load %arg10[%c0_44, %c61] : memref<8x484xf32, #tpu.memory_space<vmem>>, vector<8x400xf32>
    %c128 = arith.constant 128 : index
    %c0_45 = arith.constant 0 : index
    %39 = vector.load %arg11[%c128, %c0_45] : memref<200x400xf32, #tpu.memory_space<vmem>>, vector<8x400xf32>
    tpu.vector_store %arg11[%c128, %c0_45], %38 {strides = array<i32>} : memref<200x400xf32, #tpu.memory_space<vmem>>, vector<8x400xf32>,
    %c0_46 = arith.constant 0 : index
    %c62 = arith.constant 62 : index
    %40 = vector.load %arg10[%c0_46, %c62] : memref<8x484xf32, #tpu.memory_space<vmem>>, vector<8x400xf32>
    %c136 = arith.constant 136 : index
    %c0_47 = arith.constant 0 : index
    %41 = vector.load %arg11[%c136, %c0_47] : memref<200x400xf32, #tpu.memory_space<vmem>>, vector<8x400xf32>
    tpu.vector_store %arg11[%c136, %c0_47], %40 {strides = array<i32>} : memref<200x400xf32, #tpu.memory_space<vmem>>, vector<8x400xf32>,
    %c0_48 = arith.constant 0 : index
    %c63 = arith.constant 63 : index
    %42 = vector.load %arg10[%c0_48, %c63] : memref<8x484xf32, #tpu.memory_space<vmem>>, vector<8x400xf32>
    %c144 = arith.constant 144 : index
    %c0_49 = arith.constant 0 : index
    %43 = vector.load %arg11[%c144, %c0_49] : memref<200x400xf32, #tpu.memory_space<vmem>>, vector<8x400xf32>
    tpu.vector_store %arg11[%c144, %c0_49], %42 {strides = array<i32>} : memref<200x400xf32, #tpu.memory_space<vmem>>, vector<8x400xf32>,
    %c0_50 = arith.constant 0 : index
    %c64_51 = arith.constant 64 : index
    %44 = vector.load %arg10[%c0_50, %c64_51] : memref<8x484xf32, #tpu.memory_space<vmem>>, vector<8x400xf32>
    %c152 = arith.constant 152 : index
    %c0_52 = arith.constant 0 : index
    %45 = vector.load %arg11[%c152, %c0_52] : memref<200x400xf32, #tpu.memory_space<vmem>>, vector<8x400xf32>
    tpu.vector_store %arg11[%c152, %c0_52], %44 {strides = array<i32>} : memref<200x400xf32, #tpu.memory_space<vmem>>, vector<8x400xf32>,
    %c0_53 = arith.constant 0 : index
    %c80_54 = arith.constant 80 : index
    %46 = vector.load %arg10[%c0_53, %c80_54] : memref<8x484xf32, #tpu.memory_space<vmem>>, vector<8x400xf32>
    %c160 = arith.constant 160 : index
    %c0_55 = arith.constant 0 : index
    %47 = vector.load %arg11[%c160, %c0_55] : memref<200x400xf32, #tpu.memory_space<vmem>>, vector<8x400xf32>
    tpu.vector_store %arg11[%c160, %c0_55], %46 {strides = array<i32>} : memref<200x400xf32, #tpu.memory_space<vmem>>, vector<8x400xf32>,
    %c0_56 = arith.constant 0 : index
    %c81 = arith.constant 81 : index
    %48 = vector.load %arg10[%c0_56, %c81] : memref<8x484xf32, #tpu.memory_space<vmem>>, vector<8x400xf32>
    %c168 = arith.constant 168 : index
    %c0_57 = arith.constant 0 : index
    %49 = vector.load %arg11[%c168, %c0_57] : memref<200x400xf32, #tpu.memory_space<vmem>>, vector<8x400xf32>
    tpu.vector_store %arg11[%c168, %c0_57], %48 {strides = array<i32>} : memref<200x400xf32, #tpu.memory_space<vmem>>, vector<8x400xf32>,
    %c0_58 = arith.constant 0 : index
    %c82 = arith.constant 82 : index
    %50 = vector.load %arg10[%c0_58, %c82] : memref<8x484xf32, #tpu.memory_space<vmem>>, vector<8x400xf32>
    %c176 = arith.constant 176 : index
    %c0_59 = arith.constant 0 : index
    %51 = vector.load %arg11[%c176, %c0_59] : memref<200x400xf32, #tpu.memory_space<vmem>>, vector<8x400xf32>
    tpu.vector_store %arg11[%c176, %c0_59], %50 {strides = array<i32>} : memref<200x400xf32, #tpu.memory_space<vmem>>, vector<8x400xf32>,
    %c0_60 = arith.constant 0 : index
    %c83 = arith.constant 83 : index
    %52 = vector.load %arg10[%c0_60, %c83] : memref<8x484xf32, #tpu.memory_space<vmem>>, vector<8x400xf32>
    %c184 = arith.constant 184 : index
    %c0_61 = arith.constant 0 : index
    %53 = vector.load %arg11[%c184, %c0_61] : memref<200x400xf32, #tpu.memory_space<vmem>>, vector<8x400xf32>
    tpu.vector_store %arg11[%c184, %c0_61], %52 {strides = array<i32>} : memref<200x400xf32, #tpu.memory_space<vmem>>, vector<8x400xf32>,
    %c0_62 = arith.constant 0 : index
    %c84 = arith.constant 84 : index
    %54 = vector.load %arg10[%c0_62, %c84] : memref<8x484xf32, #tpu.memory_space<vmem>>, vector<8x400xf32>
    %c192 = arith.constant 192 : index
    %c0_63 = arith.constant 0 : index
    %55 = vector.load %arg11[%c192, %c0_63] : memref<200x400xf32, #tpu.memory_space<vmem>>, vector<8x400xf32>
    tpu.vector_store %arg11[%c192, %c0_63], %54 {strides = array<i32>} : memref<200x400xf32, #tpu.memory_space<vmem>>, vector<8x400xf32>,
    %c0_64 = arith.constant 0 : index
    %c0_65 = arith.constant 0 : index
    %56 = vector.load %arg2[%c0_64, %c0_65] : memref<8x200xf32, #tpu.memory_space<vmem>>, vector<8x200xf32>
    %c0_66 = arith.constant 0 : index
    %c0_67 = arith.constant 0 : index
    %57 = vector.load %arg11[%c0_66, %c0_67] : memref<200x400xf32, #tpu.memory_space<vmem>>, vector<200x400xf32>
    %cst_68 = arith.constant dense<0.000000e+00> : vector<8x400xf32>
    %58 = tpu.matmul %56, %57, %cst_68 {dimension_numbers = #tpu.dot_dimension_numbers<[1], [0], [0], [1], [0, 0, 1, 1], [], []>} : vector<8x200xf32>, vector<200x400xf32>, vector<8x400xf32> -> vector<8x400xf32>
    %c0_69 = arith.constant 0 : index
    %c0_70 = arith.constant 0 : index
    %59 = vector.load %arg3[%c0_69, %c0_70] : memref<8x1xf32, #tpu.memory_space<vmem>>, vector<8x1xf32>
    %60 = vector.broadcast %59 : vector<8x1xf32> to vector<8x400xf32>
    %61 = arith.addf %58, %60 : vector<8x400xf32>
    %cst_71 = arith.constant 0.000000e+00 : f32
    %62 = vector.broadcast %cst_71 : f32 to vector<8x400xf32>
    %63 = arith.maximumf %61, %62 : vector<8x400xf32>
    %64 = vector.broadcast %0 : vector<1x400xf32> to vector<8x400xf32>
    %65 = arith.mulf %63, %64 : vector<8x400xf32>
    %c0_72 = arith.constant 0 : index
    %c42_73 = arith.constant 42 : index
    %66 = vector.load %arg10[%c0_72, %c42_73] : memref<8x484xf32, #tpu.memory_space<vmem>>, vector<8x400xf32>
    tpu.vector_store %arg10[%c0_72, %c42_73], %65 {strides = array<i32>} : memref<8x484xf32, #tpu.memory_space<vmem>>, vector<8x400xf32>,
    %c0_74 = arith.constant 0 : index
    %c0_75 = arith.constant 0 : index
    %67 = vector.load %arg10[%c0_74, %c0_75] : memref<8x484xf32, #tpu.memory_space<vmem>>, vector<8x400xf32>
    %c0_76 = arith.constant 0 : index
    %c0_77 = arith.constant 0 : index
    %68 = vector.load %arg11[%c0_76, %c0_77] : memref<200x400xf32, #tpu.memory_space<vmem>>, vector<8x400xf32>
    tpu.vector_store %arg11[%c0_76, %c0_77], %67 {strides = array<i32>} : memref<200x400xf32, #tpu.memory_space<vmem>>, vector<8x400xf32>,
    %c0_78 = arith.constant 0 : index
    %c1_79 = arith.constant 1 : index
    %69 = vector.load %arg10[%c0_78, %c1_79] : memref<8x484xf32, #tpu.memory_space<vmem>>, vector<8x400xf32>
    %c8_80 = arith.constant 8 : index
    %c0_81 = arith.constant 0 : index
    %70 = vector.load %arg11[%c8_80, %c0_81] : memref<200x400xf32, #tpu.memory_space<vmem>>, vector<8x400xf32>
    tpu.vector_store %arg11[%c8_80, %c0_81], %69 {strides = array<i32>} : memref<200x400xf32, #tpu.memory_space<vmem>>, vector<8x400xf32>,
    %c0_82 = arith.constant 0 : index
    %c2_83 = arith.constant 2 : index
    %71 = vector.load %arg10[%c0_82, %c2_83] : memref<8x484xf32, #tpu.memory_space<vmem>>, vector<8x400xf32>
    %c16_84 = arith.constant 16 : index
    %c0_85 = arith.constant 0 : index
    %72 = vector.load %arg11[%c16_84, %c0_85] : memref<200x400xf32, #tpu.memory_space<vmem>>, vector<8x400xf32>
    tpu.vector_store %arg11[%c16_84, %c0_85], %71 {strides = array<i32>} : memref<200x400xf32, #tpu.memory_space<vmem>>, vector<8x400xf32>,
    %c0_86 = arith.constant 0 : index
    %c3_87 = arith.constant 3 : index
    %73 = vector.load %arg10[%c0_86, %c3_87] : memref<8x484xf32, #tpu.memory_space<vmem>>, vector<8x400xf32>
    %c24_88 = arith.constant 24 : index
    %c0_89 = arith.constant 0 : index
    %74 = vector.load %arg11[%c24_88, %c0_89] : memref<200x400xf32, #tpu.memory_space<vmem>>, vector<8x400xf32>
    tpu.vector_store %arg11[%c24_88, %c0_89], %73 {strides = array<i32>} : memref<200x400xf32, #tpu.memory_space<vmem>>, vector<8x400xf32>,
    %c0_90 = arith.constant 0 : index
    %c4_91 = arith.constant 4 : index
    %75 = vector.load %arg10[%c0_90, %c4_91] : memref<8x484xf32, #tpu.memory_space<vmem>>, vector<8x400xf32>
    %c32_92 = arith.constant 32 : index
    %c0_93 = arith.constant 0 : index
    %76 = vector.load %arg11[%c32_92, %c0_93] : memref<200x400xf32, #tpu.memory_space<vmem>>, vector<8x400xf32>
    tpu.vector_store %arg11[%c32_92, %c0_93], %75 {strides = array<i32>} : memref<200x400xf32, #tpu.memory_space<vmem>>, vector<8x400xf32>,
    %c0_94 = arith.constant 0 : index
    %c20_95 = arith.constant 20 : index
    %77 = vector.load %arg10[%c0_94, %c20_95] : memref<8x484xf32, #tpu.memory_space<vmem>>, vector<8x400xf32>
    %c40_96 = arith.constant 40 : index
    %c0_97 = arith.constant 0 : index
    %78 = vector.load %arg11[%c40_96, %c0_97] : memref<200x400xf32, #tpu.memory_space<vmem>>, vector<8x400xf32>
    tpu.vector_store %arg11[%c40_96, %c0_97], %77 {strides = array<i32>} : memref<200x400xf32, #tpu.memory_space<vmem>>, vector<8x400xf32>,
    %c0_98 = arith.constant 0 : index
    %c21_99 = arith.constant 21 : index
    %79 = vector.load %arg10[%c0_98, %c21_99] : memref<8x484xf32, #tpu.memory_space<vmem>>, vector<8x400xf32>
    %c48_100 = arith.constant 48 : index
    %c0_101 = arith.constant 0 : index
    %80 = vector.load %arg11[%c48_100, %c0_101] : memref<200x400xf32, #tpu.memory_space<vmem>>, vector<8x400xf32>
    tpu.vector_store %arg11[%c48_100, %c0_101], %79 {strides = array<i32>} : memref<200x400xf32, #tpu.memory_space<vmem>>, vector<8x400xf32>,
    %c0_102 = arith.constant 0 : index
    %c22_103 = arith.constant 22 : index
    %81 = vector.load %arg10[%c0_102, %c22_103] : memref<8x484xf32, #tpu.memory_space<vmem>>, vector<8x400xf32>
    %c56_104 = arith.constant 56 : index
    %c0_105 = arith.constant 0 : index
    %82 = vector.load %arg11[%c56_104, %c0_105] : memref<200x400xf32, #tpu.memory_space<vmem>>, vector<8x400xf32>
    tpu.vector_store %arg11[%c56_104, %c0_105], %81 {strides = array<i32>} : memref<200x400xf32, #tpu.memory_space<vmem>>, vector<8x400xf32>,
    %c0_106 = arith.constant 0 : index
    %c23_107 = arith.constant 23 : index
    %83 = vector.load %arg10[%c0_106, %c23_107] : memref<8x484xf32, #tpu.memory_space<vmem>>, vector<8x400xf32>
    %c64_108 = arith.constant 64 : index
    %c0_109 = arith.constant 0 : index
    %84 = vector.load %arg11[%c64_108, %c0_109] : memref<200x400xf32, #tpu.memory_space<vmem>>, vector<8x400xf32>
    tpu.vector_store %arg11[%c64_108, %c0_109], %83 {strides = array<i32>} : memref<200x400xf32, #tpu.memory_space<vmem>>, vector<8x400xf32>,
    %c0_110 = arith.constant 0 : index
    %c24_111 = arith.constant 24 : index
    %85 = vector.load %arg10[%c0_110, %c24_111] : memref<8x484xf32, #tpu.memory_space<vmem>>, vector<8x400xf32>
    %c72_112 = arith.constant 72 : index
    %c0_113 = arith.constant 0 : index
    %86 = vector.load %arg11[%c72_112, %c0_113] : memref<200x400xf32, #tpu.memory_space<vmem>>, vector<8x400xf32>
    tpu.vector_store %arg11[%c72_112, %c0_113], %85 {strides = array<i32>} : memref<200x400xf32, #tpu.memory_space<vmem>>, vector<8x400xf32>,
    %c0_114 = arith.constant 0 : index
    %c40_115 = arith.constant 40 : index
    %87 = vector.load %arg10[%c0_114, %c40_115] : memref<8x484xf32, #tpu.memory_space<vmem>>, vector<8x400xf32>
    %c80_116 = arith.constant 80 : index
    %c0_117 = arith.constant 0 : index
    %88 = vector.load %arg11[%c80_116, %c0_117] : memref<200x400xf32, #tpu.memory_space<vmem>>, vector<8x400xf32>
    tpu.vector_store %arg11[%c80_116, %c0_117], %87 {strides = array<i32>} : memref<200x400xf32, #tpu.memory_space<vmem>>, vector<8x400xf32>,
    %c0_118 = arith.constant 0 : index
    %c41_119 = arith.constant 41 : index
    %89 = vector.load %arg10[%c0_118, %c41_119] : memref<8x484xf32, #tpu.memory_space<vmem>>, vector<8x400xf32>
    %c88_120 = arith.constant 88 : index
    %c0_121 = arith.constant 0 : index
    %90 = vector.load %arg11[%c88_120, %c0_121] : memref<200x400xf32, #tpu.memory_space<vmem>>, vector<8x400xf32>
    tpu.vector_store %arg11[%c88_120, %c0_121], %89 {strides = array<i32>} : memref<200x400xf32, #tpu.memory_space<vmem>>, vector<8x400xf32>,
    %c0_122 = arith.constant 0 : index
    %c42_123 = arith.constant 42 : index
    %91 = vector.load %arg10[%c0_122, %c42_123] : memref<8x484xf32, #tpu.memory_space<vmem>>, vector<8x400xf32>
    %c96_124 = arith.constant 96 : index
    %c0_125 = arith.constant 0 : index
    %92 = vector.load %arg11[%c96_124, %c0_125] : memref<200x400xf32, #tpu.memory_space<vmem>>, vector<8x400xf32>
    tpu.vector_store %arg11[%c96_124, %c0_125], %91 {strides = array<i32>} : memref<200x400xf32, #tpu.memory_space<vmem>>, vector<8x400xf32>,
    %c0_126 = arith.constant 0 : index
    %c43_127 = arith.constant 43 : index
    %93 = vector.load %arg10[%c0_126, %c43_127] : memref<8x484xf32, #tpu.memory_space<vmem>>, vector<8x400xf32>
    %c104_128 = arith.constant 104 : index
    %c0_129 = arith.constant 0 : index
    %94 = vector.load %arg11[%c104_128, %c0_129] : memref<200x400xf32, #tpu.memory_space<vmem>>, vector<8x400xf32>
    tpu.vector_store %arg11[%c104_128, %c0_129], %93 {strides = array<i32>} : memref<200x400xf32, #tpu.memory_space<vmem>>, vector<8x400xf32>,
    %c0_130 = arith.constant 0 : index
    %c44_131 = arith.constant 44 : index
    %95 = vector.load %arg10[%c0_130, %c44_131] : memref<8x484xf32, #tpu.memory_space<vmem>>, vector<8x400xf32>
    %c112_132 = arith.constant 112 : index
    %c0_133 = arith.constant 0 : index
    %96 = vector.load %arg11[%c112_132, %c0_133] : memref<200x400xf32, #tpu.memory_space<vmem>>, vector<8x400xf32>
    tpu.vector_store %arg11[%c112_132, %c0_133], %95 {strides = array<i32>} : memref<200x400xf32, #tpu.memory_space<vmem>>, vector<8x400xf32>,
    %c0_134 = arith.constant 0 : index
    %c60_135 = arith.constant 60 : index
    %97 = vector.load %arg10[%c0_134, %c60_135] : memref<8x484xf32, #tpu.memory_space<vmem>>, vector<8x400xf32>
    %c120_136 = arith.constant 120 : index
    %c0_137 = arith.constant 0 : index
    %98 = vector.load %arg11[%c120_136, %c0_137] : memref<200x400xf32, #tpu.memory_space<vmem>>, vector<8x400xf32>
    tpu.vector_store %arg11[%c120_136, %c0_137], %97 {strides = array<i32>} : memref<200x400xf32, #tpu.memory_space<vmem>>, vector<8x400xf32>,
    %c0_138 = arith.constant 0 : index
    %c61_139 = arith.constant 61 : index
    %99 = vector.load %arg10[%c0_138, %c61_139] : memref<8x484xf32, #tpu.memory_space<vmem>>, vector<8x400xf32>
    %c128_140 = arith.constant 128 : index
    %c0_141 = arith.constant 0 : index
    %100 = vector.load %arg11[%c128_140, %c0_141] : memref<200x400xf32, #tpu.memory_space<vmem>>, vector<8x400xf32>
    tpu.vector_store %arg11[%c128_140, %c0_141], %99 {strides = array<i32>} : memref<200x400xf32, #tpu.memory_space<vmem>>, vector<8x400xf32>,
    %c0_142 = arith.constant 0 : index
    %c62_143 = arith.constant 62 : index
    %101 = vector.load %arg10[%c0_142, %c62_143] : memref<8x484xf32, #tpu.memory_space<vmem>>, vector<8x400xf32>
    %c136_144 = arith.constant 136 : index
    %c0_145 = arith.constant 0 : index
    %102 = vector.load %arg11[%c136_144, %c0_145] : memref<200x400xf32, #tpu.memory_space<vmem>>, vector<8x400xf32>
    tpu.vector_store %arg11[%c136_144, %c0_145], %101 {strides = array<i32>} : memref<200x400xf32, #tpu.memory_space<vmem>>, vector<8x400xf32>,
    %c0_146 = arith.constant 0 : index
    %c63_147 = arith.constant 63 : index
    %103 = vector.load %arg10[%c0_146, %c63_147] : memref<8x484xf32, #tpu.memory_space<vmem>>, vector<8x400xf32>
    %c144_148 = arith.constant 144 : index
    %c0_149 = arith.constant 0 : index
    %104 = vector.load %arg11[%c144_148, %c0_149] : memref<200x400xf32, #tpu.memory_space<vmem>>, vector<8x400xf32>
    tpu.vector_store %arg11[%c144_148, %c0_149], %103 {strides = array<i32>} : memref<200x400xf32, #tpu.memory_space<vmem>>, vector<8x400xf32>,
    %c0_150 = arith.constant 0 : index
    %c64_151 = arith.constant 64 : index
    %105 = vector.load %arg10[%c0_150, %c64_151] : memref<8x484xf32, #tpu.memory_space<vmem>>, vector<8x400xf32>
    %c152_152 = arith.constant 152 : index
    %c0_153 = arith.constant 0 : index
    %106 = vector.load %arg11[%c152_152, %c0_153] : memref<200x400xf32, #tpu.memory_space<vmem>>, vector<8x400xf32>
    tpu.vector_store %arg11[%c152_152, %c0_153], %105 {strides = array<i32>} : memref<200x400xf32, #tpu.memory_space<vmem>>, vector<8x400xf32>,
    %c0_154 = arith.constant 0 : index
    %c80_155 = arith.constant 80 : index
    %107 = vector.load %arg10[%c0_154, %c80_155] : memref<8x484xf32, #tpu.memory_space<vmem>>, vector<8x400xf32>
    %c160_156 = arith.constant 160 : index
    %c0_157 = arith.constant 0 : index
    %108 = vector.load %arg11[%c160_156, %c0_157] : memref<200x400xf32, #tpu.memory_space<vmem>>, vector<8x400xf32>
    tpu.vector_store %arg11[%c160_156, %c0_157], %107 {strides = array<i32>} : memref<200x400xf32, #tpu.memory_space<vmem>>, vector<8x400xf32>,
    %c0_158 = arith.constant 0 : index
    %c81_159 = arith.constant 81 : index
    %109 = vector.load %arg10[%c0_158, %c81_159] : memref<8x484xf32, #tpu.memory_space<vmem>>, vector<8x400xf32>
    %c168_160 = arith.constant 168 : index
    %c0_161 = arith.constant 0 : index
    %110 = vector.load %arg11[%c168_160, %c0_161] : memref<200x400xf32, #tpu.memory_space<vmem>>, vector<8x400xf32>
    tpu.vector_store %arg11[%c168_160, %c0_161], %109 {strides = array<i32>} : memref<200x400xf32, #tpu.memory_space<vmem>>, vector<8x400xf32>,
    %c0_162 = arith.constant 0 : index
    %c82_163 = arith.constant 82 : index
    %111 = vector.load %arg10[%c0_162, %c82_163] : memref<8x484xf32, #tpu.memory_space<vmem>>, vector<8x400xf32>
    %c176_164 = arith.constant 176 : index
    %c0_165 = arith.constant 0 : index
    %112 = vector.load %arg11[%c176_164, %c0_165] : memref<200x400xf32, #tpu.memory_space<vmem>>, vector<8x400xf32>
    tpu.vector_store %arg11[%c176_164, %c0_165], %111 {strides = array<i32>} : memref<200x400xf32, #tpu.memory_space<vmem>>, vector<8x400xf32>,
    %c0_166 = arith.constant 0 : index
    %c83_167 = arith.constant 83 : index
    %113 = vector.load %arg10[%c0_166, %c83_167] : memref<8x484xf32, #tpu.memory_space<vmem>>, vector<8x400xf32>
    %c184_168 = arith.constant 184 : index
    %c0_169 = arith.constant 0 : index
    %114 = vector.load %arg11[%c184_168, %c0_169] : memref<200x400xf32, #tpu.memory_space<vmem>>, vector<8x400xf32>
    tpu.vector_store %arg11[%c184_168, %c0_169], %113 {strides = array<i32>} : memref<200x400xf32, #tpu.memory_space<vmem>>, vector<8x400xf32>,
    %c0_170 = arith.constant 0 : index
    %c84_171 = arith.constant 84 : index
    %115 = vector.load %arg10[%c0_170, %c84_171] : memref<8x484xf32, #tpu.memory_space<vmem>>, vector<8x400xf32>
    %c192_172 = arith.constant 192 : index
    %c0_173 = arith.constant 0 : index
    %116 = vector.load %arg11[%c192_172, %c0_173] : memref<200x400xf32, #tpu.memory_space<vmem>>, vector<8x400xf32>
    tpu.vector_store %arg11[%c192_172, %c0_173], %115 {strides = array<i32>} : memref<200x400xf32, #tpu.memory_space<vmem>>, vector<8x400xf32>,
    %c0_174 = arith.constant 0 : index
    %c0_175 = arith.constant 0 : index
    %117 = vector.load %arg4[%c0_174, %c0_175] : memref<8x200xf32, #tpu.memory_space<vmem>>, vector<8x200xf32>
    %c0_176 = arith.constant 0 : index
    %c0_177 = arith.constant 0 : index
    %118 = vector.load %arg11[%c0_176, %c0_177] : memref<200x400xf32, #tpu.memory_space<vmem>>, vector<200x400xf32>
    %cst_178 = arith.constant dense<0.000000e+00> : vector<8x400xf32>
    %119 = tpu.matmul %117, %118, %cst_178 {dimension_numbers = #tpu.dot_dimension_numbers<[1], [0], [0], [1], [0, 0, 1, 1], [], []>} : vector<8x200xf32>, vector<200x400xf32>, vector<8x400xf32> -> vector<8x400xf32>
    %c0_179 = arith.constant 0 : index
    %c0_180 = arith.constant 0 : index
    %120 = vector.load %arg5[%c0_179, %c0_180] : memref<8x1xf32, #tpu.memory_space<vmem>>, vector<8x1xf32>
    %121 = vector.broadcast %120 : vector<8x1xf32> to vector<8x400xf32>
    %122 = arith.addf %119, %121 : vector<8x400xf32>
    %cst_181 = arith.constant 0.000000e+00 : f32
    %123 = vector.broadcast %cst_181 : f32 to vector<8x400xf32>
    %124 = arith.maximumf %122, %123 : vector<8x400xf32>
    %125 = vector.broadcast %0 : vector<1x400xf32> to vector<8x400xf32>
    %126 = arith.mulf %124, %125 : vector<8x400xf32>
    %c0_182 = arith.constant 0 : index
    %c42_183 = arith.constant 42 : index
    %127 = vector.load %arg10[%c0_182, %c42_183] : memref<8x484xf32, #tpu.memory_space<vmem>>, vector<8x400xf32>
    tpu.vector_store %arg10[%c0_182, %c42_183], %126 {strides = array<i32>} : memref<8x484xf32, #tpu.memory_space<vmem>>, vector<8x400xf32>,
    %c0_184 = arith.constant 0 : index
    %c0_185 = arith.constant 0 : index
    %128 = vector.load %arg10[%c0_184, %c0_185] : memref<8x484xf32, #tpu.memory_space<vmem>>, vector<8x400xf32>
    %c0_186 = arith.constant 0 : index
    %c0_187 = arith.constant 0 : index
    %129 = vector.load %arg11[%c0_186, %c0_187] : memref<200x400xf32, #tpu.memory_space<vmem>>, vector<8x400xf32>
    tpu.vector_store %arg11[%c0_186, %c0_187], %128 {strides = array<i32>} : memref<200x400xf32, #tpu.memory_space<vmem>>, vector<8x400xf32>,
    %c0_188 = arith.constant 0 : index
    %c1_189 = arith.constant 1 : index
    %130 = vector.load %arg10[%c0_188, %c1_189] : memref<8x484xf32, #tpu.memory_space<vmem>>, vector<8x400xf32>
    %c8_190 = arith.constant 8 : index
    %c0_191 = arith.constant 0 : index
    %131 = vector.load %arg11[%c8_190, %c0_191] : memref<200x400xf32, #tpu.memory_space<vmem>>, vector<8x400xf32>
    tpu.vector_store %arg11[%c8_190, %c0_191], %130 {strides = array<i32>} : memref<200x400xf32, #tpu.memory_space<vmem>>, vector<8x400xf32>,
    %c0_192 = arith.constant 0 : index
    %c2_193 = arith.constant 2 : index
    %132 = vector.load %arg10[%c0_192, %c2_193] : memref<8x484xf32, #tpu.memory_space<vmem>>, vector<8x400xf32>
    %c16_194 = arith.constant 16 : index
    %c0_195 = arith.constant 0 : index
    %133 = vector.load %arg11[%c16_194, %c0_195] : memref<200x400xf32, #tpu.memory_space<vmem>>, vector<8x400xf32>
    tpu.vector_store %arg11[%c16_194, %c0_195], %132 {strides = array<i32>} : memref<200x400xf32, #tpu.memory_space<vmem>>, vector<8x400xf32>,
    %c0_196 = arith.constant 0 : index
    %c3_197 = arith.constant 3 : index
    %134 = vector.load %arg10[%c0_196, %c3_197] : memref<8x484xf32, #tpu.memory_space<vmem>>, vector<8x400xf32>
    %c24_198 = arith.constant 24 : index
    %c0_199 = arith.constant 0 : index
    %135 = vector.load %arg11[%c24_198, %c0_199] : memref<200x400xf32, #tpu.memory_space<vmem>>, vector<8x400xf32>
    tpu.vector_store %arg11[%c24_198, %c0_199], %134 {strides = array<i32>} : memref<200x400xf32, #tpu.memory_space<vmem>>, vector<8x400xf32>,
    %c0_200 = arith.constant 0 : index
    %c4_201 = arith.constant 4 : index
    %136 = vector.load %arg10[%c0_200, %c4_201] : memref<8x484xf32, #tpu.memory_space<vmem>>, vector<8x400xf32>
    %c32_202 = arith.constant 32 : index
    %c0_203 = arith.constant 0 : index
    %137 = vector.load %arg11[%c32_202, %c0_203] : memref<200x400xf32, #tpu.memory_space<vmem>>, vector<8x400xf32>
    tpu.vector_store %arg11[%c32_202, %c0_203], %136 {strides = array<i32>} : memref<200x400xf32, #tpu.memory_space<vmem>>, vector<8x400xf32>,
    %c0_204 = arith.constant 0 : index
    %c20_205 = arith.constant 20 : index
    %138 = vector.load %arg10[%c0_204, %c20_205] : memref<8x484xf32, #tpu.memory_space<vmem>>, vector<8x400xf32>
    %c40_206 = arith.constant 40 : index
    %c0_207 = arith.constant 0 : index
    %139 = vector.load %arg11[%c40_206, %c0_207] : memref<200x400xf32, #tpu.memory_space<vmem>>, vector<8x400xf32>
    tpu.vector_store %arg11[%c40_206, %c0_207], %138 {strides = array<i32>} : memref<200x400xf32, #tpu.memory_space<vmem>>, vector<8x400xf32>,
    %c0_208 = arith.constant 0 : index
    %c21_209 = arith.constant 21 : index
    %140 = vector.load %arg10[%c0_208, %c21_209] : memref<8x484xf32, #tpu.memory_space<vmem>>, vector<8x400xf32>
    %c48_210 = arith.constant 48 : index
    %c0_211 = arith.constant 0 : index
    %141 = vector.load %arg11[%c48_210, %c0_211] : memref<200x400xf32, #tpu.memory_space<vmem>>, vector<8x400xf32>
    tpu.vector_store %arg11[%c48_210, %c0_211], %140 {strides = array<i32>} : memref<200x400xf32, #tpu.memory_space<vmem>>, vector<8x400xf32>,
    %c0_212 = arith.constant 0 : index
    %c22_213 = arith.constant 22 : index
    %142 = vector.load %arg10[%c0_212, %c22_213] : memref<8x484xf32, #tpu.memory_space<vmem>>, vector<8x400xf32>
    %c56_214 = arith.constant 56 : index
    %c0_215 = arith.constant 0 : index
    %143 = vector.load %arg11[%c56_214, %c0_215] : memref<200x400xf32, #tpu.memory_space<vmem>>, vector<8x400xf32>
    tpu.vector_store %arg11[%c56_214, %c0_215], %142 {strides = array<i32>} : memref<200x400xf32, #tpu.memory_space<vmem>>, vector<8x400xf32>,
    %c0_216 = arith.constant 0 : index
    %c23_217 = arith.constant 23 : index
    %144 = vector.load %arg10[%c0_216, %c23_217] : memref<8x484xf32, #tpu.memory_space<vmem>>, vector<8x400xf32>
    %c64_218 = arith.constant 64 : index
    %c0_219 = arith.constant 0 : index
    %145 = vector.load %arg11[%c64_218, %c0_219] : memref<200x400xf32, #tpu.memory_space<vmem>>, vector<8x400xf32>
    tpu.vector_store %arg11[%c64_218, %c0_219], %144 {strides = array<i32>} : memref<200x400xf32, #tpu.memory_space<vmem>>, vector<8x400xf32>,
    %c0_220 = arith.constant 0 : index
    %c24_221 = arith.constant 24 : index
    %146 = vector.load %arg10[%c0_220, %c24_221] : memref<8x484xf32, #tpu.memory_space<vmem>>, vector<8x400xf32>
    %c72_222 = arith.constant 72 : index
    %c0_223 = arith.constant 0 : index
    %147 = vector.load %arg11[%c72_222, %c0_223] : memref<200x400xf32, #tpu.memory_space<vmem>>, vector<8x400xf32>
    tpu.vector_store %arg11[%c72_222, %c0_223], %146 {strides = array<i32>} : memref<200x400xf32, #tpu.memory_space<vmem>>, vector<8x400xf32>,
    %c0_224 = arith.constant 0 : index
    %c40_225 = arith.constant 40 : index
    %148 = vector.load %arg10[%c0_224, %c40_225] : memref<8x484xf32, #tpu.memory_space<vmem>>, vector<8x400xf32>
    %c80_226 = arith.constant 80 : index
    %c0_227 = arith.constant 0 : index
    %149 = vector.load %arg11[%c80_226, %c0_227] : memref<200x400xf32, #tpu.memory_space<vmem>>, vector<8x400xf32>
    tpu.vector_store %arg11[%c80_226, %c0_227], %148 {strides = array<i32>} : memref<200x400xf32, #tpu.memory_space<vmem>>, vector<8x400xf32>,
    %c0_228 = arith.constant 0 : index
    %c41_229 = arith.constant 41 : index
    %150 = vector.load %arg10[%c0_228, %c41_229] : memref<8x484xf32, #tpu.memory_space<vmem>>, vector<8x400xf32>
    %c88_230 = arith.constant 88 : index
    %c0_231 = arith.constant 0 : index
    %151 = vector.load %arg11[%c88_230, %c0_231] : memref<200x400xf32, #tpu.memory_space<vmem>>, vector<8x400xf32>
    tpu.vector_store %arg11[%c88_230, %c0_231], %150 {strides = array<i32>} : memref<200x400xf32, #tpu.memory_space<vmem>>, vector<8x400xf32>,
    %c0_232 = arith.constant 0 : index
    %c42_233 = arith.constant 42 : index
    %152 = vector.load %arg10[%c0_232, %c42_233] : memref<8x484xf32, #tpu.memory_space<vmem>>, vector<8x400xf32>
    %c96_234 = arith.constant 96 : index
    %c0_235 = arith.constant 0 : index
    %153 = vector.load %arg11[%c96_234, %c0_235] : memref<200x400xf32, #tpu.memory_space<vmem>>, vector<8x400xf32>
    tpu.vector_store %arg11[%c96_234, %c0_235], %152 {strides = array<i32>} : memref<200x400xf32, #tpu.memory_space<vmem>>, vector<8x400xf32>,
    %c0_236 = arith.constant 0 : index
    %c43_237 = arith.constant 43 : index
    %154 = vector.load %arg10[%c0_236, %c43_237] : memref<8x484xf32, #tpu.memory_space<vmem>>, vector<8x400xf32>
    %c104_238 = arith.constant 104 : index
    %c0_239 = arith.constant 0 : index
    %155 = vector.load %arg11[%c104_238, %c0_239] : memref<200x400xf32, #tpu.memory_space<vmem>>, vector<8x400xf32>
    tpu.vector_store %arg11[%c104_238, %c0_239], %154 {strides = array<i32>} : memref<200x400xf32, #tpu.memory_space<vmem>>, vector<8x400xf32>,
    %c0_240 = arith.constant 0 : index
    %c44_241 = arith.constant 44 : index
    %156 = vector.load %arg10[%c0_240, %c44_241] : memref<8x484xf32, #tpu.memory_space<vmem>>, vector<8x400xf32>
    %c112_242 = arith.constant 112 : index
    %c0_243 = arith.constant 0 : index
    %157 = vector.load %arg11[%c112_242, %c0_243] : memref<200x400xf32, #tpu.memory_space<vmem>>, vector<8x400xf32>
    tpu.vector_store %arg11[%c112_242, %c0_243], %156 {strides = array<i32>} : memref<200x400xf32, #tpu.memory_space<vmem>>, vector<8x400xf32>,
    %c0_244 = arith.constant 0 : index
    %c60_245 = arith.constant 60 : index
    %158 = vector.load %arg10[%c0_244, %c60_245] : memref<8x484xf32, #tpu.memory_space<vmem>>, vector<8x400xf32>
    %c120_246 = arith.constant 120 : index
    %c0_247 = arith.constant 0 : index
    %159 = vector.load %arg11[%c120_246, %c0_247] : memref<200x400xf32, #tpu.memory_space<vmem>>, vector<8x400xf32>
    tpu.vector_store %arg11[%c120_246, %c0_247], %158 {strides = array<i32>} : memref<200x400xf32, #tpu.memory_space<vmem>>, vector<8x400xf32>,
    %c0_248 = arith.constant 0 : index
    %c61_249 = arith.constant 61 : index
    %160 = vector.load %arg10[%c0_248, %c61_249] : memref<8x484xf32, #tpu.memory_space<vmem>>, vector<8x400xf32>
    %c128_250 = arith.constant 128 : index
    %c0_251 = arith.constant 0 : index
    %161 = vector.load %arg11[%c128_250, %c0_251] : memref<200x400xf32, #tpu.memory_space<vmem>>, vector<8x400xf32>
    tpu.vector_store %arg11[%c128_250, %c0_251], %160 {strides = array<i32>} : memref<200x400xf32, #tpu.memory_space<vmem>>, vector<8x400xf32>,
    %c0_252 = arith.constant 0 : index
    %c62_253 = arith.constant 62 : index
    %162 = vector.load %arg10[%c0_252, %c62_253] : memref<8x484xf32, #tpu.memory_space<vmem>>, vector<8x400xf32>
    %c136_254 = arith.constant 136 : index
    %c0_255 = arith.constant 0 : index
    %163 = vector.load %arg11[%c136_254, %c0_255] : memref<200x400xf32, #tpu.memory_space<vmem>>, vector<8x400xf32>
    tpu.vector_store %arg11[%c136_254, %c0_255], %162 {strides = array<i32>} : memref<200x400xf32, #tpu.memory_space<vmem>>, vector<8x400xf32>,
    %c0_256 = arith.constant 0 : index
    %c63_257 = arith.constant 63 : index
    %164 = vector.load %arg10[%c0_256, %c63_257] : memref<8x484xf32, #tpu.memory_space<vmem>>, vector<8x400xf32>
    %c144_258 = arith.constant 144 : index
    %c0_259 = arith.constant 0 : index
    %165 = vector.load %arg11[%c144_258, %c0_259] : memref<200x400xf32, #tpu.memory_space<vmem>>, vector<8x400xf32>
    tpu.vector_store %arg11[%c144_258, %c0_259], %164 {strides = array<i32>} : memref<200x400xf32, #tpu.memory_space<vmem>>, vector<8x400xf32>,
    %c0_260 = arith.constant 0 : index
    %c64_261 = arith.constant 64 : index
    %166 = vector.load %arg10[%c0_260, %c64_261] : memref<8x484xf32, #tpu.memory_space<vmem>>, vector<8x400xf32>
    %c152_262 = arith.constant 152 : index
    %c0_263 = arith.constant 0 : index
    %167 = vector.load %arg11[%c152_262, %c0_263] : memref<200x400xf32, #tpu.memory_space<vmem>>, vector<8x400xf32>
    tpu.vector_store %arg11[%c152_262, %c0_263], %166 {strides = array<i32>} : memref<200x400xf32, #tpu.memory_space<vmem>>, vector<8x400xf32>,
    %c0_264 = arith.constant 0 : index
    %c80_265 = arith.constant 80 : index
    %168 = vector.load %arg10[%c0_264, %c80_265] : memref<8x484xf32, #tpu.memory_space<vmem>>, vector<8x400xf32>
    %c160_266 = arith.constant 160 : index
    %c0_267 = arith.constant 0 : index
    %169 = vector.load %arg11[%c160_266, %c0_267] : memref<200x400xf32, #tpu.memory_space<vmem>>, vector<8x400xf32>
    tpu.vector_store %arg11[%c160_266, %c0_267], %168 {strides = array<i32>} : memref<200x400xf32, #tpu.memory_space<vmem>>, vector<8x400xf32>,
    %c0_268 = arith.constant 0 : index
    %c81_269 = arith.constant 81 : index
    %170 = vector.load %arg10[%c0_268, %c81_269] : memref<8x484xf32, #tpu.memory_space<vmem>>, vector<8x400xf32>
    %c168_270 = arith.constant 168 : index
    %c0_271 = arith.constant 0 : index
    %171 = vector.load %arg11[%c168_270, %c0_271] : memref<200x400xf32, #tpu.memory_space<vmem>>, vector<8x400xf32>
    tpu.vector_store %arg11[%c168_270, %c0_271], %170 {strides = array<i32>} : memref<200x400xf32, #tpu.memory_space<vmem>>, vector<8x400xf32>,
    %c0_272 = arith.constant 0 : index
    %c82_273 = arith.constant 82 : index
    %172 = vector.load %arg10[%c0_272, %c82_273] : memref<8x484xf32, #tpu.memory_space<vmem>>, vector<8x400xf32>
    %c176_274 = arith.constant 176 : index
    %c0_275 = arith.constant 0 : index
    %173 = vector.load %arg11[%c176_274, %c0_275] : memref<200x400xf32, #tpu.memory_space<vmem>>, vector<8x400xf32>
    tpu.vector_store %arg11[%c176_274, %c0_275], %172 {strides = array<i32>} : memref<200x400xf32, #tpu.memory_space<vmem>>, vector<8x400xf32>,
    %c0_276 = arith.constant 0 : index
    %c83_277 = arith.constant 83 : index
    %174 = vector.load %arg10[%c0_276, %c83_277] : memref<8x484xf32, #tpu.memory_space<vmem>>, vector<8x400xf32>
    %c184_278 = arith.constant 184 : index
    %c0_279 = arith.constant 0 : index
    %175 = vector.load %arg11[%c184_278, %c0_279] : memref<200x400xf32, #tpu.memory_space<vmem>>, vector<8x400xf32>
    tpu.vector_store %arg11[%c184_278, %c0_279], %174 {strides = array<i32>} : memref<200x400xf32, #tpu.memory_space<vmem>>, vector<8x400xf32>,
    %c0_280 = arith.constant 0 : index
    %c84_281 = arith.constant 84 : index
    %176 = vector.load %arg10[%c0_280, %c84_281] : memref<8x484xf32, #tpu.memory_space<vmem>>, vector<8x400xf32>
    %c192_282 = arith.constant 192 : index
    %c0_283 = arith.constant 0 : index
    %177 = vector.load %arg11[%c192_282, %c0_283] : memref<200x400xf32, #tpu.memory_space<vmem>>, vector<8x400xf32>
    tpu.vector_store %arg11[%c192_282, %c0_283], %176 {strides = array<i32>} : memref<200x400xf32, #tpu.memory_space<vmem>>, vector<8x400xf32>,
    %c0_284 = arith.constant 0 : index
    %c0_285 = arith.constant 0 : index
    %178 = vector.load %arg6[%c0_284, %c0_285] : memref<16x200xf32, #tpu.memory_space<vmem>>, vector<16x200xf32>
    %c0_286 = arith.constant 0 : index
    %c0_287 = arith.constant 0 : index
    %179 = vector.load %arg11[%c0_286, %c0_287] : memref<200x400xf32, #tpu.memory_space<vmem>>, vector<200x400xf32>
    %cst_288 = arith.constant dense<0.000000e+00> : vector<16x400xf32>
    %180 = tpu.matmul %178, %179, %cst_288 {dimension_numbers = #tpu.dot_dimension_numbers<[1], [0], [0], [1], [0, 0, 1, 1], [], []>} : vector<16x200xf32>, vector<200x400xf32>, vector<16x400xf32> -> vector<16x400xf32>
    %c0_289 = arith.constant 0 : index
    %c0_290 = arith.constant 0 : index
    %181 = vector.load %arg7[%c0_289, %c0_290] : memref<16x1xf32, #tpu.memory_space<vmem>>, vector<16x1xf32>
    %182 = vector.broadcast %181 : vector<16x1xf32> to vector<16x400xf32>
    %183 = arith.addf %180, %182 : vector<16x400xf32>
    %c0_291 = arith.constant 0 : index
    %c0_292 = arith.constant 0 : index
    %c0_293 = arith.constant 0 : index
    %184 = vector.load %arg9[%c0_291, %c0_292, %c0_293] : memref<1x16x400xf32, #tpu.memory_space<vmem>>, vector<1x16x400xf32>
    %185 = vector.shape_cast %184 : vector<1x16x400xf32> to vector<16x400xf32>
    %186 = vector.shape_cast %183 : vector<16x400xf32> to vector<1x16x400xf32>
    tpu.vector_store %arg9[%c0_291, %c0_292, %c0_293], %186 {strides = array<i32>} : memref<1x16x400xf32, #tpu.memory_space<vmem>>, vector<1x16x400xf32>,
    return
  }
  func.func @transform_0(%arg0: i32) -> (i32, i32, i32) {
    %c0_i32 = arith.constant 0 : i32
    %c0_i32_0 = arith.constant 0 : i32
    %c0_i32_1 = arith.constant 0 : i32
    return %arg0, %c0_i32, %c0_i32_0 : i32, i32, i32
  }
  func.func @transform_1(%arg0: i32) -> (i32, i32) {
    %c0_i32 = arith.constant 0 : i32
    %c0_i32_0 = arith.constant 0 : i32
    %c0_i32_1 = arith.constant 0 : i32
    return %c0_i32, %c0_i32_0 : i32, i32
  }
  func.func @transform_2(%arg0: i32) -> (i32, i32) {
    %c0_i32 = arith.constant 0 : i32
    %c0_i32_0 = arith.constant 0 : i32
    %c0_i32_1 = arith.constant 0 : i32
    return %c0_i32, %c0_i32_0 : i32, i32
  }
  func.func @transform_3(%arg0: i32) -> (i32, i32) {
    %c0_i32 = arith.constant 0 : i32
    %c0_i32_0 = arith.constant 0 : i32
    %c0_i32_1 = arith.constant 0 : i32
    return %c0_i32, %c0_i32_0 : i32, i32
  }
  func.func @transform_4(%arg0: i32) -> (i32, i32) {
    %c0_i32 = arith.constant 0 : i32
    %c0_i32_0 = arith.constant 0 : i32
    %c0_i32_1 = arith.constant 0 : i32
    return %c0_i32, %c0_i32_0 : i32, i32
  }
  func.func @transform_5(%arg0: i32) -> (i32, i32) {
    %c0_i32 = arith.constant 0 : i32
    %c0_i32_0 = arith.constant 0 : i32
    %c0_i32_1 = arith.constant 0 : i32
    return %c0_i32, %c0_i32_0 : i32, i32
  }
  func.func @transform_6(%arg0: i32) -> (i32, i32) {
    %c0_i32 = arith.constant 0 : i32
    %c0_i32_0 = arith.constant 0 : i32
    %c0_i32_1 = arith.constant 0 : i32
    return %c0_i32, %c0_i32_0 : i32, i32
  }
  func.func @transform_7(%arg0: i32) -> (i32, i32) {
    %c0_i32 = arith.constant 0 : i32
    %c0_i32_0 = arith.constant 0 : i32
    %c0_i32_1 = arith.constant 0 : i32
    return %c0_i32, %c0_i32_0 : i32, i32
  }
  func.func @transform_8(%arg0: i32) -> (i32, i32, i32) {
    %c0_i32 = arith.constant 0 : i32
    %c0_i32_0 = arith.constant 0 : i32
    %c0_i32_1 = arith.constant 0 : i32
    return %arg0, %c0_i32, %c0_i32_0 : i32, i32, i32
  }
}

</mosaic_0001>

<bundles_post_ra>
// kernel: channel_context_forward.1
= control target key start
LH: loop header
LB: loop body
LE: loop exit
PB: predicated region body
PF: predicated region fallthrough
CT: control target
= control target key end

     0   :  { %s3690_s27 = smov 0   ;;  %s5067_s0 = inlined_call_operand.vmem [shape: f32[2,8,400], index: 0, kind: input, shape index: {}]   ;;  %s5068_s1 = inlined_call_operand.vmem [shape: f32[8,200], index: 1, kind: input, shape index: {}]   ;;  %s5069_s2 = inlined_call_operand.vmem [shape: f32[8,1], index: 2, kind: input, shape index: {}]   ;;  %s5070_s3 = inlined_call_operand.vmem [shape: f32[8,200], index: 3, kind: input, shape index: {}]   ;;  %s5071_s4 = inlined_call_operand.vmem [shape: f32[8,1], index: 4, kind: input, shape index: {}]   ;;  %s5072_s5 = inlined_call_operand.vmem [shape: f32[16,200], index: 5, kind: input, shape index: {}]   ;;  %s5073_s6 = inlined_call_operand.vmem [shape: f32[16,1], index: 6, kind: input, shape index: {}]   ;;  %s5074_s7 = inlined_call_operand.vmem [shape: f32[1,400], index: 7, kind: input, shape index: {}]   ;;  %s5075_s8 = inlined_call_operand.vmem [shape: f32[2,16,400], index: 8, kind: output, shape index: {}]  }
   0x1   :  { %5148 = sst [smem:[#allocation7_spill]] %s5067_s0 }
   0x2   :  { %5149 = sst [smem:[#allocation8_spill]] %s5068_s1 }
   0x3   :  { %5150 = sst [smem:[#allocation9_spill]] %s5069_s2 }
   0x4   :  { %5151 = sst [smem:[#allocation10_spill]] %s5070_s3 }
   0x5 LB: > { %s3264_s28 = sadd.s32 4294967295, %s3616_s27   ;;  %p3268_p0 = scmp.ge.s32.totalorder %s3616_s27, 1  ;;  %s3616_s27 = sphi %s3690_s27, %s18_s27  }
   0x6   : > { %p262_p1 = scmp.lt.s32.totalorder %s3616_s27, 3 }
   0x8   : > { %p263_p2 = pnand %p3268_p0, %p262_p1 }
   0xa   : > { %266 = sbr.rel (%p263_p2) target bundleno = 1983 (0x7bf), region = 52 }
  0x11   : > { %p296_p3 = scmp.lt.s32.totalorder %s3264_s28, 1  ;;  %v3618_v0 = vmov 0.0   ;;  %s5152_s0 = sld [smem:[#allocation7_spill]]  ;;  %vm310_vm0 = vcmask 818176   ;;  %vm336_vm1 = vcmask 1047888   ;;  %vm340_vm2 = vcmask 474112  }
  0x12   : > { %307 = vst [vmem:[#allocation2] sm:$0xff] %v3618_v0  ;;  %s5103_s11 = smov 42   ;;  %311 = vst.msk [vmem:[#allocation2 + $0x18] sm:$0xff] %vm310_vm0, %v3618_v0  ;;  %vm328_vm3 = vcmask 343040   ;;  %s5121_s12 = smov 125   ;;  %vm349_vm4 = vcmask 130048  }
  0x13   : > { %s5284_s28 = smov (!%p296_p3, %s3264_s28), 1  ;;  %s5146_s13 = smov 127   ;;  %vm367_vm5 = vcmask 1039360   ;;  %vm5141_vm6 = vcmask 1031168   ;;  %vm5140_vm7 = vcmask 1022976   ;;  %vm5139_vm8 = vcmask 1014784  }
  0x14   : > { %s3283_s29 = sshll.u32 %s5284_s28, 5  ;;  %s5113_s14 = smov 108   ;;  %vm5137_vm9 = vcmask 883712   ;;  %vm5136_vm10 = vcmask 875520   ;;  %vm1131_vm11 = vcmask 588800   ;;  %vm5138_vm12 = vcmask 867328  }
  0x15   : > { %s5142_s15 = smov 126   ;;  %s5115_s16 = smov 106   ;;  %vm5091_vm13 = vcmask 859136   ;;  %vm5090_vm14 = vcmask 850944   ;;  %vm5093_vm15 = vcmask 719872   ;;  %vm5092_vm0 = vcmask 711680  }
  0x16   : > { %s5144_s17 = smov 124   ;;  %s5117_s18 = smov 104  }
  0x17   : > { %s300_s10 = scalar_lea.vmem %s5152_s0, %s3283_s29  ;;  %s5123_s19 = smov 107  }
  0x18   : > { %v312_v1 = vld [vmem:[%s300_s10] sm:$0xff]  ;;  %v314_v2 = vld [vmem:[%s300_s10 + $0x10] sm:$0xff]  ;;  %v313_v3 = vld [vmem:[%s300_s10 + $0x8] sm:$0xff]  ;;  %s5127_s20 = smov 87   ;;  %s5131_s21 = smov 105  }
  0x19   : > { %320 = vrot.lane.b32.xlu0 %v312_v1, %s5103_s11  ;;  %324 = vrot.lane.b32.xlu1 %v314_v2, %s5103_s11  ;;  %v315_v4 = vld [vmem:[%s300_s10 + $0x18] sm:$0xff]  ;;  %s5107_s22 = smov 85   ;;  %s5129_s23 = smov 88  }
  0x1a   : > { %s5109_s24 = smov 68   ;;  %s5125_s25 = smov 86  }
  0x1b   : > { %s5086_s26 = smov 84   ;;  %s5076_s29 = smov 67  }
  0x1c   : > { %s5111_s30 = smov 66   ;;  %s5078_s9 = smov 65  }
  0x1d   : > { %322 = vrot.lane.b32.xlu0 %v313_v3, %s5103_s11  ;;  %326 = vrot.lane.b32.xlu1 %v315_v4, %s5103_s11  ;;  %s5084_s10 = smov 64   ;;  %s5153_s1 = sld [smem:[#allocation8_spill]] }
  0x1e   : > { %s5154_s2 = sld [smem:[#allocation9_spill]]  ;;  %s5171_s3 = sld [smem:[#allocation10_spill]] }
  0x1f   : > { %s5222_s0 = smov 86  }
  0x8b   : > { %v321_v5 = vpop.permute.xlu0 %320  ;;  %v325_v6 = vpop.permute.xlu1 %324 }
  0x8c   : > { %337 = vst.msk [vmem:[#allocation2] sm:$0xff] %vm336_vm1, %v321_v5 }
  0x8f   : > { %v327_v7 = vpop.permute.xlu1 %326  ;;  %v323_v11 = vpop.permute.xlu0 %322 }
  0x90   : > { %v331_v8 = vsel %vm328_vm3, %v325_v6, %v327_v7  ;;  %v3746_v12 = vsel %vm328_vm3, %v323_v11, %v325_v6  ;;  %v3753_v13 = vsel %vm328_vm3, %v321_v5, %v323_v11  ;;  %v1024_v11 = vld [vmem:[%s5153_s1 + $0x8] sm:$0xff] }
  0x91   : > { %341 = vst.msk [vmem:[#allocation2 + $0x18] sm:$0xff] %vm340_vm2, %v331_v8  ;;  %3273 = vmatprep.mubr.msk.f32.mxu0 %vm1131_vm11, %v1024_v11  ;;  %3274 = vmatprep.mubr.msk.f32.mxu1 %vm1131_vm11, %v1024_v11 }
  0x93   : > { %v3711_v9 = vld [vmem:[#allocation2] sm:$0xff] }
  0x94   : > { %415 = vrot.lane.b32.xlu1 %v3711_v9, %s5121_s12  ;;  %359 = vrot.lane.b32.xlu0 %v3711_v9, %s5146_s13 }
  0x98   : > { %471 = vrot.lane.b32.xlu1 %v3711_v9, %s5113_s14  ;;  %387 = vrot.lane.b32.xlu0 %v3711_v9, %s5142_s15  ;;  %v3721_v10 = vld [vmem:[#allocation2 + $0x18] sm:$0xff] }
  0x99   : > { %350 = vst.msk [vmem:[#allocation3 + $0x18] sm:$0xff] %vm349_vm4, %v3721_v10 }
  0x9c   : > { %527 = vrot.lane.b32.xlu1 %v3711_v9, %s5115_s16  ;;  %443 = vrot.lane.b32.xlu0 %v3711_v9, %s5144_s17 }
  0xa0   : > { %583 = vrot.lane.b32.xlu1 %v3711_v9, %s5117_s18  ;;  %499 = vrot.lane.b32.xlu0 %v3711_v9, %s5123_s19  ;;  %v1028_v42 = vld [vmem:[#allocation3 + $0x18] sm:$0xff] }
  0xa4   : > { %639 = vrot.lane.b32.xlu1 %v3711_v9, %s5127_s20  ;;  %555 = vrot.lane.b32.xlu0 %v3711_v9, %s5131_s21 }
  0xa8   : > { %695 = vrot.lane.b32.xlu1 %v3711_v9, %s5107_s22  ;;  %611 = vrot.lane.b32.xlu0 %v3711_v9, %s5129_s23 }
  0xac   : > { %751 = vrot.lane.b32.xlu1 %v3711_v9, %s5109_s24  ;;  %667 = vrot.lane.b32.xlu0 %v3711_v9, %s5125_s25 }
  0xb0   : > { %723 = vrot.lane.b32.xlu0 %v3711_v9, %s5086_s26  ;;  %363 = vrot.lane.b32.xlu1 %v3746_v12, %s5146_s13 }
  0xb4   : > { %365 = vrot.lane.b32.xlu1 %v3721_v10, %s5146_s13  ;;  %361 = vrot.lane.b32.xlu0 %v3753_v13, %s5146_s13 }
  0xb8   : > { %391 = vrot.lane.b32.xlu1 %v3746_v12, %s5142_s15  ;;  %389 = vrot.lane.b32.xlu0 %v3753_v13, %s5142_s15 }
  0xbc   : > { %419 = vrot.lane.b32.xlu1 %v3746_v12, %s5121_s12  ;;  %417 = vrot.lane.b32.xlu0 %v3753_v13, %s5121_s12 }
  0xc0   : > { %421 = vrot.lane.b32.xlu1 %v3721_v10, %s5121_s12  ;;  %393 = vrot.lane.b32.xlu0 %v3721_v10, %s5142_s15 }
  0xc4   : > { %447 = vrot.lane.b32.xlu1 %v3746_v12, %s5144_s17  ;;  %445 = vrot.lane.b32.xlu0 %v3753_v13, %s5144_s17 }
  0xc8   : > { %475 = vrot.lane.b32.xlu1 %v3746_v12, %s5113_s14  ;;  %473 = vrot.lane.b32.xlu0 %v3753_v13, %s5113_s14 }
  0xcc   : > { %477 = vrot.lane.b32.xlu1 %v3721_v10, %s5113_s14  ;;  %449 = vrot.lane.b32.xlu0 %v3721_v10, %s5144_s17 }
  0xd0   : > { %503 = vrot.lane.b32.xlu1 %v3746_v12, %s5123_s19  ;;  %501 = vrot.lane.b32.xlu0 %v3753_v13, %s5123_s19 }
  0xd4   : > { %531 = vrot.lane.b32.xlu1 %v3746_v12, %s5115_s16  ;;  %529 = vrot.lane.b32.xlu0 %v3753_v13, %s5115_s16 }
  0xd8   : > { %533 = vrot.lane.b32.xlu1 %v3721_v10, %s5115_s16  ;;  %505 = vrot.lane.b32.xlu0 %v3721_v10, %s5123_s19 }
  0xdc   : > { %559 = vrot.lane.b32.xlu1 %v3746_v12, %s5131_s21  ;;  %557 = vrot.lane.b32.xlu0 %v3753_v13, %s5131_s21 }
  0xe0   : > { %587 = vrot.lane.b32.xlu1 %v3746_v12, %s5117_s18  ;;  %585 = vrot.lane.b32.xlu0 %v3753_v13, %s5117_s18 }
  0xe4   : > { %589 = vrot.lane.b32.xlu1 %v3721_v10, %s5117_s18  ;;  %561 = vrot.lane.b32.xlu0 %v3721_v10, %s5131_s21 }
  0xe8   : > { %615 = vrot.lane.b32.xlu1 %v3746_v12, %s5129_s23  ;;  %613 = vrot.lane.b32.xlu0 %v3753_v13, %s5129_s23 }
  0xec   : > { %643 = vrot.lane.b32.xlu1 %v3746_v12, %s5127_s20  ;;  %641 = vrot.lane.b32.xlu0 %v3753_v13, %s5127_s20 }
  0xf0   : > { %645 = vrot.lane.b32.xlu1 %v3721_v10, %s5127_s20  ;;  %617 = vrot.lane.b32.xlu0 %v3721_v10, %s5129_s23 }
  0xf4   : > { %671 = vrot.lane.b32.xlu1 %v3746_v12, %s5125_s25  ;;  %669 = vrot.lane.b32.xlu0 %v3753_v13, %s5125_s25 }
  0xf8   : > { %699 = vrot.lane.b32.xlu1 %v3746_v12, %s5107_s22  ;;  %697 = vrot.lane.b32.xlu0 %v3753_v13, %s5107_s22 }
  0xfc   : > { %701 = vrot.lane.b32.xlu1 %v3721_v10, %s5107_s22  ;;  %673 = vrot.lane.b32.xlu0 %v3721_v10, %s5125_s25 }
 0x100   : > { %727 = vrot.lane.b32.xlu1 %v3746_v12, %s5086_s26  ;;  %725 = vrot.lane.b32.xlu0 %v3753_v13, %s5086_s26 }
 0x104   : > { %755 = vrot.lane.b32.xlu1 %v3746_v12, %s5109_s24  ;;  %753 = vrot.lane.b32.xlu0 %v3753_v13, %s5109_s24 }
 0x106   : > { %v3839_v14 = vpop.permute.xlu1 %415  ;;  %v360_v15 = vpop.permute.xlu0 %359 }
 0x108   : > { %757 = vrot.lane.b32.xlu1 %v3721_v10, %s5109_s24  ;;  %729 = vrot.lane.b32.xlu0 %v3721_v10, %s5086_s26  ;;  %s5105_s26 = smov 44  }
 0x10a   : > { %v3845_v16 = vpop.permute.xlu1 %471  ;;  %v388_v17 = vpop.permute.xlu0 %387 }
 0x10c   : > { %783 = vrot.lane.b32.xlu1 %v3746_v12, %s5076_s29  ;;  %781 = vrot.lane.b32.xlu0 %v3753_v13, %s5076_s29 }
 0x10e   : > { %v3851_v18 = vpop.permute.xlu1 %527  ;;  %v3853_v19 = vpop.permute.xlu0 %443 }
 0x110   : > { %811 = vrot.lane.b32.xlu1 %v3746_v12, %s5111_s30  ;;  %809 = vrot.lane.b32.xlu0 %v3753_v13, %s5111_s30 }
 0x112   : > { %v3859_v20 = vpop.permute.xlu1 %583  ;;  %v3861_v21 = vpop.permute.xlu0 %499 }
 0x114   : > { %807 = vrot.lane.b32.xlu1 %v3711_v9, %s5111_s30  ;;  %779 = vrot.lane.b32.xlu0 %v3711_v9, %s5076_s29 }
 0x116   : > { %v3867_v22 = vpop.permute.xlu1 %639  ;;  %v3869_v23 = vpop.permute.xlu0 %555 }
 0x118   : > { %813 = vrot.lane.b32.xlu1 %v3721_v10, %s5111_s30  ;;  %785 = vrot.lane.b32.xlu0 %v3721_v10, %s5076_s29  ;;  %s5080_s29 = smov 48  }
 0x11a   : > { %v3875_v24 = vpop.permute.xlu1 %695  ;;  %v3877_v25 = vpop.permute.xlu0 %611 }
 0x11c   : > { %839 = vrot.lane.b32.xlu1 %v3746_v12, %s5078_s9  ;;  %837 = vrot.lane.b32.xlu0 %v3753_v13, %s5078_s9 }
 0x11e   : > { %v3883_v26 = vpop.permute.xlu1 %751  ;;  %v3885_v27 = vpop.permute.xlu0 %667 }
 0x120   : > { %867 = vrot.lane.b32.xlu1 %v3746_v12, %s5084_s10  ;;  %865 = vrot.lane.b32.xlu0 %v3753_v13, %s5084_s10 }
 0x122   : > { %v364_v28 = vpop.permute.xlu1 %363  ;;  %v3891_v29 = vpop.permute.xlu0 %723 }
 0x124   : > { %863 = vrot.lane.b32.xlu1 %v3711_v9, %s5084_s10  ;;  %835 = vrot.lane.b32.xlu0 %v3711_v9, %s5078_s9 }
 0x126   : > { %v366_v30 = vpop.permute.xlu1 %365  ;;  %v362_v31 = vpop.permute.xlu0 %361 }
 0x127   : > { %378 = vst.msk [vmem:[#allocation3 + $0x38] sm:$0xff] %vm349_vm4, %v366_v30  ;;  %v368_v32 = vsel %vm367_vm5, %v360_v15, %v362_v31  ;;  %v369_v33 = vsel %vm367_vm5, %v362_v31, %v364_v28  ;;  %v370_v38 = vsel %vm367_vm5, %v364_v28, %v366_v30 }
 0x128   : > { %869 = vrot.lane.b32.xlu1 %v3721_v10, %s5084_s10  ;;  %841 = vrot.lane.b32.xlu0 %v3721_v10, %s5078_s9  ;;  %v3285_v34 = vpack.c.bf16 %v369_v33, %v3753_v13  ;;  %v3287_v35 = vpack.c.bf16 %v368_v32, %v3711_v9  ;;  %s5082_s9 = smov 47   ;;  %v3335_v48 = vpack.c.bf16 %v370_v38, %v3746_v12  ;;  %s5159_s10 = smov 64  }
 0x12a   : > { %v392_v36 = vpop.permute.xlu1 %391  ;;  %v390_v37 = vpop.permute.xlu0 %389  ;;  %3286 = vmatprep.subr.bf16.mxu0 %v3285_v34 }
 0x12b   : > { %3288 = vmatpush1.bf16.msra.mxu0 %v3287_v35  ;;  %v396_v39 = vsel %vm5141_vm6, %v388_v17, %v390_v37  ;;  %v397_v44 = vsel %vm5141_vm6, %v390_v37, %v392_v36 }
 0x12c   : > { %895 = vrot.lane.b32.xlu1 %v3746_v12, %s5080_s29  ;;  %893 = vrot.lane.b32.xlu0 %v3753_v13, %s5080_s29 }
 0x12e   : > { %v420_v40 = vpop.permute.xlu1 %419  ;;  %v418_v41 = vpop.permute.xlu0 %417  ;;  %v1032_v43 = vld [vmem:[#allocation3 + $0x38] sm:$0xff] }
 0x12f   : > { %v424_v45 = vsel %vm5140_vm7, %v3839_v14, %v418_v41  ;;  %v425_v46 = vsel %vm5140_vm7, %v418_v41, %v420_v40  ;;  %v3333_v47 = vpack.c.bf16 %v1032_v43, %v1028_v42 }
 0x130   : > { %923 = vrot.lane.b32.xlu1 %v3746_v12, %s5082_s9  ;;  %921 = vrot.lane.b32.xlu0 %v3753_v13, %s5082_s9  ;;  %v3289_v49 = vpack.c.bf16 %v425_v46, %v397_v44  ;;  %v3291_v50 = vpack.c.bf16 %v424_v45, %v396_v39 }
 0x131   : > { %3334 = vmatprep.subr.bf16.mxu1 %v3333_v47 }
 0x132   : > { %v422_v51 = vpop.permute.xlu1 %421  ;;  %3336 = vmatpush1.bf16.msra.mxu1 %v3335_v48  ;;  %v394_v52 = vpop.permute.xlu0 %393  ;;  %3290 = vmatprep.subr.bf16.mxu0 %v3289_v49 }
 0x133   : > { %434 = vst.msk [vmem:[#allocation3 + $0x78] sm:$0xff] %vm349_vm4, %v422_v51  ;;  %406 = vst.msk [vmem:[#allocation3 + $0x58] sm:$0xff] %vm349_vm4, %v394_v52  ;;  %3292 = vmatpush1.bf16.msra.mxu0 %v3291_v50  ;;  %v426_v55 = vsel %vm5140_vm7, %v420_v40, %v422_v51  ;;  %v398_v56 = vsel %vm5141_vm6, %v392_v36, %v394_v52  ;;  %v3644_v40 = vmov 0  }
 0x134   : > { %919 = vrot.lane.b32.xlu1 %v3711_v9, %s5082_s9  ;;  %891 = vrot.lane.b32.xlu0 %v3711_v9, %s5080_s29  ;;  %v3339_v2 = vpack.c.bf16 %v426_v55, %v398_v56 }
 0x135   : > { %3608 = vset.pattern.permute.xlu0 %v3644_v40  ;;  %3609 = vset.pattern.permute.xlu1 %v3644_v40 }
 0x136   : > { %v448_v53 = vpop.permute.xlu1 %447  ;;  %v446_v54 = vpop.permute.xlu0 %445 }
 0x137   : > { %v452_v57 = vsel %vm5139_vm8, %v3853_v19, %v446_v54  ;;  %v453_v62 = vsel %vm5139_vm8, %v446_v54, %v448_v53 }
 0x138   : > { %925 = vrot.lane.b32.xlu1 %v3721_v10, %s5082_s9  ;;  %897 = vrot.lane.b32.xlu0 %v3721_v10, %s5080_s29  ;;  %s5088_s29 = smov 46   ;;  %s5119_s9 = smov 45  }
 0x13a   : > { %v476_v58 = vpop.permute.xlu1 %475  ;;  %v474_v59 = vpop.permute.xlu0 %473  ;;  %v1036_v60 = vld [vmem:[#allocation3 + $0x58] sm:$0xff] }
 0x13b   : > { %v1040_v61 = vld [vmem:[#allocation3 + $0x78] sm:$0xff]  ;;  %v480_v63 = vsel %vm5137_vm9, %v3845_v16, %v474_v59  ;;  %v481_v0 = vsel %vm5137_vm9, %v474_v59, %v476_v58 }
 0x13c   : > { %v3337_v1 = vpack.c.bf16 %v1040_v61, %v1036_v60  ;;  %951 = vrot.lane.b32.xlu1 %v3746_v12, %s5088_s29  ;;  %949 = vrot.lane.b32.xlu0 %v3753_v13, %s5088_s29  ;;  %v3293_v3 = vpack.c.bf16 %v481_v0, %v453_v62  ;;  %v3295_v4 = vpack.c.bf16 %v480_v63, %v452_v57 }
 0x13e   : > { %3338 = vmatprep.subr.bf16.mxu1 %v3337_v1  ;;  %v478_v5 = vpop.permute.xlu1 %477  ;;  %v450_v6 = vpop.permute.xlu0 %449  ;;  %3294 = vmatprep.subr.bf16.mxu0 %v3293_v3 }
 0x13f   : > { %3340 = vmatpush1.bf16.msra.mxu1 %v3339_v2  ;;  %490 = vst.msk [vmem:[#allocation3 + $0xb8] sm:$0xff] %vm349_vm4, %v478_v5  ;;  %462 = vst.msk [vmem:[#allocation3 + $0x98] sm:$0xff] %vm349_vm4, %v450_v6  ;;  %3296 = vmatpush1.bf16.msra.mxu0 %v3295_v4  ;;  %v482_v14 = vsel %vm5137_vm9, %v476_v58, %v478_v5  ;;  %v454_v15 = vsel %vm5139_vm8, %v448_v53, %v450_v6 }
 0x140   : > { %979 = vrot.lane.b32.xlu1 %v3746_v12, %s5119_s9  ;;  %977 = vrot.lane.b32.xlu0 %v3753_v13, %s5119_s9  ;;  %v3343_v35 = vpack.c.bf16 %v482_v14, %v454_v15 }
 0x142   : > { %v504_v7 = vpop.permute.xlu1 %503  ;;  %v502_v8 = vpop.permute.xlu0 %501 }
 0x143   : > { %v508_v16 = vsel %vm5136_vm10, %v3861_v21, %v502_v8  ;;  %v509_v31 = vsel %vm5136_vm10, %v502_v8, %v504_v7 }
 0x144   : > { %975 = vrot.lane.b32.xlu1 %v3711_v9, %s5119_s9  ;;  %947 = vrot.lane.b32.xlu0 %v3711_v9, %s5088_s29 }
 0x146   : > { %v532_v17 = vpop.permute.xlu1 %531  ;;  %v530_v19 = vpop.permute.xlu0 %529  ;;  %v1044_v28 = vld [vmem:[#allocation3 + $0x98] sm:$0xff] }
 0x147   : > { %v1048_v30 = vld [vmem:[#allocation3 + $0xb8] sm:$0xff]  ;;  %v536_v32 = vsel %vm5138_vm12, %v3851_v18, %v530_v19  ;;  %v537_v33 = vsel %vm5138_vm12, %v530_v19, %v532_v17 }
 0x148   : > { %v3341_v34 = vpack.c.bf16 %v1048_v30, %v1044_v28  ;;  %981 = vrot.lane.b32.xlu1 %v3721_v10, %s5119_s9  ;;  %953 = vrot.lane.b32.xlu0 %v3721_v10, %s5088_s29  ;;  %v3297_v21 = vpack.c.bf16 %v537_v33, %v509_v31  ;;  %v3299_v36 = vpack.c.bf16 %v536_v32, %v508_v16  ;;  %s5158_s29 = smov 84  }
 0x14a   : > { %3342 = vmatprep.subr.bf16.mxu1 %v3341_v34  ;;  %v534_v37 = vpop.permute.xlu1 %533  ;;  %v506_v38 = vpop.permute.xlu0 %505  ;;  %3298 = vmatprep.subr.bf16.mxu0 %v3297_v21 }
 0x14b   : > { %3344 = vmatpush1.bf16.msra.mxu1 %v3343_v35  ;;  %546 = vst.msk [vmem:[#allocation3 + $0xf8] sm:$0xff] %vm349_vm4, %v534_v37  ;;  %518 = vst.msk [vmem:[#allocation3 + $0xd8] sm:$0xff] %vm349_vm4, %v506_v38  ;;  %3300 = vmatpush1.bf16.msra.mxu0 %v3299_v36  ;;  %v538_v41 = vsel %vm5138_vm12, %v532_v17, %v534_v37 }
 0x14c   : > { %1007 = vrot.lane.b32.xlu1 %v3746_v12, %s5105_s26  ;;  %1005 = vrot.lane.b32.xlu0 %v3753_v13, %s5105_s26  ;;  %v510_v12 = vsel %vm5136_vm10, %v504_v7, %v506_v38  ;;  %v1125_v13 = vld [vmem:[%s5154_s2] sm:$0xff]  ;;  %s5224_s2 = smov 126  }
 0x14d   : > { %v3347_v49 = vpack.c.bf16 %v538_v41, %v510_v12 }
 0x14e   : > { %v560_v18 = vpop.permute.xlu1 %559  ;;  %v558_v39 = vpop.permute.xlu0 %557 }
 0x14f   : > { %v564_v42 = vsel %vm5091_vm13, %v3869_v23, %v558_v39 }
 0x150   : > { %1009 = vrot.lane.b32.xlu1 %v3721_v10, %s5105_s26  ;;  %1003 = vrot.lane.b32.xlu0 %v3711_v9, %s5105_s26  ;;  %v565_v10 = vsel %vm5091_vm13, %v558_v39, %v560_v18  ;;  %s5161_s26 = smov 47  }
 0x152   : > { %v588_v43 = vpop.permute.xlu1 %587  ;;  %v586_v44 = vpop.permute.xlu0 %585  ;;  %v1052_v45 = vld [vmem:[#allocation3 + $0xd8] sm:$0xff] }
 0x153   : > { %v1056_v46 = vld [vmem:[#allocation3 + $0xf8] sm:$0xff]  ;;  %v592_v9 = vsel %vm5090_vm14, %v3859_v20, %v586_v44  ;;  %v593_v47 = vsel %vm5090_vm14, %v586_v44, %v588_v43 }
 0x154   : > { %v3345_v48 = vpack.c.bf16 %v1056_v46, %v1052_v45  ;;  %v3301_v50 = vpack.c.bf16 %v593_v47, %v565_v10  ;;  %v3303_v51 = vpack.c.bf16 %v592_v9, %v564_v42  ;;  %1128 = vperm.xlu0 %3608, %v1125_v13  }
 0x156   : > { %3346 = vmatprep.subr.bf16.mxu1 %v3345_v48  ;;  %v590_v52 = vpop.permute.xlu1 %589  ;;  %v562_v23 = vpop.permute.xlu0 %561  ;;  %3302 = vmatprep.subr.bf16.mxu0 %v3301_v50 }
 0x157   : > { %3348 = vmatpush1.bf16.msra.mxu1 %v3347_v49  ;;  %602 = vst.msk [vmem:[#allocation3 + $0x138] sm:$0xff] %vm349_vm4, %v590_v52  ;;  %574 = vst.msk [vmem:[#allocation3 + $0x118] sm:$0xff] %vm349_vm4, %v562_v23  ;;  %3304 = vmatpush1.bf16.msra.mxu0 %v3303_v51  ;;  %v594_v20 = vsel %vm5090_vm14, %v588_v43, %v590_v52  ;;  %v566_v55 = vsel %vm5091_vm13, %v560_v18, %v562_v23  ;;  %vm5095_vm14 = vcmask 703488   ;;  %vm5094_vm13 = vcmask 695296  }
 0x158   : > { %v3351_v1 = vpack.c.bf16 %v594_v20, %v566_v55 }
 0x15a   : > { %v616_v53 = vpop.permute.xlu1 %615  ;;  %v614_v54 = vpop.permute.xlu0 %613 }
 0x15b   : > { %v620_v56 = vsel %vm5093_vm15, %v3877_v25, %v614_v54  ;;  %v621_v61 = vsel %vm5093_vm15, %v614_v54, %v616_v53 }
 0x15e   : > { %v644_v57 = vpop.permute.xlu1 %643  ;;  %v642_v58 = vpop.permute.xlu0 %641  ;;  %v1060_v59 = vld [vmem:[#allocation3 + $0x118] sm:$0xff] }
 0x15f   : > { %v1064_v60 = vld [vmem:[#allocation3 + $0x138] sm:$0xff]  ;;  %v648_v62 = vsel %vm5092_vm0, %v3867_v22, %v642_v58  ;;  %v649_v63 = vsel %vm5092_vm0, %v642_v58, %v644_v57 }
 0x160   : > { %v3349_v0 = vpack.c.bf16 %v1064_v60, %v1060_v59  ;;  %v3305_v2 = vpack.c.bf16 %v649_v63, %v621_v61  ;;  %v3307_v3 = vpack.c.bf16 %v648_v62, %v620_v56 }
 0x162   : > { %3350 = vmatprep.subr.bf16.mxu1 %v3349_v0  ;;  %v646_v4 = vpop.permute.xlu1 %645  ;;  %v618_v5 = vpop.permute.xlu0 %617  ;;  %3306 = vmatprep.subr.bf16.mxu0 %v3305_v2 }
 0x163   : > { %3352 = vmatpush1.bf16.msra.mxu1 %v3351_v1  ;;  %658 = vst.msk [vmem:[#allocation3 + $0x178] sm:$0xff] %vm349_vm4, %v646_v4  ;;  %630 = vst.msk [vmem:[#allocation3 + $0x158] sm:$0xff] %vm349_vm4, %v618_v5  ;;  %3308 = vmatpush1.bf16.msra.mxu0 %v3307_v3  ;;  %v650_v22 = vsel %vm5092_vm0, %v644_v57, %v646_v4  ;;  %v622_v7 = vsel %vm5093_vm15, %v616_v53, %v618_v5  ;;  %vm5097_vm0 = vcmask 687104   ;;  %vm5096_vm15 = vcmask 556032  }
 0x164   : > { %v3355_v31 = vpack.c.bf16 %v650_v22, %v622_v7 }
 0x166   : > { %v672_v25 = vpop.permute.xlu1 %671  ;;  %v670_v6 = vpop.permute.xlu0 %669 }
 0x167   : > { %v676_v8 = vsel %vm5095_vm14, %v3885_v27, %v670_v6  ;;  %v677_v17 = vsel %vm5095_vm14, %v670_v6, %v672_v25 }
 0x16a   : > { %v700_v11 = vpop.permute.xlu1 %699  ;;  %v698_v14 = vpop.permute.xlu0 %697  ;;  %v1068_v15 = vld [vmem:[#allocation3 + $0x158] sm:$0xff] }
 0x16b   : > { %v1072_v16 = vld [vmem:[#allocation3 + $0x178] sm:$0xff]  ;;  %v704_v19 = vsel %vm5094_vm13, %v3875_v24, %v698_v14  ;;  %v705_v28 = vsel %vm5094_vm13, %v698_v14, %v700_v11 }
 0x16c   : > { %v3353_v30 = vpack.c.bf16 %v1072_v16, %v1068_v15  ;;  %v3309_v32 = vpack.c.bf16 %v705_v28, %v677_v17  ;;  %v3311_v33 = vpack.c.bf16 %v704_v19, %v676_v8 }
 0x16e   : > { %3354 = vmatprep.subr.bf16.mxu1 %v3353_v30  ;;  %v702_v34 = vpop.permute.xlu1 %701  ;;  %v674_v35 = vpop.permute.xlu0 %673  ;;  %3310 = vmatprep.subr.bf16.mxu0 %v3309_v32 }
 0x16f   : > { %3356 = vmatpush1.bf16.msra.mxu1 %v3355_v31  ;;  %714 = vst.msk [vmem:[#allocation3 + $0x1b8] sm:$0xff] %vm349_vm4, %v702_v34  ;;  %686 = vst.msk [vmem:[#allocation3 + $0x198] sm:$0xff] %vm349_vm4, %v674_v35  ;;  %3312 = vmatpush1.bf16.msra.mxu0 %v3311_v33  ;;  %v706_v24 = vsel %vm5094_vm13, %v700_v11, %v702_v34  ;;  %v678_v36 = vsel %vm5095_vm14, %v672_v25, %v674_v35  ;;  %vm5099_vm13 = vcmask 547840   ;;  %vm5098_vm14 = vcmask 539648  }
 0x170   : > { %v3359_v43 = vpack.c.bf16 %v706_v24, %v678_v36 }
 0x172   : > { %v728_v27 = vpop.permute.xlu1 %727  ;;  %v726_v21 = vpop.permute.xlu0 %725 }
 0x173   : > { %v732_v37 = vsel %vm5097_vm0, %v3891_v29, %v726_v21  ;;  %v733_v41 = vsel %vm5097_vm0, %v726_v21, %v728_v27 }
 0x176   : > { %v756_v38 = vpop.permute.xlu1 %755  ;;  %v754_v18 = vpop.permute.xlu0 %753  ;;  %v1076_v39 = vld [vmem:[#allocation3 + $0x198] sm:$0xff] }
 0x177   : > { %v1080_v40 = vld [vmem:[#allocation3 + $0x1b8] sm:$0xff]  ;;  %v760_v12 = vsel %vm5096_vm15, %v3883_v26, %v754_v18  ;;  %v761_v13 = vsel %vm5096_vm15, %v754_v18, %v756_v38 }
 0x178   : > { %v3357_v42 = vpack.c.bf16 %v1080_v40, %v1076_v39  ;;  %v3313_v44 = vpack.c.bf16 %v761_v13, %v733_v41  ;;  %v3315_v45 = vpack.c.bf16 %v760_v12, %v732_v37 }
 0x17a   : > { %3358 = vmatprep.subr.bf16.mxu1 %v3357_v42  ;;  %v758_v46 = vpop.permute.xlu1 %757  ;;  %v730_v10 = vpop.permute.xlu0 %729  ;;  %3314 = vmatprep.subr.bf16.mxu0 %v3313_v44 }
 0x17b   : > { %3360 = vmatpush1.bf16.msra.mxu1 %v3359_v43  ;;  %770 = vst.msk [vmem:[#allocation3 + $0x1f8] sm:$0xff] %vm349_vm4, %v758_v46  ;;  %742 = vst.msk [vmem:[#allocation3 + $0x1d8] sm:$0xff] %vm349_vm4, %v730_v10  ;;  %3316 = vmatpush1.bf16.msra.mxu0 %v3315_v45  ;;  %v762_v26 = vsel %vm5096_vm15, %v756_v38, %v758_v46  ;;  %v734_v47 = vsel %vm5097_vm0, %v728_v27, %v730_v10  ;;  %vm5101_vm15 = vcmask 531456   ;;  %vm5100_vm0 = vcmask 523264  }
 0x17c   : > { %v3363_v54 = vpack.c.bf16 %v762_v26, %v734_v47 }
 0x17e   : > { %v784_v29 = vpop.permute.xlu1 %783  ;;  %v782_v9 = vpop.permute.xlu0 %781 }
 0x17f   : > { %v789_v52 = vsel %vm5099_vm13, %v782_v9, %v784_v29 }
 0x182   : > { %v812_v48 = vpop.permute.xlu1 %811  ;;  %v810_v49 = vpop.permute.xlu0 %809  ;;  %v1084_v50 = vld [vmem:[#allocation3 + $0x1d8] sm:$0xff] }
 0x183   : > { %v1088_v51 = vld [vmem:[#allocation3 + $0x1f8] sm:$0xff]  ;;  %v817_v23 = vsel %vm5098_vm14, %v810_v49, %v812_v48 }
 0x184   : > { %v3361_v53 = vpack.c.bf16 %v1088_v51, %v1084_v50  ;;  %v3317_v20 = vpack.c.bf16 %v817_v23, %v789_v52 }
 0x186   : > { %3362 = vmatprep.subr.bf16.mxu1 %v3361_v53  ;;  %v808_v55 = vpop.permute.xlu1 %807  ;;  %v780_v56 = vpop.permute.xlu0 %779  ;;  %3318 = vmatprep.subr.bf16.mxu0 %v3317_v20 }
 0x187   : > { %3364 = vmatpush1.bf16.msra.mxu1 %v3363_v54  ;;  %v816_v57 = vsel %vm5098_vm14, %v808_v55, %v810_v49  ;;  %v788_v58 = vsel %vm5099_vm13, %v780_v56, %v782_v9 }
 0x188   : > { %v3319_v59 = vpack.c.bf16 %v816_v57, %v788_v58 }
 0x18a   : > { %v814_v60 = vpop.permute.xlu1 %813  ;;  %v786_v61 = vpop.permute.xlu0 %785  ;;  %3320 = vmatpush1.bf16.msra.mxu0 %v3319_v59 }
 0x18b   : > { %826 = vst.msk [vmem:[#allocation3 + $0x238] sm:$0xff] %vm349_vm4, %v814_v60  ;;  %798 = vst.msk [vmem:[#allocation3 + $0x218] sm:$0xff] %vm349_vm4, %v786_v61  ;;  %v818_v0 = vsel %vm5098_vm14, %v812_v48, %v814_v60  ;;  %v790_v1 = vsel %vm5099_vm13, %v784_v29, %v786_v61  ;;  %vm899_vm14 = vcmask 392192   ;;  %vm5102_vm13 = vcmask 384000  }
 0x18c   : > { %v3367_v7 = vpack.c.bf16 %v818_v0, %v790_v1 }
 0x18e   : > { %v840_v62 = vpop.permute.xlu1 %839  ;;  %v838_v63 = vpop.permute.xlu0 %837 }
 0x18f   : > { %v845_v25 = vsel %vm5101_vm15, %v838_v63, %v840_v62 }
 0x192   : > { %v868_v2 = vpop.permute.xlu1 %867  ;;  %v866_v3 = vpop.permute.xlu0 %865  ;;  %v1092_v4 = vld [vmem:[#allocation3 + $0x218] sm:$0xff] }
 0x193   : > { %v1096_v5 = vld [vmem:[#allocation3 + $0x238] sm:$0xff]  ;;  %v873_v6 = vsel %vm5100_vm0, %v866_v3, %v868_v2 }
 0x194   : > { %v3365_v22 = vpack.c.bf16 %v1096_v5, %v1092_v4  ;;  %v3321_v8 = vpack.c.bf16 %v873_v6, %v845_v25 }
 0x196   : > { %3366 = vmatprep.subr.bf16.mxu1 %v3365_v22  ;;  %v864_v11 = vpop.permute.xlu1 %863  ;;  %v836_v14 = vpop.permute.xlu0 %835  ;;  %3322 = vmatprep.subr.bf16.mxu0 %v3321_v8 }
 0x197   : > { %3368 = vmatpush1.bf16.msra.mxu1 %v3367_v7  ;;  %v872_v15 = vsel %vm5100_vm0, %v864_v11, %v866_v3  ;;  %v844_v16 = vsel %vm5101_vm15, %v836_v14, %v838_v63  ;;  %v1023_v3 = vld [vmem:[%s5153_s1] sm:$0xff]  ;;  %v1282_v7 = vlaneseq  ;;  %s5223_s1 = smov 127  }
 0x198   : > { %v3323_v17 = vpack.c.bf16 %v872_v15, %v844_v16  ;;  %v306_v15 = vld [vmem:[%s5074_s7] sm:$0xf] }
 0x199   : > { %v1283_v8 = vshrl.u32 %v1282_v7, 7 }
 0x19a   : > { %v870_v19 = vpop.permute.xlu1 %869  ;;  %v842_v28 = vpop.permute.xlu0 %841  ;;  %3324 = vmatpush1.bf16.msra.mxu0 %v3323_v17 }
 0x19b   : > { %882 = vst.msk [vmem:[#allocation3 + $0x278] sm:$0xff] %vm349_vm4, %v870_v19  ;;  %854 = vst.msk [vmem:[#allocation3 + $0x258] sm:$0xff] %vm349_vm4, %v842_v28  ;;  %v874_v32 = vsel %vm5100_vm0, %v868_v2, %v870_v19  ;;  %v846_v33 = vsel %vm5101_vm15, %v840_v62, %v842_v28  ;;  %vm955_vm0 = vcmask 375808   ;;  %vm983_vm15 = vcmask 367616  }
 0x19c   : > { %v3371_v38 = vpack.c.bf16 %v874_v32, %v846_v33  ;;  %v1284_v11 = vsub.s32 0, %v1283_v8  ;;  %v1296_v33 = vsub.s32 3, %v1283_v8 }
 0x19e   : > { %v896_v30 = vpop.permute.xlu1 %895  ;;  %v894_v31 = vpop.permute.xlu0 %893  ;;  %v4067_v28 = vrot.slane %v306_v15, %v1284_v11 }
 0x19f   : > { %v901_v24 = vsel %vm899_vm14, %v894_v31, %v896_v30 }
 0x1a0   : > { %5155 = vst [vmem:[#allocation4_spill] sm:$0xff] %v4067_v28 }
 0x1a2   : > { %v924_v34 = vpop.permute.xlu1 %923  ;;  %v922_v35 = vpop.permute.xlu0 %921  ;;  %v1100_v27 = vld [vmem:[#allocation3 + $0x258] sm:$0xff] }
 0x1a3   : > { %v1104_v21 = vld [vmem:[#allocation3 + $0x278] sm:$0xff]  ;;  %v929_v36 = vsel %vm5102_vm13, %v922_v35, %v924_v34 }
 0x1a4   : > { %v3369_v37 = vpack.c.bf16 %v1104_v21, %v1100_v27  ;;  %v3325_v18 = vpack.c.bf16 %v929_v36, %v901_v24  ;;  %v1288_v36 = vsub.s32 1, %v1283_v8 }
 0x1a6   : > { %3370 = vmatprep.subr.bf16.mxu1 %v3369_v37  ;;  %v920_v39 = vpop.permute.xlu1 %919  ;;  %v892_v40 = vpop.permute.xlu0 %891  ;;  %3326 = vmatprep.subr.bf16.mxu0 %v3325_v18 }
 0x1a7   : > { %3372 = vmatpush1.bf16.msra.mxu1 %v3371_v38  ;;  %v928_v41 = vsel %vm5102_vm13, %v920_v39, %v922_v35  ;;  %v900_v12 = vsel %vm899_vm14, %v892_v40, %v894_v31  ;;  %v1292_v31 = vsub.s32 2, %v1283_v8  ;;  %v4073_v38 = vrot.slane %v306_v15, %v1296_v33 }
 0x1a8   : > { %v3327_v13 = vpack.c.bf16 %v928_v41, %v900_v12  ;;  %v4076_v12 = vrot.slane %v306_v15, %v1288_v36 }
 0x1a9   : > { %v4071_v21 = vrot.slane %v306_v15, %v1292_v31  ;;  %5156 = vst [vmem:[#allocation5_spill] sm:$0xff] %v4073_v38 }
 0x1aa   : > { %v926_v42 = vpop.permute.xlu1 %925  ;;  %v898_v43 = vpop.permute.xlu0 %897  ;;  %3328 = vmatpush1.bf16.msra.mxu0 %v3327_v13  ;;  %5157 = vst [vmem:[#allocation6_spill] sm:$0xff] %v4076_v12 }
 0x1ab   : > { %938 = vst.msk [vmem:[#allocation3 + $0x2b8] sm:$0xff] %vm349_vm4, %v926_v42  ;;  %910 = vst.msk [vmem:[#allocation3 + $0x298] sm:$0xff] %vm349_vm4, %v898_v43  ;;  %v930_v46 = vsel %vm5102_vm13, %v924_v34, %v926_v42  ;;  %v902_v10 = vsel %vm899_vm14, %v896_v30, %v898_v43  ;;  %vm1011_vm13 = vcmask 359424  }
 0x1ac   : > { %v3375_v51 = vpack.c.bf16 %v930_v46, %v902_v10 }
 0x1ae   : > { %v952_v44 = vpop.permute.xlu1 %951  ;;  %v950_v45 = vpop.permute.xlu0 %949 }
 0x1af   : > { %v957_v48 = vsel %vm955_vm0, %v950_v45, %v952_v44 }
 0x1b2   : > { %v980_v29 = vpop.permute.xlu1 %979  ;;  %v978_v9 = vpop.permute.xlu0 %977  ;;  %v1108_v26 = vld [vmem:[#allocation3 + $0x298] sm:$0xff] }
 0x1b3   : > { %v1112_v47 = vld [vmem:[#allocation3 + $0x2b8] sm:$0xff]  ;;  %v985_v49 = vsel %vm983_vm15, %v978_v9, %v980_v29 }
 0x1b4   : > { %v3373_v50 = vpack.c.bf16 %v1112_v47, %v1108_v26  ;;  %v3329_v52 = vpack.c.bf16 %v985_v49, %v957_v48 }
 0x1b6   : > { %3374 = vmatprep.subr.bf16.mxu1 %v3373_v50  ;;  %v976_v23 = vpop.permute.xlu1 %975  ;;  %v948_v53 = vpop.permute.xlu0 %947  ;;  %3330 = vmatprep.subr.bf16.mxu0 %v3329_v52 }
 0x1b7   : > { %3376 = vmatpush1.bf16.msra.mxu1 %v3375_v51  ;;  %v984_v54 = vsel %vm983_vm15, %v976_v23, %v978_v9  ;;  %v956_v20 = vsel %vm955_vm0, %v948_v53, %v950_v45 }
 0x1b8   : > { %v3331_v55 = vpack.c.bf16 %v984_v54, %v956_v20 }
 0x1ba   : > { %v982_v56 = vpop.permute.xlu1 %981  ;;  %v954_v57 = vpop.permute.xlu0 %953  ;;  %3332 = vmatpush1.bf16.msra.mxu0 %v3331_v55 }
 0x1bb   : > { %994 = vst.msk [vmem:[#allocation3 + $0x2f8] sm:$0xff] %vm349_vm4, %v982_v56  ;;  %966 = vst.msk [vmem:[#allocation3 + $0x2d8] sm:$0xff] %vm349_vm4, %v954_v57  ;;  %v986_v61 = vsel %vm983_vm15, %v980_v29, %v982_v56  ;;  %v958_v62 = vsel %vm955_vm0, %v952_v44, %v954_v57 }
 0x1bc   : > { %v3379_v25 = vpack.c.bf16 %v986_v61, %v958_v62 }
 0x1be   : > { %v1008_v58 = vpop.permute.xlu1 %1007  ;;  %v1006_v59 = vpop.permute.xlu0 %1005 }
 0x1bf   : > { %v1013_v60 = vsel %vm1011_vm13, %v1006_v59, %v1008_v58 }
 0x1c0   : > { %1183 = vmatprep.subr.mxu0 %v1013_v60 }
 0x1c2   : > { %v1010_v63 = vpop.permute.xlu1 %1009  ;;  %v1004_v0 = vpop.permute.xlu0 %1003  ;;  %v1116_v1 = vld [vmem:[#allocation3 + $0x2d8] sm:$0xff] }
 0x1c3   : > { %v1120_v2 = vld [vmem:[#allocation3 + $0x2f8] sm:$0xff]  ;;  %1022 = vst.msk [vmem:[#allocation3 + $0x318] sm:$0xff] %vm349_vm4, %v1010_v63  ;;  %v1012_v4 = vsel %vm1011_vm13, %v1004_v0, %v1006_v59  ;;  %v1014_v22 = vsel %vm1011_vm13, %v1008_v58, %v1010_v63 }
 0x1c4   : > { %v3377_v5 = vpack.c.bf16 %v1120_v2, %v1116_v1  ;;  %1184 = vmatpush1.msra.mxu0 %v1012_v4 }
 0x1c5   : > { %1200 = vmatmul.mubr.f32.vlgmr.msra.gmra.mrb[0].mxu0 %v1023_v3 }
 0x1c6   : > { %3378 = vmatprep.subr.bf16.mxu1 %v3377_v5 }
 0x1c7   : > { %3380 = vmatpush1.bf16.msra.mxu1 %v3379_v25 }
 0x1ca   : > { %v1124_v6 = vld [vmem:[#allocation3 + $0x318] sm:$0xff] }
 0x1cb   : > { %1254 = vmatprep.subr.mxu1 %v1124_v6 }
 0x1cc   : > { %1255 = vmatpush1.msra.mxu1 %v1014_v22 }
 0x1cd   : > { %1271 = vmatmul.mubr.f32.vlgmr.msra.gmra.mrb[0].mxu1 %v1023_v3 }
 0x1d3   : > { %v1129_v14 = vpop.permute.xlu0 %1128 }
 0x298   : > { %v1201_v16 = vpop.f32.mrb[0].mxu0 }
 0x299   : > { %v1202_v17 = vadd.f32 %v1201_v16, %v1129_v14  ;;  %v1203_v19 = vpop.f32.mrb[1].mxu0 }
 0x29a   : > { %v1204_v24 = vadd.f32 %v1203_v19, %v1129_v14 }
 0x29b   : > { %v1277_v30 = vmax.f32 %v1202_v17, 0.0 }
 0x29c   : > { %v1278_v41 = vmax.f32 %v1204_v24, 0.0  ;;  %v2087_v24 = vld [vmem:[%s5071_s4] sm:$0xff] }
 0x29d   : > { %v1302_v32 = vmul.f32 %v4067_v28, %v1277_v30  ;;  %v1986_v30 = vld [vmem:[%s5171_s3 + $0x8] sm:$0xff] }
 0x29e   : > { %v1303_v42 = vmul.f32 %v4076_v12, %v1278_v41  ;;  %3275 = vmatprep.mubr.msk.f32.mxu0 %vm1131_vm11, %v1986_v30  ;;  %3276 = vmatprep.mubr.msk.f32.mxu1 %vm1131_vm11, %v1986_v30 }
 0x29f   : > { %1310 = vrot.lane.b32.xlu1 %v1302_v32, %s5103_s11 }
 0x2a0   : > { %v1272_v34 = vpop.f32.mrb[0].mxu1 }
 0x2a1   : > { %v1273_v35 = vadd.f32 %v1272_v34, %v1129_v14  ;;  %v1274_v27 = vpop.f32.mrb[1].mxu1 }
 0x2a2   : > { %v1275_v37 = vadd.f32 %v1274_v27, %v1129_v14 }
 0x2a3   : > { %v1279_v18 = vmax.f32 %v1273_v35, 0.0 }
 0x2a4   : > { %v1280_v39 = vmax.f32 %v1275_v37, 0.0 }
 0x2a5   : > { %v1304_v40 = vmul.f32 %v4071_v21, %v1279_v18 }
 0x2a6   : > { %v1305_v13 = vmul.f32 %v4073_v38, %v1280_v39 }
 0x2a7   : > { %1314 = vrot.lane.b32.xlu0 %v1304_v40, %s5103_s11 }
 0x2a8   : > { %1316 = vrot.lane.b32.xlu1 %v1305_v13, %s5103_s11 }
 0x2ac   : > { %1312 = vrot.lane.b32.xlu1 %v1303_v42, %s5103_s11  ;;  %s5160_s11 = smov 67  }
 0x311   : > { %v1311_v43 = vpop.permute.xlu1 %1310 }
 0x312   : > { %1325 = vst.msk [vmem:[#allocation2] sm:$0xff] %vm336_vm1, %v1311_v43 }
 0x319   : > { %v1315_v44 = vpop.permute.xlu0 %1314  ;;  %v4084_v45 = vld [vmem:[#allocation2] sm:$0xff] }
 0x31a   : > { %v1317_v46 = vpop.permute.xlu1 %1316  ;;  %1399 = vrot.lane.b32.xlu1 %v4084_v45, %s5121_s12  ;;  %1345 = vrot.lane.b32.xlu0 %v4084_v45, %s5146_s13 }
 0x31b   : > { %v1320_v10 = vsel %vm328_vm3, %v1315_v44, %v1317_v46 }
 0x31c   : > { %1328 = vst.msk [vmem:[#allocation2 + $0x18] sm:$0xff] %vm340_vm2, %v1320_v10 }
 0x31e   : > { %1453 = vrot.lane.b32.xlu1 %v4084_v45, %s5113_s14  ;;  %1372 = vrot.lane.b32.xlu0 %v4084_v45, %s5142_s15  ;;  %v1313_v9 = vpop.permute.xlu1 %1312 }
 0x31f   : > { %v4185_v26 = vsel %vm328_vm3, %v1311_v43, %v1313_v9  ;;  %v4188_v47 = vsel %vm328_vm3, %v1313_v9, %v1315_v44 }
 0x322   : > { %1507 = vrot.lane.b32.xlu1 %v4084_v45, %s5115_s16  ;;  %1426 = vrot.lane.b32.xlu0 %v4084_v45, %s5144_s17 }
 0x323   : > { %v4100_v29 = vld [vmem:[#allocation2 + $0x18] sm:$0xff] }
 0x324   : > { %1336 = vst.msk [vmem:[#allocation3 + $0x18] sm:$0xff] %vm349_vm4, %v4100_v29 }
 0x326   : > { %1561 = vrot.lane.b32.xlu1 %v4084_v45, %s5117_s18  ;;  %1480 = vrot.lane.b32.xlu0 %v4084_v45, %s5123_s19 }
 0x32a   : > { %1615 = vrot.lane.b32.xlu1 %v4084_v45, %s5127_s20  ;;  %1534 = vrot.lane.b32.xlu0 %v4084_v45, %s5131_s21 }
 0x32b   : > { %v1990_v8 = vld [vmem:[#allocation3 + $0x18] sm:$0xff] }
 0x32e   : > { %1669 = vrot.lane.b32.xlu1 %v4084_v45, %s5107_s22  ;;  %1588 = vrot.lane.b32.xlu0 %v4084_v45, %s5129_s23  ;;  %s5162_s22 = smov 65  }
 0x332   : > { %1723 = vrot.lane.b32.xlu1 %v4084_v45, %s5109_s24  ;;  %1642 = vrot.lane.b32.xlu0 %v4084_v45, %s5125_s25  ;;  %s5163_s24 = smov 48  }
 0x336   : > { %1777 = vrot.lane.b32.xlu1 %v4084_v45, %s5111_s30  ;;  %1696 = vrot.lane.b32.xlu0 %v4084_v45, %s5158_s29  ;;  %s5164_s30 = smov 46  }
 0x33a   : > { %1831 = vrot.lane.b32.xlu1 %v4084_v45, %s5159_s10  ;;  %1750 = vrot.lane.b32.xlu0 %v4084_v45, %s5160_s11 }
 0x33e   : > { %1885 = vrot.lane.b32.xlu1 %v4084_v45, %s5161_s26  ;;  %1804 = vrot.lane.b32.xlu0 %v4084_v45, %s5162_s22 }
 0x342   : > { %1939 = vrot.lane.b32.xlu1 %v4084_v45, %s5119_s9  ;;  %1858 = vrot.lane.b32.xlu0 %v4084_v45, %s5163_s24 }
 0x346   : > { %1912 = vrot.lane.b32.xlu0 %v4084_v45, %s5164_s30  ;;  %1351 = vrot.lane.b32.xlu1 %v4100_v29, %s5146_s13 }
 0x34a   : > { %1378 = vrot.lane.b32.xlu0 %v4100_v29, %s5142_s15  ;;  %1405 = vrot.lane.b32.xlu1 %v4100_v29, %s5121_s12 }
 0x34e   : > { %1432 = vrot.lane.b32.xlu0 %v4100_v29, %s5144_s17  ;;  %1459 = vrot.lane.b32.xlu1 %v4100_v29, %s5113_s14  ;;  %s5165_s14 = smov 85  }
 0x352   : > { %1486 = vrot.lane.b32.xlu0 %v4100_v29, %s5123_s19  ;;  %1513 = vrot.lane.b32.xlu1 %v4100_v29, %s5115_s16  ;;  %s5166_s16 = smov 68  }
 0x356   : > { %1540 = vrot.lane.b32.xlu0 %v4100_v29, %s5131_s21  ;;  %1567 = vrot.lane.b32.xlu1 %v4100_v29, %s5117_s18  ;;  %s5167_s18 = smov 66  }
 0x35a   : > { %1594 = vrot.lane.b32.xlu0 %v4100_v29, %s5129_s23  ;;  %1621 = vrot.lane.b32.xlu1 %v4100_v29, %s5127_s20 }
 0x35e   : > { %1648 = vrot.lane.b32.xlu0 %v4100_v29, %s5125_s25  ;;  %1675 = vrot.lane.b32.xlu1 %v4100_v29, %s5165_s14 }
 0x362   : > { %1702 = vrot.lane.b32.xlu0 %v4100_v29, %s5158_s29  ;;  %1729 = vrot.lane.b32.xlu1 %v4100_v29, %s5166_s16 }
 0x366   : > { %1756 = vrot.lane.b32.xlu0 %v4100_v29, %s5160_s11  ;;  %1783 = vrot.lane.b32.xlu1 %v4100_v29, %s5167_s18 }
 0x36a   : > { %1810 = vrot.lane.b32.xlu0 %v4100_v29, %s5162_s22  ;;  %1837 = vrot.lane.b32.xlu1 %v4100_v29, %s5159_s10 }
 0x36e   : > { %1864 = vrot.lane.b32.xlu0 %v4100_v29, %s5163_s24  ;;  %1891 = vrot.lane.b32.xlu1 %v4100_v29, %s5161_s26 }
 0x372   : > { %1918 = vrot.lane.b32.xlu0 %v4100_v29, %s5164_s30  ;;  %1945 = vrot.lane.b32.xlu1 %v4100_v29, %s5119_s9  ;;  %s5168_s9 = smov 108  }
 0x376   : > { %1349 = vrot.lane.b32.xlu1 %v4188_v47, %s5146_s13  ;;  %1347 = vrot.lane.b32.xlu0 %v4185_v26, %s5146_s13 }
 0x37a   : > { %1376 = vrot.lane.b32.xlu1 %v4188_v47, %s5142_s15  ;;  %1374 = vrot.lane.b32.xlu0 %v4185_v26, %s5142_s15 }
 0x37e   : > { %1403 = vrot.lane.b32.xlu1 %v4188_v47, %s5121_s12  ;;  %1401 = vrot.lane.b32.xlu0 %v4185_v26, %s5121_s12  ;;  %s5169_s12 = smov 106  }
 0x382   : > { %1430 = vrot.lane.b32.xlu1 %v4188_v47, %s5144_s17  ;;  %1428 = vrot.lane.b32.xlu0 %v4185_v26, %s5144_s17 }
 0x386   : > { %1457 = vrot.lane.b32.xlu1 %v4188_v47, %s5168_s9  ;;  %1455 = vrot.lane.b32.xlu0 %v4185_v26, %s5168_s9 }
 0x38a   : > { %1484 = vrot.lane.b32.xlu1 %v4188_v47, %s5123_s19  ;;  %1482 = vrot.lane.b32.xlu0 %v4185_v26, %s5123_s19  ;;  %s5170_s19 = smov 104  }
 0x38c   : > { %v4214_v48 = vpop.permute.xlu0 %1345  ;;  %v4216_v49 = vpop.permute.xlu1 %1399 }
 0x38e   : > { %1511 = vrot.lane.b32.xlu1 %v4188_v47, %s5169_s12  ;;  %1509 = vrot.lane.b32.xlu0 %v4185_v26, %s5169_s12 }
 0x390   : > { %v4222_v50 = vpop.permute.xlu0 %1372  ;;  %v4224_v51 = vpop.permute.xlu1 %1453 }
 0x392   : > { %1538 = vrot.lane.b32.xlu1 %v4188_v47, %s5131_s21  ;;  %1536 = vrot.lane.b32.xlu0 %v4185_v26, %s5131_s21  ;;  %s5214_s21 = smov 42  }
 0x394   : > { %v4230_v52 = vpop.permute.xlu0 %1426  ;;  %v4232_v23 = vpop.permute.xlu1 %1507 }
 0x396   : > { %1565 = vrot.lane.b32.xlu1 %v4188_v47, %s5170_s19  ;;  %1563 = vrot.lane.b32.xlu0 %v4185_v26, %s5170_s19 }
 0x398   : > { %v4238_v53 = vpop.permute.xlu0 %1480  ;;  %v4240_v54 = vpop.permute.xlu1 %1561 }
 0x39a   : > { %1592 = vrot.lane.b32.xlu1 %v4188_v47, %s5129_s23  ;;  %1590 = vrot.lane.b32.xlu0 %v4185_v26, %s5129_s23  ;;  %s5172_s23 = smov 45  }
 0x39c   : > { %v4246_v20 = vpop.permute.xlu0 %1534  ;;  %v4248_v55 = vpop.permute.xlu1 %1615 }
 0x39e   : > { %1619 = vrot.lane.b32.xlu1 %v4188_v47, %s5127_s20  ;;  %1617 = vrot.lane.b32.xlu0 %v4185_v26, %s5127_s20  ;;  %s5173_s20 = smov 44  }
 0x3a0   : > { %v4254_v56 = vpop.permute.xlu0 %1588  ;;  %v4256_v57 = vpop.permute.xlu1 %1669 }
 0x3a2   : > { %1646 = vrot.lane.b32.xlu1 %v4188_v47, %s5125_s25  ;;  %1644 = vrot.lane.b32.xlu0 %v4185_v26, %s5125_s25  ;;  %s5217_s25 = smov 125  }
 0x3a4   : > { %v4262_v58 = vpop.permute.xlu0 %1642  ;;  %v4264_v59 = vpop.permute.xlu1 %1723 }
 0x3a6   : > { %1673 = vrot.lane.b32.xlu1 %v4188_v47, %s5165_s14  ;;  %1671 = vrot.lane.b32.xlu0 %v4185_v26, %s5165_s14 }
 0x3a8   : > { %v4270_v60 = vpop.permute.xlu0 %1696  ;;  %v4272_v61 = vpop.permute.xlu1 %1777 }
 0x3aa   : > { %1700 = vrot.lane.b32.xlu1 %v4188_v47, %s5158_s29  ;;  %1698 = vrot.lane.b32.xlu0 %v4185_v26, %s5158_s29 }
 0x3ac   : > { %v4278_v62 = vpop.permute.xlu0 %1750  ;;  %v4280_v63 = vpop.permute.xlu1 %1831 }
 0x3ae   : > { %1727 = vrot.lane.b32.xlu1 %v4188_v47, %s5166_s16  ;;  %1725 = vrot.lane.b32.xlu0 %v4185_v26, %s5166_s16 }
 0x3b0   : > { %v4286_v0 = vpop.permute.xlu0 %1804  ;;  %v4288_v1 = vpop.permute.xlu1 %1885 }
 0x3b2   : > { %1754 = vrot.lane.b32.xlu1 %v4188_v47, %s5160_s11  ;;  %1752 = vrot.lane.b32.xlu0 %v4185_v26, %s5160_s11 }
 0x3b4   : > { %v4294_v2 = vpop.permute.xlu0 %1858  ;;  %v4296_v3 = vpop.permute.xlu1 %1939 }
 0x3b6   : > { %1781 = vrot.lane.b32.xlu1 %v4188_v47, %s5167_s18  ;;  %1779 = vrot.lane.b32.xlu0 %v4185_v26, %s5167_s18 }
 0x3b8   : > { %v4302_v4 = vpop.permute.xlu0 %1912  ;;  %v4304_v5 = vpop.permute.xlu1 %1351 }
 0x3b9   : > { %1363 = vst.msk [vmem:[#allocation3 + $0x38] sm:$0xff] %vm349_vm4, %v4304_v5 }
 0x3ba   : > { %1808 = vrot.lane.b32.xlu1 %v4188_v47, %s5162_s22  ;;  %1806 = vrot.lane.b32.xlu0 %v4185_v26, %s5162_s22 }
 0x3bc   : > { %v4312_v25 = vpop.permute.xlu0 %1378  ;;  %v4314_v6 = vpop.permute.xlu1 %1405 }
 0x3bd   : > { %1390 = vst.msk [vmem:[#allocation3 + $0x58] sm:$0xff] %vm349_vm4, %v4312_v25  ;;  %1417 = vst.msk [vmem:[#allocation3 + $0x78] sm:$0xff] %vm349_vm4, %v4314_v6 }
 0x3be   : > { %1835 = vrot.lane.b32.xlu1 %v4188_v47, %s5159_s10  ;;  %1833 = vrot.lane.b32.xlu0 %v4185_v26, %s5159_s10 }
 0x3c0   : > { %v4324_v22 = vpop.permute.xlu0 %1432  ;;  %v4326_v7 = vpop.permute.xlu1 %1459  ;;  %v1994_v11 = vld [vmem:[#allocation3 + $0x38] sm:$0xff] }
 0x3c1   : > { %1444 = vst.msk [vmem:[#allocation3 + $0x98] sm:$0xff] %vm349_vm4, %v4324_v22  ;;  %1471 = vst.msk [vmem:[#allocation3 + $0xb8] sm:$0xff] %vm349_vm4, %v4326_v7  ;;  %v3429_v14 = vpack.c.bf16 %v1994_v11, %v1990_v8 }
 0x3c2   : > { %1862 = vrot.lane.b32.xlu1 %v4188_v47, %s5163_s24  ;;  %1860 = vrot.lane.b32.xlu0 %v4185_v26, %s5163_s24 }
 0x3c3   : > { %3430 = vmatprep.subr.bf16.mxu1 %v3429_v14 }
 0x3c4   : > { %v4336_v15 = vpop.permute.xlu0 %1486  ;;  %v4338_v16 = vpop.permute.xlu1 %1513  ;;  %v1998_v46 = vld [vmem:[#allocation3 + $0x58] sm:$0xff] }
 0x3c5   : > { %1498 = vst.msk [vmem:[#allocation3 + $0xd8] sm:$0xff] %vm349_vm4, %v4336_v15  ;;  %1525 = vst.msk [vmem:[#allocation3 + $0xf8] sm:$0xff] %vm349_vm4, %v4338_v16  ;;  %v2002_v10 = vld [vmem:[#allocation3 + $0x78] sm:$0xff] }
 0x3c6   : > { %1889 = vrot.lane.b32.xlu1 %v4188_v47, %s5161_s26  ;;  %1887 = vrot.lane.b32.xlu0 %v4185_v26, %s5161_s26 }
 0x3c8   : > { %v4348_v17 = vpop.permute.xlu0 %1540  ;;  %v4350_v19 = vpop.permute.xlu1 %1567 }
 0x3c9   : > { %1552 = vst.msk [vmem:[#allocation3 + $0x118] sm:$0xff] %vm349_vm4, %v4348_v17  ;;  %1579 = vst.msk [vmem:[#allocation3 + $0x138] sm:$0xff] %vm349_vm4, %v4350_v19 }
 0x3ca   : > { %1916 = vrot.lane.b32.xlu1 %v4188_v47, %s5164_s30  ;;  %1914 = vrot.lane.b32.xlu0 %v4185_v26, %s5164_s30 }
 0x3cc   : > { %v4365_v31 = vpop.permute.xlu0 %1594  ;;  %v4367_v32 = vpop.permute.xlu1 %1621 }
 0x3cd   : > { %1606 = vst.msk [vmem:[#allocation3 + $0x158] sm:$0xff] %vm349_vm4, %v4365_v31  ;;  %1633 = vst.msk [vmem:[#allocation3 + $0x178] sm:$0xff] %vm349_vm4, %v4367_v32 }
 0x3ce   : > { %1943 = vrot.lane.b32.xlu1 %v4188_v47, %s5172_s23  ;;  %1941 = vrot.lane.b32.xlu0 %v4185_v26, %s5172_s23 }
 0x3d0   : > { %v4377_v33 = vpop.permute.xlu0 %1648  ;;  %v4379_v34 = vpop.permute.xlu1 %1675 }
 0x3d1   : > { %1660 = vst.msk [vmem:[#allocation3 + $0x198] sm:$0xff] %vm349_vm4, %v4377_v33  ;;  %1687 = vst.msk [vmem:[#allocation3 + $0x1b8] sm:$0xff] %vm349_vm4, %v4379_v34 }
 0x3d2   : > { %1970 = vrot.lane.b32.xlu1 %v4188_v47, %s5173_s20  ;;  %1968 = vrot.lane.b32.xlu0 %v4185_v26, %s5173_s20 }
 0x3d4   : > { %v4389_v35 = vpop.permute.xlu0 %1702  ;;  %v4391_v27 = vpop.permute.xlu1 %1729 }
 0x3d5   : > { %1714 = vst.msk [vmem:[#allocation3 + $0x1d8] sm:$0xff] %vm349_vm4, %v4389_v35  ;;  %1741 = vst.msk [vmem:[#allocation3 + $0x1f8] sm:$0xff] %vm349_vm4, %v4391_v27 }
 0x3d6   : > { %1972 = vrot.lane.b32.xlu1 %v4100_v29, %s5173_s20  ;;  %1966 = vrot.lane.b32.xlu0 %v4084_v45, %s5173_s20 }
 0x3d8   : > { %v4404_v36 = vpop.permute.xlu0 %1756  ;;  %v4406_v37 = vpop.permute.xlu1 %1783 }
 0x3d9   : > { %1768 = vst.msk [vmem:[#allocation3 + $0x218] sm:$0xff] %vm349_vm4, %v4404_v36  ;;  %1795 = vst.msk [vmem:[#allocation3 + $0x238] sm:$0xff] %vm349_vm4, %v4406_v37 }
 0x3da   : > { %2090 = vperm.xlu0 %3608, %v2087_v24   ;;  %v3433_v24 = vpack.c.bf16 %v2002_v10, %v1998_v46 }
 0x3dc   : > { %v4412_v18 = vpop.permute.xlu0 %1810  ;;  %v4414_v39 = vpop.permute.xlu1 %1837 }
 0x3dd   : > { %1822 = vst.msk [vmem:[#allocation3 + $0x258] sm:$0xff] %vm349_vm4, %v4412_v18  ;;  %1849 = vst.msk [vmem:[#allocation3 + $0x278] sm:$0xff] %vm349_vm4, %v4414_v39 }
 0x3e0   : > { %v4420_v40 = vpop.permute.xlu0 %1864  ;;  %v4422_v41 = vpop.permute.xlu1 %1891 }
 0x3e1   : > { %1876 = vst.msk [vmem:[#allocation3 + $0x298] sm:$0xff] %vm349_vm4, %v4420_v40  ;;  %1903 = vst.msk [vmem:[#allocation3 + $0x2b8] sm:$0xff] %vm349_vm4, %v4422_v41 }
 0x3e4   : > { %v4428_v13 = vpop.permute.xlu0 %1918  ;;  %v4430_v42 = vpop.permute.xlu1 %1945 }
 0x3e5   : > { %1930 = vst.msk [vmem:[#allocation3 + $0x2d8] sm:$0xff] %vm349_vm4, %v4428_v13  ;;  %1957 = vst.msk [vmem:[#allocation3 + $0x2f8] sm:$0xff] %vm349_vm4, %v4430_v42 }
 0x3e8   : > { %v1348_v43 = vpop.permute.xlu0 %1347  ;;  %v1350_v44 = vpop.permute.xlu1 %1349 }
 0x3e9   : > { %v1353_v29 = vsel %vm367_vm5, %v4214_v48, %v1348_v43  ;;  %v1354_v9 = vsel %vm367_vm5, %v1348_v43, %v1350_v44  ;;  %v1355_v8 = vsel %vm367_vm5, %v1350_v44, %v4304_v5  ;;  %v2006_v44 = vld [vmem:[#allocation3 + $0x98] sm:$0xff] }
 0x3ea   : > { %v3381_v11 = vpack.c.bf16 %v1354_v9, %v4185_v26  ;;  %v3431_v14 = vpack.c.bf16 %v1355_v8, %v4188_v47  ;;  %v3383_v30 = vpack.c.bf16 %v1353_v29, %v4084_v45  ;;  %v2010_v26 = vld [vmem:[#allocation3 + $0xb8] sm:$0xff] }
 0x3eb   : > { %v3437_v8 = vpack.c.bf16 %v2010_v26, %v2006_v44 }
 0x3ec   : > { %v1375_v12 = vpop.permute.xlu0 %1374  ;;  %v1377_v28 = vpop.permute.xlu1 %1376  ;;  %3382 = vmatprep.subr.bf16.mxu0 %v3381_v11  ;;  %3432 = vmatpush1.bf16.msra.mxu1 %v3431_v14  ;;  %v2014_v14 = vld [vmem:[#allocation3 + $0xd8] sm:$0xff] }
 0x3ed   : > { %3384 = vmatpush1.bf16.msra.mxu0 %v3383_v30  ;;  %3434 = vmatprep.subr.bf16.mxu1 %v3433_v24  ;;  %v1380_v48 = vsel %vm5141_vm6, %v4222_v50, %v1375_v12  ;;  %v1381_v43 = vsel %vm5141_vm6, %v1375_v12, %v1377_v28  ;;  %v1382_v47 = vsel %vm5141_vm6, %v1377_v28, %v4312_v25  ;;  %v2018_v30 = vld [vmem:[#allocation3 + $0xf8] sm:$0xff] }
 0x3ee   : > { %v3441_v26 = vpack.c.bf16 %v2018_v30, %v2014_v14 }
 0x3f0   : > { %v1402_v38 = vpop.permute.xlu0 %1401  ;;  %v1404_v5 = vpop.permute.xlu1 %1403 }
 0x3f1   : > { %v1407_v45 = vsel %vm5140_vm7, %v4216_v49, %v1402_v38  ;;  %v1408_v46 = vsel %vm5140_vm7, %v1402_v38, %v1404_v5  ;;  %v1409_v10 = vsel %vm5140_vm7, %v1404_v5, %v4314_v6 }
 0x3f2   : > { %v3385_v29 = vpack.c.bf16 %v1408_v46, %v1381_v43  ;;  %v3435_v9 = vpack.c.bf16 %v1409_v10, %v1382_v47  ;;  %v3387_v50 = vpack.c.bf16 %v1407_v45, %v1380_v48 }
 0x3f4   : > { %v1429_v12 = vpop.permute.xlu0 %1428  ;;  %v1431_v11 = vpop.permute.xlu1 %1430  ;;  %3386 = vmatprep.subr.bf16.mxu0 %v3385_v29  ;;  %3436 = vmatpush1.bf16.msra.mxu1 %v3435_v9  ;;  %v2022_v29 = vld [vmem:[#allocation3 + $0x118] sm:$0xff] }
 0x3f5   : > { %3388 = vmatpush1.bf16.msra.mxu0 %v3387_v50  ;;  %3438 = vmatprep.subr.bf16.mxu1 %v3437_v8  ;;  %v1434_v28 = vsel %vm5139_vm8, %v4230_v52, %v1429_v12  ;;  %v1435_v49 = vsel %vm5139_vm8, %v1429_v12, %v1431_v11  ;;  %v1436_v6 = vsel %vm5139_vm8, %v1431_v11, %v4324_v22  ;;  %v2026_v9 = vld [vmem:[#allocation3 + $0x138] sm:$0xff]  ;;  %vm5177_vm8 = vcmask 850944  }
 0x3f6   : > { %vm5178_vm7 = vmmov %vm5177_vm8 }
 0x3f7   : > { %vm5179_vm6 = vmmov %vm5178_vm7 }
 0x3f8   : > { %v1456_v25 = vpop.permute.xlu0 %1455  ;;  %v1458_v38 = vpop.permute.xlu1 %1457 }
 0x3f9   : > { %v1461_v24 = vsel %vm5137_vm9, %v4224_v51, %v1456_v25  ;;  %v1462_v48 = vsel %vm5137_vm9, %v1456_v25, %v1458_v38  ;;  %v1463_v43 = vsel %vm5137_vm9, %v1458_v38, %v4326_v7 }
 0x3fa   : > { %v3389_v5 = vpack.c.bf16 %v1462_v48, %v1435_v49  ;;  %v3439_v44 = vpack.c.bf16 %v1463_v43, %v1436_v6  ;;  %v3391_v52 = vpack.c.bf16 %v1461_v24, %v1434_v28  ;;  %v3445_v49 = vpack.c.bf16 %v2026_v9, %v2022_v29  ;;  %v2030_v6 = vld [vmem:[#allocation3 + $0x158] sm:$0xff] }
 0x3fb   : > { %v2034_v24 = vld [vmem:[#allocation3 + $0x178] sm:$0xff] }
 0x3fc   : > { %v1483_v47 = vpop.permute.xlu0 %1482  ;;  %v1485_v45 = vpop.permute.xlu1 %1484  ;;  %3390 = vmatprep.subr.bf16.mxu0 %v3389_v5  ;;  %3440 = vmatpush1.bf16.msra.mxu1 %v3439_v44 }
 0x3fd   : > { %3392 = vmatpush1.bf16.msra.mxu0 %v3391_v52  ;;  %3442 = vmatprep.subr.bf16.mxu1 %v3441_v26  ;;  %v1488_v22 = vsel %vm5136_vm10, %v4238_v53, %v1483_v47  ;;  %v1489_v51 = vsel %vm5136_vm10, %v1483_v47, %v1485_v45  ;;  %v1490_v7 = vsel %vm5136_vm10, %v1485_v45, %v4336_v15  ;;  %vm5174_vm10 = vcmask 859136  }
 0x3fe   : > { %vm5175_vm9 = vmmov %vm5174_vm10  ;;  %v3449_v26 = vpack.c.bf16 %v2034_v24, %v2030_v6 }
 0x400   : > { %v1510_v46 = vpop.permute.xlu0 %1509  ;;  %v1512_v10 = vpop.permute.xlu1 %1511 }
 0x401   : > { %v1515_v50 = vsel %vm5138_vm12, %v4232_v23, %v1510_v46  ;;  %v1516_v8 = vsel %vm5138_vm12, %v1510_v46, %v1512_v10  ;;  %v1517_v12 = vsel %vm5138_vm12, %v1512_v10, %v4338_v16  ;;  %vm5176_vm12 = vmmov %vm5175_vm9  ;;  %v2038_v46 = vld [vmem:[#allocation3 + $0x198] sm:$0xff] }
 0x402   : > { %v3393_v11 = vpack.c.bf16 %v1516_v8, %v1489_v51  ;;  %v3443_v28 = vpack.c.bf16 %v1517_v12, %v1490_v7  ;;  %v3395_v53 = vpack.c.bf16 %v1515_v50, %v1488_v22  ;;  %v2042_v10 = vld [vmem:[#allocation3 + $0x1b8] sm:$0xff] }
 0x403   : > { %v3453_v12 = vpack.c.bf16 %v2042_v10, %v2038_v46 }
 0x404   : > { %v1537_v25 = vpop.permute.xlu0 %1536  ;;  %v1539_v38 = vpop.permute.xlu1 %1538  ;;  %3394 = vmatprep.subr.bf16.mxu0 %v3393_v11  ;;  %3444 = vmatpush1.bf16.msra.mxu1 %v3443_v28 }
 0x405   : > { %3396 = vmatpush1.bf16.msra.mxu0 %v3395_v53  ;;  %3446 = vmatprep.subr.bf16.mxu1 %v3445_v49  ;;  %v1542_v15 = vsel %vm5174_vm10, %v4246_v20, %v1537_v25  ;;  %v1543_v23 = vsel %vm5175_vm9, %v1537_v25, %v1539_v38  ;;  %v1544_v16 = vsel %vm5176_vm12, %v1539_v38, %v4348_v17  ;;  %vm5180_vm9 = vcmask 719872   ;;  %v2046_v25 = vld [vmem:[#allocation3 + $0x1d8] sm:$0xff] }
 0x406   : > { %vm5181_vm10 = vmmov %vm5180_vm9  ;;  %v2050_v38 = vld [vmem:[#allocation3 + $0x1f8] sm:$0xff] }
 0x407   : > { %v3457_v24 = vpack.c.bf16 %v2050_v38, %v2046_v25 }
 0x408   : > { %v1564_v14 = vpop.permute.xlu0 %1563  ;;  %v1566_v30 = vpop.permute.xlu1 %1565 }
 0x409   : > { %v1569_v48 = vsel %vm5177_vm8, %v4240_v54, %v1564_v14  ;;  %v1570_v43 = vsel %vm5178_vm7, %v1564_v14, %v1566_v30  ;;  %v1571_v5 = vsel %vm5179_vm6, %v1566_v30, %v4350_v19  ;;  %vm5182_vm6 = vmmov %vm5180_vm9  ;;  %vm5183_vm7 = vcmask 711680  }
 0x40a   : > { %v3397_v44 = vpack.c.bf16 %v1570_v43, %v1543_v23  ;;  %v3447_v52 = vpack.c.bf16 %v1571_v5, %v1544_v16  ;;  %v3399_v20 = vpack.c.bf16 %v1569_v48, %v1542_v15  ;;  %vm5184_vm8 = vmmov %vm5183_vm7 }
 0x40b   : > { %vm5185_vm12 = vmmov %vm5183_vm7 }
 0x40c   : > { %v1591_v47 = vpop.permute.xlu0 %1590  ;;  %v1593_v45 = vpop.permute.xlu1 %1592  ;;  %3398 = vmatprep.subr.bf16.mxu0 %v3397_v44  ;;  %3448 = vmatpush1.bf16.msra.mxu1 %v3447_v52  ;;  %v2054_v44 = vld [vmem:[#allocation3 + $0x218] sm:$0xff] }
 0x40d   : > { %3400 = vmatpush1.bf16.msra.mxu0 %v3399_v20  ;;  %3450 = vmatprep.subr.bf16.mxu1 %v3449_v26  ;;  %v1596_v17 = vsel %vm5180_vm9, %v4254_v56, %v1591_v47  ;;  %v1597_v54 = vsel %vm5181_vm10, %v1591_v47, %v1593_v45  ;;  %v1598_v19 = vsel %vm5182_vm6, %v1593_v45, %v4365_v31  ;;  %vm5186_vm9 = vcmask 703488   ;;  %v2058_v52 = vld [vmem:[#allocation3 + $0x238] sm:$0xff] }
 0x40e   : > { %vm5187_vm10 = vmmov %vm5186_vm9 }
 0x40f   : > { %vm5188_vm6 = vmmov %vm5186_vm9 }
 0x410   : > { %v1618_v22 = vpop.permute.xlu0 %1617  ;;  %v1620_v51 = vpop.permute.xlu1 %1619 }
 0x411   : > { %v1623_v29 = vsel %vm5183_vm7, %v4248_v55, %v1618_v22  ;;  %v1624_v9 = vsel %vm5184_vm8, %v1618_v22, %v1620_v51  ;;  %v1625_v7 = vsel %vm5185_vm12, %v1620_v51, %v4367_v32  ;;  %vm5189_vm7 = vcmask 695296  }
 0x412   : > { %v3401_v50 = vpack.c.bf16 %v1624_v9, %v1597_v54  ;;  %v3451_v8 = vpack.c.bf16 %v1625_v7, %v1598_v19  ;;  %v3403_v56 = vpack.c.bf16 %v1623_v29, %v1596_v17  ;;  %vm5190_vm8 = vmmov %vm5189_vm7  ;;  %v3461_v54 = vpack.c.bf16 %v2058_v52, %v2054_v44  ;;  %v2062_v19 = vld [vmem:[#allocation3 + $0x258] sm:$0xff] }
 0x413   : > { %vm5191_vm12 = vmmov %vm5189_vm7  ;;  %v2066_v29 = vld [vmem:[#allocation3 + $0x278] sm:$0xff] }
 0x414   : > { %v1645_v11 = vpop.permute.xlu0 %1644  ;;  %v1647_v28 = vpop.permute.xlu1 %1646  ;;  %3402 = vmatprep.subr.bf16.mxu0 %v3401_v50  ;;  %3452 = vmatpush1.bf16.msra.mxu1 %v3451_v8 }
 0x415   : > { %3404 = vmatpush1.bf16.msra.mxu0 %v3403_v56  ;;  %3454 = vmatprep.subr.bf16.mxu1 %v3453_v12  ;;  %v1650_v31 = vsel %vm5186_vm9, %v4262_v58, %v1645_v11  ;;  %v1651_v55 = vsel %vm5187_vm10, %v1645_v11, %v1647_v28  ;;  %v1652_v32 = vsel %vm5188_vm6, %v1647_v28, %v4377_v33  ;;  %vm5192_vm9 = vcmask 687104  }
 0x416   : > { %vm5193_vm10 = vmmov %vm5192_vm9  ;;  %v3465_v12 = vpack.c.bf16 %v2066_v29, %v2062_v19 }
 0x417   : > { %vm5194_vm6 = vmmov %vm5192_vm9 }
 0x418   : > { %v1672_v53 = vpop.permute.xlu0 %1671  ;;  %v1674_v49 = vpop.permute.xlu1 %1673 }
 0x419   : > { %v1677_v15 = vsel %vm5189_vm7, %v4256_v57, %v1672_v53  ;;  %v1678_v23 = vsel %vm5190_vm8, %v1672_v53, %v1674_v49  ;;  %v1679_v14 = vsel %vm5191_vm12, %v1674_v49, %v4379_v34  ;;  %vm5195_vm7 = vcmask 556032   ;;  %v2070_v53 = vld [vmem:[#allocation3 + $0x298] sm:$0xff] }
 0x41a   : > { %v3405_v30 = vpack.c.bf16 %v1678_v23, %v1651_v55  ;;  %v3455_v6 = vpack.c.bf16 %v1679_v14, %v1652_v32  ;;  %v3407_v58 = vpack.c.bf16 %v1677_v15, %v1650_v31  ;;  %vm5196_vm8 = vmmov %vm5195_vm7  ;;  %v2074_v49 = vld [vmem:[#allocation3 + $0x2b8] sm:$0xff] }
 0x41b   : > { %vm5197_vm12 = vmmov %vm5195_vm7  ;;  %v3469_v14 = vpack.c.bf16 %v2074_v49, %v2070_v53  ;;  %v5215_v49 = vld [vmem:[#allocation4_spill] sm:$0xff] }
 0x41c   : > { %v1699_v16 = vpop.permute.xlu0 %1698  ;;  %v1701_v48 = vpop.permute.xlu1 %1700  ;;  %3406 = vmatprep.subr.bf16.mxu0 %v3405_v30  ;;  %3456 = vmatpush1.bf16.msra.mxu1 %v3455_v6 }
 0x41d   : > { %3408 = vmatpush1.bf16.msra.mxu0 %v3407_v58  ;;  %3458 = vmatprep.subr.bf16.mxu1 %v3457_v24  ;;  %v1704_v33 = vsel %vm5192_vm9, %v4270_v60, %v1699_v16  ;;  %v1705_v57 = vsel %vm5193_vm10, %v1699_v16, %v1701_v48  ;;  %v1706_v34 = vsel %vm5194_vm6, %v1701_v48, %v4389_v35  ;;  %vm5198_vm9 = vcmask 547840   ;;  %v2078_v16 = vld [vmem:[#allocation3 + $0x2d8] sm:$0xff] }
 0x41e   : > { %vm5199_vm10 = vmmov %vm5198_vm9  ;;  %v2082_v48 = vld [vmem:[#allocation3 + $0x2f8] sm:$0xff] }
 0x41f   : > { %vm5200_vm6 = vmmov %vm5198_vm9  ;;  %v3473_v52 = vpack.c.bf16 %v2082_v48, %v2078_v16 }
 0x420   : > { %v1726_v43 = vpop.permute.xlu0 %1725  ;;  %v1728_v5 = vpop.permute.xlu1 %1727 }
 0x421   : > { %v1731_v20 = vsel %vm5195_vm7, %v4264_v59, %v1726_v43  ;;  %v1732_v26 = vsel %vm5196_vm8, %v1726_v43, %v1728_v5  ;;  %v1733_v47 = vsel %vm5197_vm12, %v1728_v5, %v4391_v27  ;;  %vm5201_vm7 = vcmask 539648  }
 0x422   : > { %v3409_v45 = vpack.c.bf16 %v1732_v26, %v1705_v57  ;;  %v3459_v17 = vpack.c.bf16 %v1733_v47, %v1706_v34  ;;  %v3411_v60 = vpack.c.bf16 %v1731_v20, %v1704_v33  ;;  %vm5202_vm8 = vmmov %vm5201_vm7 }
 0x423   : > { %vm5203_vm12 = vmmov %vm5201_vm7 }
 0x424   : > { %v1753_v22 = vpop.permute.xlu0 %1752  ;;  %v1755_v51 = vpop.permute.xlu1 %1754  ;;  %3410 = vmatprep.subr.bf16.mxu0 %v3409_v45  ;;  %3460 = vmatpush1.bf16.msra.mxu1 %v3459_v17 }
 0x425   : > { %3412 = vmatpush1.bf16.msra.mxu0 %v3411_v60  ;;  %3462 = vmatprep.subr.bf16.mxu1 %v3461_v54  ;;  %v1758_v35 = vsel %vm5198_vm9, %v4278_v62, %v1753_v22  ;;  %v1759_v59 = vsel %vm5199_vm10, %v1753_v22, %v1755_v51  ;;  %v1760_v27 = vsel %vm5200_vm6, %v1755_v51, %v4404_v36  ;;  %vm5204_vm9 = vcmask 531456  }
 0x426   : > { %vm5205_vm10 = vmmov %vm5204_vm9 }
 0x427   : > { %vm5206_vm6 = vmmov %vm5204_vm9 }
 0x428   : > { %v1780_v46 = vpop.permute.xlu0 %1779  ;;  %v1782_v10 = vpop.permute.xlu1 %1781 }
 0x429   : > { %v1785_v9 = vsel %vm5201_vm7, %v4272_v61, %v1780_v46  ;;  %v1786_v7 = vsel %vm5202_vm8, %v1780_v46, %v1782_v10  ;;  %v1787_v50 = vsel %vm5203_vm12, %v1782_v10, %v4406_v37  ;;  %vm5207_vm7 = vcmask 523264  }
 0x42a   : > { %v3413_v8 = vpack.c.bf16 %v1786_v7, %v1759_v59  ;;  %v3463_v56 = vpack.c.bf16 %v1787_v50, %v1760_v27  ;;  %v3415_v62 = vpack.c.bf16 %v1785_v9, %v1758_v35  ;;  %vm5208_vm8 = vmmov %vm5207_vm7 }
 0x42b   : > { %vm5209_vm12 = vmmov %vm5207_vm7 }
 0x42c   : > { %v1807_v11 = vpop.permute.xlu0 %1806  ;;  %v1809_v28 = vpop.permute.xlu1 %1808  ;;  %3414 = vmatprep.subr.bf16.mxu0 %v3413_v8  ;;  %3464 = vmatpush1.bf16.msra.mxu1 %v3463_v56 }
 0x42d   : > { %3416 = vmatpush1.bf16.msra.mxu0 %v3415_v62  ;;  %3466 = vmatprep.subr.bf16.mxu1 %v3465_v12  ;;  %v1812_v36 = vsel %vm5204_vm9, %v4286_v0, %v1807_v11  ;;  %v1813_v61 = vsel %vm5205_vm10, %v1807_v11, %v1809_v28  ;;  %v1814_v37 = vsel %vm5206_vm6, %v1809_v28, %v4412_v18  ;;  %vm5210_vm9 = vcmask 384000  }
 0x42e   : > { %vm5211_vm10 = vmmov %vm5210_vm9 }
 0x42f   : > { %vm5212_vm6 = vmmov %vm5210_vm9 }
 0x430   : > { %v1834_v31 = vpop.permute.xlu0 %1833  ;;  %v1836_v55 = vpop.permute.xlu1 %1835 }
 0x431   : > { %v1839_v25 = vsel %vm5207_vm7, %v4280_v63, %v1834_v31  ;;  %v1840_v38 = vsel %vm5208_vm8, %v1834_v31, %v1836_v55  ;;  %v1841_v32 = vsel %vm5209_vm12, %v1836_v55, %v4414_v39  ;;  %v5213_v55 = vld [vmem:[#allocation5_spill] sm:$0xff]  ;;  %vm5232_vm12 = vcmask 1014784  }
 0x432   : > { %v3417_v15 = vpack.c.bf16 %v1840_v38, %v1813_v61  ;;  %v3467_v23 = vpack.c.bf16 %v1841_v32, %v1814_v37  ;;  %v3419_v0 = vpack.c.bf16 %v1839_v25, %v1812_v36  ;;  %v5216_v25 = vld [vmem:[#allocation6_spill] sm:$0xff] }
 0x434   : > { %v1861_v30 = vpop.permute.xlu0 %1860  ;;  %v1863_v6 = vpop.permute.xlu1 %1862  ;;  %3418 = vmatprep.subr.bf16.mxu0 %v3417_v15  ;;  %3468 = vmatpush1.bf16.msra.mxu1 %v3467_v23 }
 0x435   : > { %3420 = vmatpush1.bf16.msra.mxu0 %v3419_v0  ;;  %3470 = vmatprep.subr.bf16.mxu1 %v3469_v14  ;;  %v1866_v18 = vsel %vm899_vm14, %v4294_v2, %v1861_v30  ;;  %v1867_v63 = vsel %vm899_vm14, %v1861_v30, %v1863_v6  ;;  %v1868_v39 = vsel %vm899_vm14, %v1863_v6, %v4420_v40 }
 0x438   : > { %v1888_v58 = vpop.permute.xlu0 %1887  ;;  %v1890_v24 = vpop.permute.xlu1 %1889 }
 0x439   : > { %v1893_v33 = vsel %vm5210_vm9, %v4288_v1, %v1888_v58  ;;  %v1894_v57 = vsel %vm5211_vm10, %v1888_v58, %v1890_v24  ;;  %v1895_v43 = vsel %vm5212_vm6, %v1890_v24, %v4422_v41  ;;  %vm5233_vm9 = vmmov %vm5232_vm12  ;;  %vm5235_vm6 = vcmask 883712  }
 0x43a   : > { %v3421_v5 = vpack.c.bf16 %v1894_v57, %v1867_v63  ;;  %v3471_v44 = vpack.c.bf16 %v1895_v43, %v1868_v39  ;;  %v3423_v2 = vpack.c.bf16 %v1893_v33, %v1866_v18  ;;  %vm5234_vm10 = vmmov %vm5233_vm9 }
 0x43c   : > { %v1915_v34 = vpop.permute.xlu0 %1914  ;;  %v1917_v20 = vpop.permute.xlu1 %1916  ;;  %3422 = vmatprep.subr.bf16.mxu0 %v3421_v5  ;;  %3472 = vmatpush1.bf16.msra.mxu1 %v3471_v44 }
 0x43d   : > { %3424 = vmatpush1.bf16.msra.mxu0 %v3423_v2  ;;  %3474 = vmatprep.subr.bf16.mxu1 %v3473_v52  ;;  %v1920_v40 = vsel %vm955_vm0, %v4302_v4, %v1915_v34  ;;  %v1921_v1 = vsel %vm955_vm0, %v1915_v34, %v1917_v20  ;;  %v1922_v41 = vsel %vm955_vm0, %v1917_v20, %v4428_v13 }
 0x440   : > { %v1942_v26 = vpop.permute.xlu0 %1941  ;;  %v1944_v47 = vpop.permute.xlu1 %1943 }
 0x441   : > { %v1947_v45 = vsel %vm983_vm15, %v4296_v3, %v1942_v26  ;;  %v1948_v17 = vsel %vm983_vm15, %v1942_v26, %v1944_v47  ;;  %v1949_v60 = vsel %vm983_vm15, %v1944_v47, %v4430_v42  ;;  %v1985_v3 = vld [vmem:[%s5171_s3] sm:$0xff]  ;;  %s5225_s3 = smov 124  }
 0x442   : > { %v3425_v54 = vpack.c.bf16 %v1948_v17, %v1921_v1  ;;  %v3475_v22 = vpack.c.bf16 %v1949_v60, %v1922_v41  ;;  %v3427_v51 = vpack.c.bf16 %v1947_v45, %v1920_v40 }
 0x444   : > { %v1969_v35 = vpop.permute.xlu0 %1968  ;;  %v1971_v4 = vpop.permute.xlu1 %1970  ;;  %3426 = vmatprep.subr.bf16.mxu0 %v3425_v54  ;;  %3476 = vmatpush1.bf16.msra.mxu1 %v3475_v22 }
 0x445   : > { %v1975_v59 = vsel %vm1011_vm13, %v1969_v35, %v1971_v4  ;;  %3428 = vmatpush1.bf16.msra.mxu0 %v3427_v51 }
 0x446   : > { %2144 = vmatprep.subr.mxu0 %v1975_v59 }
 0x448   : > { %v1967_v13 = vpop.permute.xlu0 %1966  ;;  %v1973_v46 = vpop.permute.xlu1 %1972 }
 0x449   : > { %v1974_v10 = vsel %vm1011_vm13, %v1967_v13, %v1969_v35  ;;  %1984 = vst.msk [vmem:[#allocation3 + $0x318] sm:$0xff] %vm349_vm4, %v1973_v46  ;;  %v1976_v19 = vsel %vm1011_vm13, %v1971_v4, %v1973_v46 }
 0x44a   : > { %2145 = vmatpush1.msra.mxu0 %v1974_v10 }
 0x44b   : > { %2161 = vmatmul.mubr.f32.vlgmr.msra.gmra.mrb[2].mxu0 %v1985_v3 }
 0x450   : > { %v2086_v42 = vld [vmem:[#allocation3 + $0x318] sm:$0xff] }
 0x451   : > { %2215 = vmatprep.subr.mxu1 %v2086_v42 }
 0x452   : > { %2216 = vmatpush1.msra.mxu1 %v1976_v19 }
 0x453   : > { %2232 = vmatmul.mubr.f32.vlgmr.msra.gmra.mrb[2].mxu1 %v1985_v3 }
 0x459   : > { %v2091_v9 = vpop.permute.xlu0 %2090 }
 0x51e   : > { %v2162_v29 = vpop.f32.mrb[2].mxu0 }
 0x51f   : > { %v2164_v27 = vpop.f32.mrb[3].mxu0  ;;  %v2163_v50 = vadd.f32 %v2162_v29, %v2091_v9 }
 0x520   : > { %v2165_v62 = vadd.f32 %v2164_v27, %v2091_v9  ;;  %v2926_v27 = vld [vmem:[%s5072_s5 + $0x8] sm:$0xff] }
 0x521   : > { %v2238_v36 = vmax.f32 %v2163_v50, 0.0  ;;  %3279 = vmatprep.mubr.msk.f32.mxu1 %vm1131_vm11, %v2926_v27  ;;  %3277 = vmatprep.mubr.msk.f32.mxu0 %vm1131_vm11, %v2926_v27 }
 0x522   : > { %v2239_v31 = vmax.f32 %v2165_v62, 0.0  ;;  %v3030_v62 = vld [vmem:[%s5073_s6 + $0x8] sm:$0xff] }
 0x523   : > { %v2242_v37 = vmul.f32 %v2238_v36, %v5215_v49 }
 0x524   : > { %v2243_v38 = vmul.f32 %v2239_v31, %v5216_v25 }
 0x526   : > { %v2233_v7 = vpop.f32.mrb[2].mxu1 }
 0x527   : > { %v2234_v8 = vadd.f32 %v2233_v7, %v2091_v9  ;;  %v2235_v56 = vpop.f32.mrb[3].mxu1 }
 0x528   : > { %v2236_v12 = vadd.f32 %v2235_v56, %v2091_v9 }
 0x529   : > { %v2240_v11 = vmax.f32 %v2234_v8, 0.0 }
 0x52a   : > { %v2241_v28 = vmax.f32 %v2236_v12, 0.0 }
 0x52b   : > { %v2244_v61 = vmul.f32 %v2240_v11, %v4071_v21  ;;  %v3029_v11 = vld [vmem:[%s5073_s6] sm:$0xff] }
 0x52c   : > { %v2245_v53 = vmul.f32 %v2241_v28, %v5213_v55 }
 0x52d   : > { %2254 = vrot.lane.b32.xlu1 %v2244_v61, %s5214_s21 }
 0x52e   : > { %2256 = vrot.lane.b32.xlu0 %v2245_v53, %s5214_s21 }
 0x531   : > { %2250 = vrot.lane.b32.xlu1 %v2242_v37, %s5214_s21 }
 0x532   : > { %2252 = vrot.lane.b32.xlu0 %v2243_v38, %s5214_s21  ;;  %s5218_s21 = smov 107  }
 0x59f   : > { %v2255_v32 = vpop.permute.xlu1 %2254 }
 0x5a0   : > { %v2257_v15 = vpop.permute.xlu0 %2256 }
 0x5a1   : > { %v2260_v23 = vsel %vm328_vm3, %v2255_v32, %v2257_v15 }
 0x5a2   : > { %2268 = vst.msk [vmem:[#allocation2 + $0x18] sm:$0xff] %vm340_vm2, %v2260_v23 }
 0x5a3   : > { %v2251_v21 = vpop.permute.xlu1 %2250 }
 0x5a4   : > { %2265 = vst.msk [vmem:[#allocation2] sm:$0xff] %vm336_vm1, %v2251_v21  ;;  %v2253_v0 = vpop.permute.xlu0 %2252  ;;  %vm5226_vm1 = vcmask 1031168  }
 0x5a5   : > { %v4573_v14 = vsel %vm328_vm3, %v2251_v21, %v2253_v0  ;;  %v4576_v30 = vsel %vm328_vm3, %v2253_v0, %v2255_v32  ;;  %vm5227_vm2 = vmmov %vm5226_vm1 }
 0x5a6   : > { %vm5228_vm3 = vmmov %vm5226_vm1 }
 0x5a9   : > { %v4578_v6 = vld [vmem:[#allocation2 + $0x18] sm:$0xff] }
 0x5aa   : > { %2291 = vrot.lane.b32.xlu0 %v4578_v6, %s5146_s13  ;;  %2276 = vst.msk [vmem:[#allocation3 + $0x18] sm:$0xff] %vm349_vm4, %v4578_v6 }
 0x5ab   : > { %v4584_v18 = vld [vmem:[#allocation2] sm:$0xff] }
 0x5ac   : > { %2285 = vrot.lane.b32.xlu1 %v4584_v18, %s5146_s13  ;;  %s5221_s13 = smov 87  }
 0x5ae   : > { %2318 = vrot.lane.b32.xlu0 %v4578_v6, %s5142_s15 }
 0x5b0   : > { %2312 = vrot.lane.b32.xlu1 %v4584_v18, %s5142_s15  ;;  %s5219_s15 = smov 105  }
 0x5b1   : > { %v2932_v39 = vld [vmem:[#allocation3 + $0x18] sm:$0xff] }
 0x5b2   : > { %2345 = vrot.lane.b32.xlu0 %v4578_v6, %s5217_s25 }
 0x5b4   : > { %2339 = vrot.lane.b32.xlu1 %v4584_v18, %s5217_s25 }
 0x5b6   : > { %2372 = vrot.lane.b32.xlu0 %v4578_v6, %s5144_s17 }
 0x5b8   : > { %2366 = vrot.lane.b32.xlu1 %v4584_v18, %s5144_s17  ;;  %s5220_s17 = smov 88  }
 0x5ba   : > { %2399 = vrot.lane.b32.xlu0 %v4578_v6, %s5168_s9 }
 0x5bc   : > { %2393 = vrot.lane.b32.xlu1 %v4584_v18, %s5168_s9 }
 0x5be   : > { %2426 = vrot.lane.b32.xlu0 %v4578_v6, %s5218_s21 }
 0x5c0   : > { %2420 = vrot.lane.b32.xlu1 %v4584_v18, %s5218_s21 }
 0x5c2   : > { %2453 = vrot.lane.b32.xlu0 %v4578_v6, %s5169_s12 }
 0x5c4   : > { %2447 = vrot.lane.b32.xlu1 %v4584_v18, %s5169_s12 }
 0x5c6   : > { %2480 = vrot.lane.b32.xlu0 %v4578_v6, %s5219_s15 }
 0x5c8   : > { %2474 = vrot.lane.b32.xlu1 %v4584_v18, %s5219_s15 }
 0x5ca   : > { %2507 = vrot.lane.b32.xlu0 %v4578_v6, %s5170_s19 }
 0x5cc   : > { %2501 = vrot.lane.b32.xlu1 %v4584_v18, %s5170_s19 }
 0x5ce   : > { %2534 = vrot.lane.b32.xlu0 %v4578_v6, %s5220_s17 }
 0x5d0   : > { %2528 = vrot.lane.b32.xlu1 %v4584_v18, %s5220_s17 }
 0x5d2   : > { %2561 = vrot.lane.b32.xlu0 %v4578_v6, %s5221_s13 }
 0x5d4   : > { %2555 = vrot.lane.b32.xlu1 %v4584_v18, %s5221_s13 }
 0x5d6   : > { %2588 = vrot.lane.b32.xlu0 %v4578_v6, %s5222_s0 }
 0x5d8   : > { %2582 = vrot.lane.b32.xlu1 %v4584_v18, %s5222_s0 }
 0x5da   : > { %2615 = vrot.lane.b32.xlu0 %v4578_v6, %s5165_s14 }
 0x5dc   : > { %2609 = vrot.lane.b32.xlu1 %v4584_v18, %s5165_s14 }
 0x5de   : > { %2642 = vrot.lane.b32.xlu0 %v4578_v6, %s5158_s29 }
 0x5e0   : > { %2636 = vrot.lane.b32.xlu1 %v4584_v18, %s5158_s29 }
 0x5e2   : > { %2669 = vrot.lane.b32.xlu0 %v4578_v6, %s5166_s16 }
 0x5e4   : > { %2663 = vrot.lane.b32.xlu1 %v4584_v18, %s5166_s16 }
 0x5e6   : > { %2696 = vrot.lane.b32.xlu0 %v4578_v6, %s5160_s11 }
 0x5e8   : > { %2690 = vrot.lane.b32.xlu1 %v4584_v18, %s5160_s11 }
 0x5ea   : > { %2723 = vrot.lane.b32.xlu0 %v4578_v6, %s5167_s18 }
 0x5ec   : > { %2717 = vrot.lane.b32.xlu1 %v4584_v18, %s5167_s18 }
 0x5ee   : > { %2750 = vrot.lane.b32.xlu0 %v4578_v6, %s5162_s22 }
 0x5f0   : > { %2744 = vrot.lane.b32.xlu1 %v4584_v18, %s5162_s22 }
 0x5f2   : > { %2777 = vrot.lane.b32.xlu0 %v4578_v6, %s5159_s10 }
 0x5f4   : > { %2771 = vrot.lane.b32.xlu1 %v4584_v18, %s5159_s10 }
 0x5f6   : > { %2804 = vrot.lane.b32.xlu0 %v4578_v6, %s5163_s24 }
 0x5f8   : > { %2798 = vrot.lane.b32.xlu1 %v4584_v18, %s5163_s24 }
 0x5fa   : > { %2831 = vrot.lane.b32.xlu0 %v4578_v6, %s5161_s26 }
 0x5fc   : > { %2825 = vrot.lane.b32.xlu1 %v4584_v18, %s5161_s26 }
 0x5fe   : > { %2858 = vrot.lane.b32.xlu0 %v4578_v6, %s5164_s30 }
 0x600   : > { %2852 = vrot.lane.b32.xlu1 %v4584_v18, %s5164_s30 }
 0x602   : > { %2885 = vrot.lane.b32.xlu0 %v4578_v6, %s5172_s23 }
 0x604   : > { %2879 = vrot.lane.b32.xlu1 %v4584_v18, %s5172_s23 }
 0x606   : > { %2289 = vrot.lane.b32.xlu0 %v4576_v30, %s5223_s1 }
 0x608   : > { %2287 = vrot.lane.b32.xlu1 %v4573_v14, %s5223_s1 }
 0x60a   : > { %2316 = vrot.lane.b32.xlu0 %v4576_v30, %s5224_s2 }
 0x60c   : > { %2314 = vrot.lane.b32.xlu1 %v4573_v14, %s5224_s2 }
 0x60e   : > { %2343 = vrot.lane.b32.xlu0 %v4576_v30, %s5217_s25 }
 0x610   : > { %2341 = vrot.lane.b32.xlu1 %v4573_v14, %s5217_s25 }
 0x612   : > { %2370 = vrot.lane.b32.xlu0 %v4576_v30, %s5225_s3 }
 0x614   : > { %2368 = vrot.lane.b32.xlu1 %v4573_v14, %s5225_s3 }
 0x616   : > { %2397 = vrot.lane.b32.xlu0 %v4576_v30, %s5168_s9 }
 0x618   : > { %2395 = vrot.lane.b32.xlu1 %v4573_v14, %s5168_s9 }
 0x61a   : > { %2424 = vrot.lane.b32.xlu0 %v4576_v30, %s5218_s21 }
 0x61c   : > { %v4698_v63 = vpop.permute.xlu0 %2291  ;;  %2422 = vrot.lane.b32.xlu1 %v4573_v14, %s5218_s21 }
 0x61d   : > { %2303 = vst.msk [vmem:[#allocation3 + $0x38] sm:$0xff] %vm349_vm4, %v4698_v63 }
 0x61e   : > { %2451 = vrot.lane.b32.xlu0 %v4576_v30, %s5169_s12  ;;  %v4706_v58 = vpop.permute.xlu1 %2285 }
 0x620   : > { %v4708_v24 = vpop.permute.xlu0 %2318  ;;  %2449 = vrot.lane.b32.xlu1 %v4573_v14, %s5169_s12 }
 0x621   : > { %2330 = vst.msk [vmem:[#allocation3 + $0x58] sm:$0xff] %vm349_vm4, %v4708_v24 }
 0x622   : > { %2478 = vrot.lane.b32.xlu0 %v4576_v30, %s5219_s15  ;;  %v4716_v16 = vpop.permute.xlu1 %2312 }
 0x624   : > { %v4718_v48 = vpop.permute.xlu0 %2345  ;;  %2476 = vrot.lane.b32.xlu1 %v4573_v14, %s5219_s15  ;;  %v2936_v33 = vld [vmem:[#allocation3 + $0x38] sm:$0xff] }
 0x625   : > { %2357 = vst.msk [vmem:[#allocation3 + $0x78] sm:$0xff] %vm349_vm4, %v4718_v48  ;;  %v3525_v57 = vpack.c.bf16 %v2936_v33, %v2932_v39 }
 0x626   : > { %2505 = vrot.lane.b32.xlu0 %v4576_v30, %s5170_s19  ;;  %v4726_v43 = vpop.permute.xlu1 %2339 }
 0x627   : > { %3526 = vmatprep.subr.bf16.mxu1 %v3525_v57 }
 0x628   : > { %v4728_v5 = vpop.permute.xlu0 %2372  ;;  %2503 = vrot.lane.b32.xlu1 %v4573_v14, %s5170_s19  ;;  %v2940_v23 = vld [vmem:[#allocation3 + $0x58] sm:$0xff]  ;;  %s3284_s19 = sshll.u32 %s5284_s28, 6 }
 0x629   : > { %2384 = vst.msk [vmem:[#allocation3 + $0x98] sm:$0xff] %vm349_vm4, %v4728_v5 }
 0x62a   : > { %2532 = vrot.lane.b32.xlu0 %v4576_v30, %s5220_s17  ;;  %v4736_v44 = vpop.permute.xlu1 %2366 }
 0x62c   : > { %v4738_v2 = vpop.permute.xlu0 %2399  ;;  %2530 = vrot.lane.b32.xlu1 %v4573_v14, %s5220_s17  ;;  %v2944_v25 = vld [vmem:[#allocation3 + $0x78] sm:$0xff] }
 0x62d   : > { %2411 = vst.msk [vmem:[#allocation3 + $0xb8] sm:$0xff] %vm349_vm4, %v4738_v2 }
 0x62e   : > { %2559 = vrot.lane.b32.xlu0 %v4576_v30, %s5221_s13  ;;  %v4746_v52 = vpop.permute.xlu1 %2393 }
 0x630   : > { %v4748_v34 = vpop.permute.xlu0 %2426  ;;  %2557 = vrot.lane.b32.xlu1 %v4573_v14, %s5221_s13 }
 0x631   : > { %2438 = vst.msk [vmem:[#allocation3 + $0xd8] sm:$0xff] %vm349_vm4, %v4748_v34 }
 0x632   : > { %2586 = vrot.lane.b32.xlu0 %v4576_v30, %s5222_s0  ;;  %v4756_v20 = vpop.permute.xlu1 %2420 }
 0x634   : > { %v4758_v40 = vpop.permute.xlu0 %2453  ;;  %2584 = vrot.lane.b32.xlu1 %v4573_v14, %s5222_s0 }
 0x635   : > { %2465 = vst.msk [vmem:[#allocation3 + $0xf8] sm:$0xff] %vm349_vm4, %v4758_v40 }
 0x636   : > { %2613 = vrot.lane.b32.xlu0 %v4576_v30, %s5165_s14  ;;  %v4766_v1 = vpop.permute.xlu1 %2447 }
 0x638   : > { %v4768_v26 = vpop.permute.xlu0 %2480  ;;  %2611 = vrot.lane.b32.xlu1 %v4573_v14, %s5165_s14 }
 0x639   : > { %2492 = vst.msk [vmem:[#allocation3 + $0x118] sm:$0xff] %vm349_vm4, %v4768_v26 }
 0x63a   : > { %2640 = vrot.lane.b32.xlu0 %v4576_v30, %s5158_s29  ;;  %v4776_v47 = vpop.permute.xlu1 %2474 }
 0x63c   : > { %v4778_v41 = vpop.permute.xlu0 %2507  ;;  %2638 = vrot.lane.b32.xlu1 %v4573_v14, %s5158_s29 }
 0x63d   : > { %2519 = vst.msk [vmem:[#allocation3 + $0x138] sm:$0xff] %vm349_vm4, %v4778_v41 }
 0x63e   : > { %2667 = vrot.lane.b32.xlu0 %v4576_v30, %s5166_s16  ;;  %v4786_v45 = vpop.permute.xlu1 %2501 }
 0x640   : > { %v4788_v17 = vpop.permute.xlu0 %2534  ;;  %2665 = vrot.lane.b32.xlu1 %v4573_v14, %s5166_s16 }
 0x641   : > { %2546 = vst.msk [vmem:[#allocation3 + $0x158] sm:$0xff] %vm349_vm4, %v4788_v17 }
 0x642   : > { %2694 = vrot.lane.b32.xlu0 %v4576_v30, %s5160_s11  ;;  %v4796_v60 = vpop.permute.xlu1 %2528 }
 0x644   : > { %v4798_v54 = vpop.permute.xlu0 %2561  ;;  %2692 = vrot.lane.b32.xlu1 %v4573_v14, %s5160_s11 }
 0x645   : > { %2573 = vst.msk [vmem:[#allocation3 + $0x178] sm:$0xff] %vm349_vm4, %v4798_v54 }
 0x646   : > { %2721 = vrot.lane.b32.xlu0 %v4576_v30, %s5167_s18  ;;  %v4806_v22 = vpop.permute.xlu1 %2555 }
 0x648   : > { %v4808_v51 = vpop.permute.xlu0 %2588  ;;  %2719 = vrot.lane.b32.xlu1 %v4573_v14, %s5167_s18 }
 0x649   : > { %2600 = vst.msk [vmem:[#allocation3 + $0x198] sm:$0xff] %vm349_vm4, %v4808_v51 }
 0x64a   : > { %2748 = vrot.lane.b32.xlu0 %v4576_v30, %s5162_s22  ;;  %v4816_v35 = vpop.permute.xlu1 %2582 }
 0x64c   : > { %v4818_v4 = vpop.permute.xlu0 %2615  ;;  %2746 = vrot.lane.b32.xlu1 %v4573_v14, %s5162_s22 }
 0x64d   : > { %2627 = vst.msk [vmem:[#allocation3 + $0x1b8] sm:$0xff] %vm349_vm4, %v4818_v4 }
 0x64e   : > { %2775 = vrot.lane.b32.xlu0 %v4576_v30, %s5159_s10  ;;  %v4826_v59 = vpop.permute.xlu1 %2609 }
 0x650   : > { %v4828_v13 = vpop.permute.xlu0 %2642  ;;  %2773 = vrot.lane.b32.xlu1 %v4573_v14, %s5159_s10 }
 0x651   : > { %2654 = vst.msk [vmem:[#allocation3 + $0x1d8] sm:$0xff] %vm349_vm4, %v4828_v13 }
 0x652   : > { %2802 = vrot.lane.b32.xlu0 %v4576_v30, %s5163_s24  ;;  %v4836_v46 = vpop.permute.xlu1 %2636 }
 0x654   : > { %v4838_v3 = vpop.permute.xlu0 %2669  ;;  %2800 = vrot.lane.b32.xlu1 %v4573_v14, %s5163_s24  ;;  %s305_s24 = scalar_lea.vmem %s5075_s8, %s3284_s19 }
 0x655   : > { %2681 = vst.msk [vmem:[#allocation3 + $0x1f8] sm:$0xff] %vm349_vm4, %v4838_v3 }
 0x656   : > { %2829 = vrot.lane.b32.xlu0 %v4576_v30, %s5161_s26  ;;  %v4846_v10 = vpop.permute.xlu1 %2663 }
 0x658   : > { %v4848_v42 = vpop.permute.xlu0 %2696  ;;  %2827 = vrot.lane.b32.xlu1 %v4573_v14, %s5161_s26 }
 0x659   : > { %2708 = vst.msk [vmem:[#allocation3 + $0x218] sm:$0xff] %vm349_vm4, %v4848_v42 }
 0x65a   : > { %2856 = vrot.lane.b32.xlu0 %v4576_v30, %s5164_s30  ;;  %v4856_v19 = vpop.permute.xlu1 %2690 }
 0x65c   : > { %v4858_v29 = vpop.permute.xlu0 %2723  ;;  %2854 = vrot.lane.b32.xlu1 %v4573_v14, %s5164_s30 }
 0x65d   : > { %2735 = vst.msk [vmem:[#allocation3 + $0x238] sm:$0xff] %vm349_vm4, %v4858_v29 }
 0x65e   : > { %2883 = vrot.lane.b32.xlu0 %v4576_v30, %s5172_s23  ;;  %v4871_v9 = vpop.permute.xlu1 %2717 }
 0x660   : > { %v4873_v7 = vpop.permute.xlu0 %2750  ;;  %2881 = vrot.lane.b32.xlu1 %v4573_v14, %s5172_s23 }
 0x661   : > { %2762 = vst.msk [vmem:[#allocation3 + $0x258] sm:$0xff] %vm349_vm4, %v4873_v7 }
 0x662   : > { %2910 = vrot.lane.b32.xlu0 %v4576_v30, %s5173_s20  ;;  %v4881_v50 = vpop.permute.xlu1 %2744 }
 0x664   : > { %v4883_v8 = vpop.permute.xlu0 %2777  ;;  %2908 = vrot.lane.b32.xlu1 %v4573_v14, %s5173_s20 }
 0x665   : > { %2789 = vst.msk [vmem:[#allocation3 + $0x278] sm:$0xff] %vm349_vm4, %v4883_v8 }
 0x666   : > { %2912 = vrot.lane.b32.xlu0 %v4578_v6, %s5173_s20  ;;  %v4891_v56 = vpop.permute.xlu1 %2771  ;;  %v3529_v6 = vpack.c.bf16 %v2944_v25, %v2940_v23 }
 0x668   : > { %v4896_v12 = vpop.permute.xlu0 %2804  ;;  %2906 = vrot.lane.b32.xlu1 %v4584_v18, %s5173_s20 }
 0x669   : > { %2816 = vst.msk [vmem:[#allocation3 + $0x298] sm:$0xff] %vm349_vm4, %v4896_v12 }
 0x66a   : > { %3038 = vperm.xlu0 %3608, %v3030_v62   ;;  %v4905_v28 = vpop.permute.xlu1 %2798 }
 0x66c   : > { %v4907_v36 = vpop.permute.xlu0 %2831  ;;  %3033 = vperm.xlu1 %3609, %v3029_v11   ;;  %v2952_v11 = vld [vmem:[#allocation3 + $0xb8] sm:$0xff] }
 0x66d   : > { %2843 = vst.msk [vmem:[#allocation3 + $0x2b8] sm:$0xff] %vm349_vm4, %v4907_v36 }
 0x66e   : > { %v4911_v61 = vpop.permute.xlu1 %2825 }
 0x670   : > { %v4913_v31 = vpop.permute.xlu0 %2858 }
 0x671   : > { %2870 = vst.msk [vmem:[#allocation3 + $0x2d8] sm:$0xff] %vm349_vm4, %v4913_v31 }
 0x672   : > { %v4917_v55 = vpop.permute.xlu1 %2852 }
 0x674   : > { %v4919_v53 = vpop.permute.xlu0 %2885 }
 0x675   : > { %2897 = vst.msk [vmem:[#allocation3 + $0x2f8] sm:$0xff] %vm349_vm4, %v4919_v53 }
 0x676   : > { %v4923_v49 = vpop.permute.xlu1 %2879 }
 0x678   : > { %v2290_v37 = vpop.permute.xlu0 %2289 }
 0x679   : > { %v2295_v38 = vsel %vm367_vm5, %v2290_v37, %v4698_v63 }
 0x67a   : > { %v2288_v32 = vpop.permute.xlu1 %2287  ;;  %v3527_v15 = vpack.c.bf16 %v2295_v38, %v4576_v30 }
 0x67b   : > { %v2293_v21 = vsel %vm367_vm5, %v4706_v58, %v2288_v32  ;;  %v2294_v0 = vsel %vm367_vm5, %v2288_v32, %v2290_v37  ;;  %vm5229_vm5 = vcmask 1022976  }
 0x67c   : > { %v2317_v39 = vpop.permute.xlu0 %2316  ;;  %3528 = vmatpush1.bf16.msra.mxu1 %v3527_v15  ;;  %v3477_v33 = vpack.c.bf16 %v2294_v0, %v4573_v14  ;;  %v3479_v57 = vpack.c.bf16 %v2293_v21, %v4584_v18  ;;  %v2948_v18 = vld [vmem:[#allocation3 + $0x98] sm:$0xff]  ;;  %vm5230_vm7 = vmmov %vm5229_vm5 }
 0x67d   : > { %v2322_v27 = vsel %vm5226_vm1, %v2317_v39, %v4708_v24  ;;  %3530 = vmatprep.subr.bf16.mxu1 %v3529_v6  ;;  %vm5231_vm8 = vmmov %vm5229_vm5  ;;  %v3533_v32 = vpack.c.bf16 %v2952_v11, %v2948_v18  ;;  %v2968_v18 = vld [vmem:[#allocation3 + $0x138] sm:$0xff] }
 0x67e   : > { %v2315_v63 = vpop.permute.xlu1 %2314  ;;  %3478 = vmatprep.subr.bf16.mxu0 %v3477_v33  ;;  %vm5236_vm1 = vmmov %vm5235_vm6 }
 0x67f   : > { %v2320_v30 = vsel %vm5227_vm2, %v4716_v16, %v2315_v63  ;;  %v2321_v58 = vsel %vm5228_vm3, %v2315_v63, %v2317_v39  ;;  %3480 = vmatpush1.bf16.msra.mxu0 %v3479_v57  ;;  %v2960_v39 = vld [vmem:[#allocation3 + $0xf8] sm:$0xff]  ;;  %vm5237_vm2 = vmmov %vm5236_vm1  ;;  %vm5238_vm3 = vcmask 875520  }
 0x680   : > { %v2344_v62 = vpop.permute.xlu0 %2343  ;;  %v2956_v63 = vld [vmem:[#allocation3 + $0xd8] sm:$0xff] }
 0x681   : > { %v2349_v37 = vsel %vm5229_vm5, %v2344_v62, %v4718_v48  ;;  %vm5239_vm5 = vmmov %vm5238_vm3 }
 0x682   : > { %v2342_v14 = vpop.permute.xlu1 %2341  ;;  %v3531_v25 = vpack.c.bf16 %v2349_v37, %v2322_v27 }
 0x683   : > { %v2347_v24 = vsel %vm5230_vm7, %v4726_v43, %v2342_v14  ;;  %v2348_v38 = vsel %vm5231_vm8, %v2342_v14, %v2344_v62  ;;  %vm5240_vm7 = vmmov %vm5238_vm3  ;;  %vm5241_vm8 = vcmask 867328  }
 0x684   : > { %v2371_v15 = vpop.permute.xlu0 %2370  ;;  %3532 = vmatpush1.bf16.msra.mxu1 %v3531_v25  ;;  %v3481_v16 = vpack.c.bf16 %v2348_v38, %v2321_v58  ;;  %v3483_v23 = vpack.c.bf16 %v2347_v24, %v2320_v30  ;;  %v3537_v58 = vpack.c.bf16 %v2960_v39, %v2956_v63  ;;  %v2976_v39 = vld [vmem:[#allocation3 + $0x178] sm:$0xff] }
 0x685   : > { %v2376_v21 = vsel %vm5232_vm12, %v2371_v15, %v4728_v5  ;;  %3534 = vmatprep.subr.bf16.mxu1 %v3533_v32  ;;  %vm5242_vm12 = vmmov %vm5241_vm8  ;;  %v2972_v63 = vld [vmem:[#allocation3 + $0x158] sm:$0xff] }
 0x686   : > { %v2369_v0 = vpop.permute.xlu1 %2368  ;;  %3482 = vmatprep.subr.bf16.mxu0 %v3481_v16 }
 0x687   : > { %v2374_v48 = vsel %vm5233_vm9, %v4736_v44, %v2369_v0  ;;  %v2375_v6 = vsel %vm5234_vm10, %v2369_v0, %v2371_v15  ;;  %3484 = vmatpush1.bf16.msra.mxu0 %v3483_v23  ;;  %v2964_v15 = vld [vmem:[#allocation3 + $0x118] sm:$0xff]  ;;  %vm5243_vm9 = vmmov %vm5241_vm8  ;;  %vm5244_vm10 = vcmask 859136  }
 0x688   : > { %v2398_v43 = vpop.permute.xlu0 %2397  ;;  %v3541_v23 = vpack.c.bf16 %v2968_v18, %v2964_v15  ;;  %v2980_v18 = vld [vmem:[#allocation3 + $0x198] sm:$0xff] }
 0x689   : > { %v2403_v33 = vsel %vm5235_vm6, %v2398_v43, %v4738_v2  ;;  %vm5245_vm6 = vmmov %vm5244_vm10 }
 0x68a   : > { %v2396_v57 = vpop.permute.xlu1 %2395  ;;  %v3535_v27 = vpack.c.bf16 %v2403_v33, %v2376_v21 }
 0x68b   : > { %v2401_v5 = vsel %vm5236_vm1, %v4746_v52, %v2396_v57  ;;  %v2402_v30 = vsel %vm5237_vm2, %v2396_v57, %v2398_v43  ;;  %vm5246_vm1 = vmmov %vm5245_vm6  ;;  %vm5247_vm2 = vcmask 850944  }
 0x68c   : > { %v2425_v62 = vpop.permute.xlu0 %2424  ;;  %3536 = vmatpush1.bf16.msra.mxu1 %v3535_v27  ;;  %v3485_v44 = vpack.c.bf16 %v2402_v30, %v2375_v6  ;;  %v3487_v11 = vpack.c.bf16 %v2401_v5, %v2374_v48  ;;  %v3545_v30 = vpack.c.bf16 %v2976_v39, %v2972_v63  ;;  %v3000_v63 = vld [vmem:[#allocation3 + $0x238] sm:$0xff] }
 0x68d   : > { %v2430_v37 = vsel %vm5238_vm3, %v2425_v62, %v4748_v34  ;;  %3538 = vmatprep.subr.bf16.mxu1 %v3537_v58  ;;  %vm5248_vm3 = vmmov %vm5247_vm2 }
 0x68e   : > { %v2423_v14 = vpop.permute.xlu1 %2422  ;;  %3486 = vmatprep.subr.bf16.mxu0 %v3485_v44 }
 0x68f   : > { %v2428_v2 = vsel %vm5239_vm5, %v4756_v20, %v2423_v14  ;;  %v2429_v25 = vsel %vm5240_vm7, %v2423_v14, %v2425_v62  ;;  %3488 = vmatpush1.bf16.msra.mxu0 %v3487_v11  ;;  %vm5249_vm5 = vmmov %vm5247_vm2  ;;  %vm5250_vm7 = vcmask 719872   ;;  %v2984_v14 = vld [vmem:[#allocation3 + $0x1b8] sm:$0xff] }
 0x690   : > { %v2452_v52 = vpop.permute.xlu0 %2451 }
 0x691   : > { %v2457_v24 = vsel %vm5241_vm8, %v2452_v52, %v4758_v40  ;;  %vm5251_vm8 = vmmov %vm5250_vm7 }
 0x692   : > { %v2450_v38 = vpop.permute.xlu1 %2449  ;;  %v3539_v32 = vpack.c.bf16 %v2457_v24, %v2430_v37 }
 0x693   : > { %v2455_v34 = vsel %vm5242_vm12, %v4766_v1, %v2450_v38  ;;  %v2456_v16 = vsel %vm5243_vm9, %v2450_v38, %v2452_v52  ;;  %vm5252_vm12 = vmmov %vm5250_vm7  ;;  %vm5253_vm9 = vcmask 711680   ;;  %v3549_v38 = vpack.c.bf16 %v2984_v14, %v2980_v18  ;;  %v3008_v14 = vld [vmem:[#allocation3 + $0x278] sm:$0xff] }
 0x694   : > { %v2479_v21 = vpop.permute.xlu0 %2478  ;;  %3540 = vmatpush1.bf16.msra.mxu1 %v3539_v32  ;;  %v3489_v20 = vpack.c.bf16 %v2456_v16, %v2429_v25  ;;  %v3491_v0 = vpack.c.bf16 %v2455_v34, %v2428_v2  ;;  %v3004_v18 = vld [vmem:[#allocation3 + $0x258] sm:$0xff] }
 0x695   : > { %v2484_v48 = vsel %vm5244_vm10, %v2479_v21, %v4768_v26  ;;  %3542 = vmatprep.subr.bf16.mxu1 %v3541_v23  ;;  %vm5254_vm10 = vmmov %vm5253_vm9 }
 0x696   : > { %v2477_v6 = vpop.permute.xlu1 %2476  ;;  %3490 = vmatprep.subr.bf16.mxu0 %v3489_v20 }
 0x697   : > { %v2482_v40 = vsel %vm5245_vm6, %v4776_v47, %v2477_v6  ;;  %v2483_v43 = vsel %vm5246_vm1, %v2477_v6, %v2479_v21  ;;  %3492 = vmatpush1.bf16.msra.mxu0 %v3491_v0  ;;  %vm5255_vm6 = vmmov %vm5253_vm9  ;;  %vm5256_vm1 = vcmask 703488   ;;  %v2992_v21 = vld [vmem:[#allocation3 + $0x1f8] sm:$0xff] }
 0x698   : > { %v2506_v1 = vpop.permute.xlu0 %2505  ;;  %v2988_v6 = vld [vmem:[#allocation3 + $0x1d8] sm:$0xff] }
 0x699   : > { %v2511_v33 = vsel %vm5247_vm2, %v2506_v1, %v4778_v41  ;;  %vm5257_vm2 = vmmov %vm5256_vm1 }
 0x69a   : > { %v2504_v57 = vpop.permute.xlu1 %2503  ;;  %v3543_v27 = vpack.c.bf16 %v2511_v33, %v2484_v48 }
 0x69b   : > { %v2509_v26 = vsel %vm5248_vm3, %v4786_v45, %v2504_v57  ;;  %v2510_v5 = vsel %vm5249_vm5, %v2504_v57, %v2506_v1  ;;  %vm5258_vm3 = vmmov %vm5256_vm1  ;;  %vm5259_vm5 = vcmask 695296  }
 0x69c   : > { %v2533_v58 = vpop.permute.xlu0 %2532  ;;  %3544 = vmatpush1.bf16.msra.mxu1 %v3543_v27  ;;  %v3493_v47 = vpack.c.bf16 %v2510_v5, %v2483_v43  ;;  %v3495_v62 = vpack.c.bf16 %v2509_v26, %v2482_v40  ;;  %v3553_v43 = vpack.c.bf16 %v2992_v21, %v2988_v6  ;;  %v3012_v21 = vld [vmem:[#allocation3 + $0x298] sm:$0xff] }
 0x69d   : > { %v2538_v44 = vsel %vm5250_vm7, %v2533_v58, %v4788_v17  ;;  %3546 = vmatprep.subr.bf16.mxu1 %v3545_v30  ;;  %vm5260_vm7 = vmmov %vm5259_vm5 }
 0x69e   : > { %v2531_v11 = vpop.permute.xlu1 %2530  ;;  %3494 = vmatprep.subr.bf16.mxu0 %v3493_v47 }
 0x69f   : > { %v2536_v41 = vsel %vm5251_vm8, %v4796_v60, %v2531_v11  ;;  %v2537_v37 = vsel %vm5252_vm12, %v2531_v11, %v2533_v58  ;;  %3496 = vmatpush1.bf16.msra.mxu0 %v3495_v62  ;;  %vm5261_vm8 = vmmov %vm5259_vm5  ;;  %vm5262_vm12 = vcmask 687104   ;;  %v2996_v58 = vld [vmem:[#allocation3 + $0x218] sm:$0xff] }
 0x6a0   : > { %v2560_v45 = vpop.permute.xlu0 %2559  ;;  %v3557_v62 = vpack.c.bf16 %v3000_v63, %v2996_v58 }
 0x6a1   : > { %v2565_v2 = vsel %vm5253_vm9, %v2560_v45, %v4798_v54  ;;  %vm5263_vm9 = vmmov %vm5262_vm12 }
 0x6a2   : > { %v2558_v25 = vpop.permute.xlu1 %2557  ;;  %v3547_v52 = vpack.c.bf16 %v2565_v2, %v2538_v44 }
 0x6a3   : > { %v2563_v17 = vsel %vm5254_vm10, %v4806_v22, %v2558_v25  ;;  %v2564_v24 = vsel %vm5255_vm6, %v2558_v25, %v2560_v45  ;;  %vm5264_vm10 = vmmov %vm5263_vm9  ;;  %vm5265_vm6 = vcmask 556032  }
 0x6a4   : > { %v2587_v32 = vpop.permute.xlu0 %2586  ;;  %3548 = vmatpush1.bf16.msra.mxu1 %v3547_v52  ;;  %v3497_v60 = vpack.c.bf16 %v2564_v24, %v2537_v37  ;;  %v3499_v15 = vpack.c.bf16 %v2563_v17, %v2536_v41  ;;  %v3561_v24 = vpack.c.bf16 %v3008_v14, %v3004_v18  ;;  %v2927_v14 = vld [vmem:[%s5072_s5 + $0x10] sm:$0xff] }
 0x6a5   : > { %v2592_v34 = vsel %vm5256_vm1, %v2587_v32, %v4808_v51  ;;  %3550 = vmatprep.subr.bf16.mxu1 %v3549_v38  ;;  %vm5266_vm1 = vmmov %vm5265_vm6 }
 0x6a6   : > { %v2585_v16 = vpop.permute.xlu1 %2584  ;;  %3498 = vmatprep.subr.bf16.mxu0 %v3497_v60 }
 0x6a7   : > { %v2590_v54 = vsel %vm5257_vm2, %v4816_v35, %v2585_v16  ;;  %v2591_v23 = vsel %vm5258_vm3, %v2585_v16, %v2587_v32  ;;  %3500 = vmatpush1.bf16.msra.mxu0 %v3499_v15  ;;  %vm5267_vm2 = vmmov %vm5266_vm1  ;;  %vm5268_vm3 = vcmask 547840   ;;  %v3016_v16 = vld [vmem:[#allocation3 + $0x2b8] sm:$0xff] }
 0x6a8   : > { %v2614_v22 = vpop.permute.xlu0 %2613 }
 0x6a9   : > { %v2619_v20 = vsel %vm5259_vm5, %v2614_v22, %v4818_v4  ;;  %vm5269_vm5 = vmmov %vm5268_vm3 }
 0x6aa   : > { %v2612_v0 = vpop.permute.xlu1 %2611  ;;  %v3551_v48 = vpack.c.bf16 %v2619_v20, %v2592_v34 }
 0x6ab   : > { %v2617_v51 = vsel %vm5260_vm7, %v4826_v59, %v2612_v0  ;;  %v2618_v40 = vsel %vm5261_vm8, %v2612_v0, %v2614_v22  ;;  %vm5270_vm7 = vmmov %vm5268_vm3  ;;  %vm5271_vm8 = vcmask 539648   ;;  %v3565_v0 = vpack.c.bf16 %v3016_v16, %v3012_v21 }
 0x6ac   : > { %v2641_v1 = vpop.permute.xlu0 %2640  ;;  %3552 = vmatpush1.bf16.msra.mxu1 %v3551_v48  ;;  %v3501_v35 = vpack.c.bf16 %v2618_v40, %v2591_v23  ;;  %v3503_v39 = vpack.c.bf16 %v2617_v51, %v2590_v54 }
 0x6ad   : > { %v2646_v33 = vsel %vm5262_vm12, %v2641_v1, %v4828_v13  ;;  %3554 = vmatprep.subr.bf16.mxu1 %v3553_v43  ;;  %vm5272_vm12 = vmmov %vm5271_vm8 }
 0x6ae   : > { %v2639_v57 = vpop.permute.xlu1 %2638  ;;  %3502 = vmatprep.subr.bf16.mxu0 %v3501_v35 }
 0x6af   : > { %v2644_v4 = vsel %vm5263_vm9, %v4836_v46, %v2639_v57  ;;  %v2645_v27 = vsel %vm5264_vm10, %v2639_v57, %v2641_v1  ;;  %3504 = vmatpush1.bf16.msra.mxu0 %v3503_v39  ;;  %vm5273_vm9 = vmmov %vm5271_vm8  ;;  %vm5274_vm10 = vcmask 531456   ;;  %v3024_v1 = vld [vmem:[#allocation3 + $0x2f8] sm:$0xff] }
 0x6b0   : > { %v2668_v59 = vpop.permute.xlu0 %2667  ;;  %v3020_v57 = vld [vmem:[#allocation3 + $0x2d8] sm:$0xff] }
 0x6b1   : > { %v2673_v26 = vsel %vm5265_vm6, %v2668_v59, %v4838_v3  ;;  %vm5275_vm6 = vmmov %vm5274_vm10 }
 0x6b2   : > { %v2666_v5 = vpop.permute.xlu1 %2665  ;;  %v3555_v30 = vpack.c.bf16 %v2673_v26, %v2646_v33 }
 0x6b3   : > { %v2671_v13 = vsel %vm5266_vm1, %v4846_v10, %v2666_v5  ;;  %v2672_v47 = vsel %vm5267_vm2, %v2666_v5, %v2668_v59  ;;  %vm5276_vm1 = vmmov %vm5275_vm6  ;;  %vm5277_vm2 = vcmask 523264  }
 0x6b4   : > { %v2695_v44 = vpop.permute.xlu0 %2694  ;;  %3556 = vmatpush1.bf16.msra.mxu1 %v3555_v30  ;;  %v3505_v46 = vpack.c.bf16 %v2672_v47, %v2645_v27  ;;  %v3507_v11 = vpack.c.bf16 %v2671_v13, %v2644_v4  ;;  %v3569_v27 = vpack.c.bf16 %v3024_v1, %v3020_v57 }
 0x6b5   : > { %v2700_v41 = vsel %vm5268_vm3, %v2695_v44, %v4848_v42  ;;  %3558 = vmatprep.subr.bf16.mxu1 %v3557_v62  ;;  %vm5278_vm3 = vmmov %vm5277_vm2 }
 0x6b6   : > { %v2693_v37 = vpop.permute.xlu1 %2692  ;;  %3506 = vmatprep.subr.bf16.mxu0 %v3505_v46 }
 0x6b7   : > { %v2698_v3 = vsel %vm5269_vm5, %v4856_v19, %v2693_v37  ;;  %v2699_v45 = vsel %vm5270_vm7, %v2693_v37, %v2695_v44  ;;  %3508 = vmatpush1.bf16.msra.mxu0 %v3507_v11  ;;  %vm5279_vm5 = vmmov %vm5277_vm2  ;;  %vm5280_vm7 = vcmask 384000  }
 0x6b8   : > { %v2722_v10 = vpop.permute.xlu0 %2721 }
 0x6b9   : > { %v2727_v2 = vsel %vm5271_vm8, %v2722_v10, %v4858_v29  ;;  %vm5281_vm8 = vmmov %vm5280_vm7 }
 0x6ba   : > { %v2720_v25 = vpop.permute.xlu1 %2719  ;;  %v3559_v52 = vpack.c.bf16 %v2727_v2, %v2700_v41 }
 0x6bb   : > { %v2725_v42 = vsel %vm5272_vm12, %v4871_v9, %v2720_v25  ;;  %v2726_v17 = vsel %vm5273_vm9, %v2720_v25, %v2722_v10  ;;  %vm5282_vm12 = vmmov %vm5280_vm7  ;;  %v2928_v10 = vld [vmem:[%s5072_s5 + $0x18] sm:$0xff] }
 0x6bc   : > { %v2749_v38 = vpop.permute.xlu0 %2748  ;;  %3560 = vmatpush1.bf16.msra.mxu1 %v3559_v52  ;;  %v3509_v19 = vpack.c.bf16 %v2726_v17, %v2699_v45  ;;  %v3511_v32 = vpack.c.bf16 %v2725_v42, %v2698_v3 }
 0x6bd   : > { %v2754_v60 = vsel %vm5274_vm10, %v2749_v38, %v4873_v7  ;;  %3562 = vmatprep.subr.bf16.mxu1 %v3561_v24 }
 0x6be   : > { %v2747_v15 = vpop.permute.xlu1 %2746  ;;  %3510 = vmatprep.subr.bf16.mxu0 %v3509_v19 }
 0x6bf   : > { %v2752_v29 = vsel %vm5275_vm6, %v4881_v50, %v2747_v15  ;;  %v2753_v34 = vsel %vm5276_vm1, %v2747_v15, %v2749_v38  ;;  %3512 = vmatpush1.bf16.msra.mxu0 %v3511_v32 }
 0x6c0   : > { %v2776_v9 = vpop.permute.xlu0 %2775 }
 0x6c1   : > { %v2781_v54 = vsel %vm5277_vm2, %v2776_v9, %v4883_v8 }
 0x6c2   : > { %v2774_v23 = vpop.permute.xlu1 %2773  ;;  %v3563_v22 = vpack.c.bf16 %v2781_v54, %v2754_v60 }
 0x6c3   : > { %v2779_v7 = vsel %vm5278_vm3, %v4891_v56, %v2774_v23  ;;  %v2780_v20 = vsel %vm5279_vm5, %v2774_v23, %v2776_v9 }
 0x6c4   : > { %v2803_v48 = vpop.permute.xlu0 %2802  ;;  %3564 = vmatpush1.bf16.msra.mxu1 %v3563_v22  ;;  %v3513_v50 = vpack.c.bf16 %v2780_v20, %v2753_v34  ;;  %v3515_v6 = vpack.c.bf16 %v2779_v7, %v2752_v29 }
 0x6c5   : > { %v2808_v51 = vsel %vm899_vm14, %v2803_v48, %v4896_v12  ;;  %3566 = vmatprep.subr.bf16.mxu1 %v3565_v0 }
 0x6c6   : > { %v2801_v40 = vpop.permute.xlu1 %2800  ;;  %3514 = vmatprep.subr.bf16.mxu0 %v3513_v50 }
 0x6c7   : > { %v2806_v8 = vsel %vm899_vm14, %v4905_v28, %v2801_v40  ;;  %v2807_v43 = vsel %vm899_vm14, %v2801_v40, %v2803_v48  ;;  %3516 = vmatpush1.bf16.msra.mxu0 %v3515_v6 }
 0x6c8   : > { %v2830_v56 = vpop.permute.xlu0 %2829 }
 0x6c9   : > { %v2835_v35 = vsel %vm5280_vm7, %v2830_v56, %v4907_v36 }
 0x6ca   : > { %v2828_v39 = vpop.permute.xlu1 %2827  ;;  %v3567_v33 = vpack.c.bf16 %v2835_v35, %v2808_v51 }
 0x6cb   : > { %v2833_v12 = vsel %vm5281_vm8, %v4911_v61, %v2828_v39  ;;  %v2834_v4 = vsel %vm5282_vm12, %v2828_v39, %v2830_v56 }
 0x6cc   : > { %v2857_v59 = vpop.permute.xlu0 %2856  ;;  %3568 = vmatpush1.bf16.msra.mxu1 %v3567_v33  ;;  %v3517_v28 = vpack.c.bf16 %v2834_v4, %v2807_v43  ;;  %v3519_v63 = vpack.c.bf16 %v2833_v12, %v2806_v8 }
 0x6cd   : > { %v2862_v26 = vsel %vm955_vm0, %v2857_v59, %v4913_v31  ;;  %3570 = vmatprep.subr.bf16.mxu1 %v3569_v27 }
 0x6ce   : > { %v2855_v5 = vpop.permute.xlu1 %2854  ;;  %3518 = vmatprep.subr.bf16.mxu0 %v3517_v28 }
 0x6cf   : > { %v2860_v36 = vsel %vm955_vm0, %v4917_v55, %v2855_v5  ;;  %v2861_v30 = vsel %vm955_vm0, %v2855_v5, %v2857_v59  ;;  %3520 = vmatpush1.bf16.msra.mxu0 %v3519_v63 }
 0x6d0   : > { %v2884_v61 = vpop.permute.xlu0 %2883 }
 0x6d1   : > { %v2889_v58 = vsel %vm983_vm15, %v2884_v61, %v4919_v53 }
 0x6d2   : > { %v2882_v13 = vpop.permute.xlu1 %2881  ;;  %v3571_v47 = vpack.c.bf16 %v2889_v58, %v2862_v26 }
 0x6d3   : > { %v2887_v62 = vsel %vm983_vm15, %v4923_v49, %v2882_v13  ;;  %v2888_v31 = vsel %vm983_vm15, %v2882_v13, %v2884_v61  ;;  %v2925_v49 = vld [vmem:[%s5072_s5] sm:$0xff] }
 0x6d4   : > { %v2911_v44 = vpop.permute.xlu0 %2910  ;;  %3572 = vmatpush1.bf16.msra.mxu1 %v3571_v47  ;;  %v3521_v46 = vpack.c.bf16 %v2888_v31, %v2861_v30  ;;  %v3523_v11 = vpack.c.bf16 %v2887_v62, %v2860_v36 }
 0x6d6   : > { %v2909_v41 = vpop.permute.xlu1 %2908  ;;  %3522 = vmatprep.subr.bf16.mxu0 %v3521_v46 }
 0x6d7   : > { %v2915_v55 = vsel %vm1011_vm13, %v2909_v41, %v2911_v44  ;;  %3524 = vmatpush1.bf16.msra.mxu0 %v3523_v11 }
 0x6d8   : > { %v2913_v37 = vpop.permute.xlu0 %2912  ;;  %3095 = vmatprep.subr.mxu0 %v2915_v55 }
 0x6d9   : > { %v2916_v53 = vsel %vm1011_vm13, %v2911_v44, %v2913_v37  ;;  %2924 = vst.msk [vmem:[#allocation3 + $0x318] sm:$0xff] %vm349_vm4, %v2913_v37 }
 0x6da   : > { %v2907_v3 = vpop.permute.xlu1 %2906 }
 0x6db   : > { %v2914_v45 = vsel %vm1011_vm13, %v2907_v3, %v2909_v41 }
 0x6dc   : > { %3096 = vmatpush1.msra.mxu0 %v2914_v45 }
 0x6dd   : > { %3112 = vmatmul.mubr.f32.vlgmr.msra.gmra.mrb[4].mxu0 %v2925_v49 }
 0x6de   : > { %3278 = vmatprep.mubr.msk.f32.mxu0 %vm1131_vm11, %v2928_v10 }
 0x6e0   : > { %v3028_v2 = vld [vmem:[#allocation3 + $0x318] sm:$0xff] }
 0x6e1   : > { %3172 = vmatprep.subr.mxu1 %v3028_v2  ;;  %3118 = vmatmul.mubr.f32.gmra.mrb[6].mxu0 %v2927_v14 }
 0x6e2   : > { %3173 = vmatpush1.msra.mxu1 %v2916_v53 }
 0x6e3   : > { %3189 = vmatmul.mubr.f32.vlgmr.msra.gmra.mrb[4].mxu1 %v2925_v49 }
 0x6e4   : > { %3280 = vmatprep.mubr.msk.f32.mxu1 %vm1131_vm11, %v2928_v10 }
 0x6e7   : > { %3195 = vmatmul.mubr.f32.gmra.mrb[6].mxu1 %v2927_v14 }
 0x6e9   : > { %v3039_v24 = vpop.permute.xlu0 %3038 }
 0x6eb   : > { %v3034_v25 = vpop.permute.xlu1 %3033 }
 0x7b0   : > { %v3113_v52 = vpop.f32.mrb[4].mxu0 }
 0x7b1   : > { %v3114_v18 = vadd.f32 %v3113_v52, %v3034_v25  ;;  %v3115_v42 = vpop.f32.mrb[5].mxu0 }
 0x7b2   : > { %v3116_v17 = vadd.f32 %v3115_v42, %v3034_v25 }
 0x7b3   : > { %3201 = vst [vmem:[%s305_s24] sm:$0xff] %v3114_v18 }
 0x7b4   : > { %3202 = vst [vmem:[%s305_s24 + $0x8] sm:$0xff] %v3116_v17  ;;  %v3119_v38 = vpop.f32.mrb[6].mxu0 }
 0x7b5   : > { %v3120_v19 = vadd.f32 %v3119_v38, %v3039_v24  ;;  %v3121_v32 = vpop.f32.mrb[7].mxu0 }
 0x7b6   : > { %v3190_v60 = vpop.f32.mrb[4].mxu1  ;;  %v3122_v15 = vadd.f32 %v3121_v32, %v3039_v24 }
 0x7b7   : > { %v3192_v29 = vpop.f32.mrb[5].mxu1  ;;  %v3191_v34 = vadd.f32 %v3190_v60, %v3034_v25  ;;  %3205 = vst [vmem:[%s305_s24 + $0x20] sm:$0xff] %v3120_v19 }
 0x7b8   : > { %v3193_v9 = vadd.f32 %v3192_v29, %v3034_v25  ;;  %3206 = vst [vmem:[%s305_s24 + $0x28] sm:$0xff] %v3122_v15 }
 0x7b9   : > { %3203 = vst [vmem:[%s305_s24 + $0x10] sm:$0xff] %v3191_v34 }
 0x7ba   : > { %3204 = vst.msk [vmem:[%s305_s24 + $0x18] sm:$0xff] %vm349_vm4, %v3193_v9  ;;  %v3196_v16 = vpop.f32.mrb[6].mxu1 }
 0x7bb   : > { %v3197_v54 = vadd.f32 %v3196_v16, %v3039_v24  ;;  %v3198_v23 = vpop.f32.mrb[7].mxu1 }
 0x7bc   : > { %v3199_v22 = vadd.f32 %v3198_v23, %v3039_v24 }
 0x7bd   : > { %3207 = vst [vmem:[%s305_s24 + $0x30] sm:$0xff] %v3197_v54 }
 0x7be   : > { %3208 = vst.msk [vmem:[%s305_s24 + $0x38] sm:$0xff] %vm349_vm4, %v3199_v22 }
 0x7bf PF: > { %s18_s27 = sadd.s32 1, %s3616_s27  }
 0x7c0   : > { %p15_p4 = scmp.ge.s32.totalorder %s18_s27, 4  }
 0x7c2   :  { %17 = sbr.rel (!%p15_p4) target bundleno = 5 (0x5), region = 82 }

</bundles_post_ra>
